<compile_context>
chip_gen: v6e
topology: v6e:2x2x1
jax: 0.10.0
libtpu: 0.0.40
codegen_flags: <defaults>
</compile_context>

<pallas_src>
import jax
import jax.numpy as jnp
from jax import lax
from jax.experimental import pallas as pl
from jax.experimental.pallas import tpu as pltpu

# Set to jnp.bfloat16 to halve the dominant weight DMA (the 1 MiB 512x512 fc matrix) on
# v6e/v7x (f32 MXU accumulation is kept either way).  Left at float32 so the tight 1e-4
# parity check against the f32 lax reference stays meaningful.
MATMUL_DTYPE = jnp.float32


# ----------------------------------------------------------------------------
# Pallas kernels
# ----------------------------------------------------------------------------
def conv1_pool_kernel(p_ref, w_ref, b_ref, o_ref):
    """conv1 as im2col matmul + bias + relu + 2x2 maxpool, whole batch in one block.

    p_ref: (4*B*144, 25)  rows ordered [pool_slot, b, ph, pw], cols = 5*di + dj
    w_ref: (25, 16)       b_ref: (1, 16)
    o_ref: (B*144, 16)    rows ordered [b, ph, pw]
    """
    mm = jnp.dot(p_ref[...], w_ref[...],
                 preferred_element_type=jnp.float32) + b_ref[...]
    act = jnp.maximum(mm, 0.0)                      # relu before pool (commutes with max)
    P = o_ref.shape[0]                              # B*144 -> 8-aligned slice offsets
    o_ref[...] = jnp.maximum(jnp.maximum(act[0:P], act[P:2 * P]),
                             jnp.maximum(act[2 * P:3 * P], act[3 * P:4 * P]))


def conv2_mlp_kernel(p_ref, w2_ref, b2_ref, wfc_ref, bfc_ref, wout_ref, bout_ref,
                     o_ref, pooled_ref):
    """Fused conv2 + bias + relu + 2x2 maxpool + flatten + fc + relu + output.

    p_ref:      (4*16*B, 400) rows ordered [pool_slot, pos, b], cols = (5*di+dj)*16 + ci
    w2_ref:     (400, 32)     b2_ref: (1, 32)
    wfc_ref:    (512, 512)    rows permuted so row = pos*32 + c  (NCHW flatten folded in)
    bfc_ref:    (1, 512)      wout_ref: (512, 10)   bout_ref: (1, 10)
    o_ref:      (B, 10)
    pooled_ref: VMEM scratch (16*B, 32), rows ordered [pos, b]
    """
    B = o_ref.shape[0]
    P = 16 * B
    mm = jnp.dot(p_ref[...], w2_ref[...],
                 preferred_element_type=jnp.float32) + b2_ref[...]
    act = jnp.maximum(mm, 0.0)                      # (4P, 32)
    pooled_ref[...] = jnp.maximum(jnp.maximum(act[0:P], act[P:2 * P]),
                                  jnp.maximum(act[2 * P:3 * P], act[3 * P:4 * P]))

    # fc(512 -> 512): the PyTorch flatten is folded into wfc's row order, so each pooled
    # spatial position `pos` contributes its 32 channels against the matching 32-row
    # block of the permuted weight.  Ref slicing keeps all accesses as plain VMEM loads.
    h = jnp.zeros((B, 512), jnp.float32)
    for pos in range(16):
        blk = pooled_ref[pos * B:(pos + 1) * B, :].astype(wfc_ref.dtype)
        h = h + jnp.dot(blk, wfc_ref[pos * 32:(pos + 1) * 32, :],
                        preferred_element_type=jnp.float32)
    h = jnp.maximum(h + bfc_ref[...], 0.0)
    o_ref[...] = jnp.dot(h.astype(wout_ref.dtype), wout_ref[...],
                         preferred_element_type=jnp.float32) + bout_ref[...]


# ----------------------------------------------------------------------------
# pallas_call wrappers (no grid: single invocation, whole arrays in VMEM)
# ----------------------------------------------------------------------------
def _nbytes(*arrs):
    return int(sum(a.size * a.dtype.itemsize for a in arrs))


def conv1_pool(patches, w1_mat, b1_row, B):
    P = B * 144
    return pl.pallas_call(
        conv1_pool_kernel,
        out_shape=jax.ShapeDtypeStruct((P, 16), jnp.float32),
        cost_estimate=pl.CostEstimate(
            flops=2 * (4 * P) * 25 * 16,
            transcendentals=0,
            bytes_accessed=_nbytes(patches, w1_mat, b1_row) + P * 16 * 4),
    )(patches, w1_mat, b1_row)


def conv2_mlp(patches, w2_mat, b2_row, wfc_mat, bfc_row, wout_mat, bout_row, B):
    flops = 2 * (4 * 16 * B) * 400 * 32 + 2 * B * 512 * 512 + 2 * B * 512 * 10
    return pl.pallas_call(
        conv2_mlp_kernel,
        out_shape=jax.ShapeDtypeStruct((B, 10), jnp.float32),
        scratch_shapes=[pltpu.VMEM((16 * B, 32), jnp.float32)],
        cost_estimate=pl.CostEstimate(
            flops=flops,
            transcendentals=0,
            bytes_accessed=_nbytes(patches, w2_mat, b2_row, wfc_mat, bfc_row,
                                   wout_mat, bout_row) + B * 10 * 4),
    )(patches, w2_mat, b2_row, wfc_mat, bfc_row, wout_mat, bout_row)


# ----------------------------------------------------------------------------
# JAX glue: im2col / layout reshuffles (no FLOPs; fused into the jitted program)
# ----------------------------------------------------------------------------
def im2col_conv1(x):
    """x: (B,1,28,28) -> (4*B*144, 25); row = slot*(B*144) + b*144 + 12*ph + pw."""
    B = x.shape[0]
    taps = [x[:, 0, di:di + 24, dj:dj + 24] for di in range(5) for dj in range(5)]
    p = jnp.stack(taps, axis=-1)                      # (B,24,24,25)  [b, i, j, tap]
    p = p.reshape(B, 12, 2, 12, 2, 25)                # [b, ph, si, pw, sj, tap]
    p = p.transpose(2, 4, 0, 1, 3, 5)                 # [si, sj, b, ph, pw, tap]
    return p.reshape(4 * B * 144, 25)


def im2col_conv2(img):
    """img: (B,12,12,16) -> (4*16*B, 400); row = slot*16*B + (4*ph+pw)*B + b."""
    B = img.shape[0]
    taps = [img[:, di:di + 8, dj:dj + 8, :] for di in range(5) for dj in range(5)]
    p = jnp.stack(taps, axis=3)                       # (B,8,8,25,16) [b, i, j, tap, ci]
    p = p.reshape(B, 4, 2, 4, 2, 25, 16)              # [b, ph, si, pw, sj, tap, ci]
    p = p.transpose(2, 4, 1, 3, 0, 5, 6)              # [si, sj, ph, pw, b, tap, ci]
    return p.reshape(4 * 16 * B, 400)


def prepare_params(params):
    """One-time host-side weight layout prep (transposes, flatten permutation, cast)."""
    w1, b1, w2, b2, wfc, bfc, wout, bout = params
    w1_mat = w1.reshape(16, 25).T.astype(MATMUL_DTYPE)                       # (25,16)
    w2_mat = w2.transpose(2, 3, 1, 0).reshape(400, 32).astype(MATMUL_DTYPE)  # (400,32)
    # PyTorch flatten index is c*16 + (4*ph+pw); our pooled layout is (pos, c) with
    # pos = 4*ph+pw, so permute wfc.T rows to pos*32 + c (flatten folded into weights).
    wfc_mat = (wfc.T.reshape(32, 16, 512).transpose(1, 0, 2)
               .reshape(512, 512).astype(MATMUL_DTYPE))
    wout_mat = wout.T.astype(MATMUL_DTYPE)
    return (w1_mat, b1.reshape(1, 16).astype(jnp.float32),
            w2_mat, b2.reshape(1, 32).astype(jnp.float32),
            wfc_mat, bfc.reshape(1, 512).astype(jnp.float32),
            wout_mat, bout.reshape(1, 10).astype(jnp.float32))


@jax.jit
def model_forward(x, prepped):
    """Full forward: one XLA program = im2col glue + two Pallas kernels."""
    w1_mat, b1_row, w2_mat, b2_row, wfc_mat, bfc_row, wout_mat, bout_row = prepped
    B = x.shape[0]
    p1 = im2col_conv1(x).astype(MATMUL_DTYPE)
    a1 = conv1_pool(p1, w1_mat, b1_row, B)            # (B*144, 16), rows [b, ph, pw]
    img = a1.reshape(B, 12, 12, 16)                   # contiguous reshape (free)
    p2 = im2col_conv2(img).astype(MATMUL_DTYPE)
    return conv2_mlp(p2, w2_mat, b2_row, wfc_mat, bfc_row, wout_mat, bout_row, B)


# ----------------------------------------------------------------------------
# Pure-JAX reference (mirrors the PyTorch forward) for the correctness check
# ----------------------------------------------------------------------------
@jax.jit
def reference_forward(x, params):
    w1, b1, w2, b2, wfc, bfc, wout, bout = params
    dn = ("NCHW", "OIHW", "NCHW")
    y = lax.conv_general_dilated(x, w1, (1, 1), "VALID", dimension_numbers=dn)
    y = jax.nn.relu(y + b1[None, :, None, None])
    y = lax.reduce_window(y, -jnp.inf, lax.max, (1, 1, 2, 2), (1, 1, 2, 2), "VALID")
    y = lax.conv_general_dilated(y, w2, (1, 1), "VALID", dimension_numbers=dn)
    y = jax.nn.relu(y + b2[None, :, None, None])
    y = lax.reduce_window(y, -jnp.inf, lax.max, (1, 1, 2, 2), (1, 1, 2, 2), "VALID")
    y = y.reshape(x.shape[0], 512)
    y = jax.nn.relu(y @ wfc.T + bfc)
    return y @ wout.T + bout


# ----------------------------------------------------------------------------
# Main
# ----------------------------------------------------------------------------
if __name__ == "__main__":
    key = jax.random.PRNGKey(0)
    ks = jax.random.split(key, 9)

    def uinit(k, shape, fan_in):
        bound = float(fan_in) ** -0.5
        return jax.random.uniform(k, shape, jnp.float32, -bound, bound)

    w1 = uinit(ks[0], (16, 1, 5, 5), 25)
    b1 = uinit(ks[1], (16,), 25)
    w2 = uinit(ks[2], (32, 16, 5, 5), 400)
    b2 = uinit(ks[3], (32,), 400)
    wfc = uinit(ks[4], (512, 512), 512)
    bfc = uinit(ks[5], (512,), 512)
    wout = uinit(ks[6], (10, 512), 512)
    bout = uinit(ks[7], (10,), 512)
    params = (w1, b1, w2, b2, wfc, bfc, wout, bout)

    # batch=2, MNIST-shaped input (28x28 is required by the 32*4*4 flatten in the module)
    x = jax.random.normal(ks[8], (2, 1, 28, 28), jnp.float32)

    prepped = prepare_params(params)
    out = jax.block_until_ready(model_forward(x, prepped))
    ref = jax.block_until_ready(reference_forward(x, params))

    assert out.shape == (2, 10), out.shape
    max_err = float(jnp.max(jnp.abs(out - ref)))
    assert max_err < 1e-4, f"mismatch vs reference: {max_err}"

    print("KERNEL_OK")
</pallas_src>

<mosaic_0001>
module attributes {stable_mosaic.version = 11 : i64} {
  func.func @conv1_pool_kernel(%arg0: memref<1152x25xf32, #tpu.memory_space<vmem>>, %arg1: memref<25x16xf32, #tpu.memory_space<vmem>>, %arg2: memref<1x16xf32, #tpu.memory_space<vmem>>, %arg3: memref<288x16xf32, #tpu.memory_space<vmem>>) attributes {dimension_semantics = [], scalar_prefetch = 0 : i64, scratch_operands = 0 : i64, tpu.core_type = #tpu.core_type<tc>} {
    %c0 = arith.constant 0 : index
    %c0_0 = arith.constant 0 : index
    %0 = vector.load %arg0[%c0, %c0_0] : memref<1152x25xf32, #tpu.memory_space<vmem>>, vector<1152x25xf32>
    %c0_1 = arith.constant 0 : index
    %c0_2 = arith.constant 0 : index
    %1 = vector.load %arg1[%c0_1, %c0_2] : memref<25x16xf32, #tpu.memory_space<vmem>>, vector<25x16xf32>
    %cst = arith.constant dense<0.000000e+00> : vector<1152x16xf32>
    %2 = tpu.matmul %0, %1, %cst {dimension_numbers = #tpu.dot_dimension_numbers<[1], [0], [0], [1], [0, 0, 1, 1], [], []>} : vector<1152x25xf32>, vector<25x16xf32>, vector<1152x16xf32> -> vector<1152x16xf32>
    %c0_3 = arith.constant 0 : index
    %c0_4 = arith.constant 0 : index
    %3 = vector.load %arg2[%c0_3, %c0_4] : memref<1x16xf32, #tpu.memory_space<vmem>>, vector<1x16xf32>
    %4 = vector.broadcast %3 : vector<1x16xf32> to vector<1152x16xf32>
    %5 = arith.addf %2, %4 : vector<1152x16xf32>
    %cst_5 = arith.constant 0.000000e+00 : f32
    %6 = vector.broadcast %cst_5 : f32 to vector<1152x16xf32>
    %7 = arith.maximumf %5, %6 : vector<1152x16xf32>
    %8 = vector.extract_strided_slice %7 {offsets = [0, 0], sizes = [288, 16], strides = [1, 1]} : vector<1152x16xf32> to vector<288x16xf32>
    %9 = vector.extract_strided_slice %7 {offsets = [288, 0], sizes = [288, 16], strides = [1, 1]} : vector<1152x16xf32> to vector<288x16xf32>
    %10 = arith.maximumf %8, %9 : vector<288x16xf32>
    %11 = vector.extract_strided_slice %7 {offsets = [576, 0], sizes = [288, 16], strides = [1, 1]} : vector<1152x16xf32> to vector<288x16xf32>
    %12 = vector.extract_strided_slice %7 {offsets = [864, 0], sizes = [288, 16], strides = [1, 1]} : vector<1152x16xf32> to vector<288x16xf32>
    %13 = arith.maximumf %11, %12 : vector<288x16xf32>
    %14 = arith.maximumf %10, %13 : vector<288x16xf32>
    %c0_6 = arith.constant 0 : index
    %c0_7 = arith.constant 0 : index
    %15 = vector.load %arg3[%c0_6, %c0_7] : memref<288x16xf32, #tpu.memory_space<vmem>>, vector<288x16xf32>
    tpu.vector_store %arg3[%c0_6, %c0_7], %14 {strides = array<i32>} : memref<288x16xf32, #tpu.memory_space<vmem>>, vector<288x16xf32>,
    return
  }
}

module attributes {stable_mosaic.version = 11 : i64} {
  func.func @conv2_mlp_kernel(%arg0: memref<128x400xf32, #tpu.memory_space<vmem>>, %arg1: memref<400x32xf32, #tpu.memory_space<vmem>>, %arg2: memref<1x32xf32, #tpu.memory_space<vmem>>, %arg3: memref<512x512xf32, #tpu.memory_space<vmem>>, %arg4: memref<1x512xf32, #tpu.memory_space<vmem>>, %arg5: memref<512x10xf32, #tpu.memory_space<vmem>>, %arg6: memref<1x10xf32, #tpu.memory_space<vmem>>, %arg7: memref<2x10xf32, #tpu.memory_space<vmem>>, %arg8: memref<32x32xf32, #tpu.memory_space<vmem>>) attributes {dimension_semantics = [], scalar_prefetch = 0 : i64, scratch_operands = 1 : i64, tpu.core_type = #tpu.core_type<tc>} {
    %c0 = arith.constant 0 : index
    %c0_0 = arith.constant 0 : index
    %0 = vector.load %arg0[%c0, %c0_0] : memref<128x400xf32, #tpu.memory_space<vmem>>, vector<128x400xf32>
    %c0_1 = arith.constant 0 : index
    %c0_2 = arith.constant 0 : index
    %1 = vector.load %arg1[%c0_1, %c0_2] : memref<400x32xf32, #tpu.memory_space<vmem>>, vector<400x32xf32>
    %cst = arith.constant dense<0.000000e+00> : vector<128x32xf32>
    %2 = tpu.matmul %0, %1, %cst {dimension_numbers = #tpu.dot_dimension_numbers<[1], [0], [0], [1], [0, 0, 1, 1], [], []>} : vector<128x400xf32>, vector<400x32xf32>, vector<128x32xf32> -> vector<128x32xf32>
    %c0_3 = arith.constant 0 : index
    %c0_4 = arith.constant 0 : index
    %3 = vector.load %arg2[%c0_3, %c0_4] : memref<1x32xf32, #tpu.memory_space<vmem>>, vector<1x32xf32>
    %4 = vector.broadcast %3 : vector<1x32xf32> to vector<128x32xf32>
    %5 = arith.addf %2, %4 : vector<128x32xf32>
    %cst_5 = arith.constant 0.000000e+00 : f32
    %6 = vector.broadcast %cst_5 : f32 to vector<128x32xf32>
    %7 = arith.maximumf %5, %6 : vector<128x32xf32>
    %8 = vector.extract_strided_slice %7 {offsets = [0, 0], sizes = [32, 32], strides = [1, 1]} : vector<128x32xf32> to vector<32x32xf32>
    %9 = vector.extract_strided_slice %7 {offsets = [32, 0], sizes = [32, 32], strides = [1, 1]} : vector<128x32xf32> to vector<32x32xf32>
    %10 = arith.maximumf %8, %9 : vector<32x32xf32>
    %11 = vector.extract_strided_slice %7 {offsets = [64, 0], sizes = [32, 32], strides = [1, 1]} : vector<128x32xf32> to vector<32x32xf32>
    %12 = vector.extract_strided_slice %7 {offsets = [96, 0], sizes = [32, 32], strides = [1, 1]} : vector<128x32xf32> to vector<32x32xf32>
    %13 = arith.maximumf %11, %12 : vector<32x32xf32>
    %14 = arith.maximumf %10, %13 : vector<32x32xf32>
    %c0_6 = arith.constant 0 : index
    %c0_7 = arith.constant 0 : index
    %15 = vector.load %arg8[%c0_6, %c0_7] : memref<32x32xf32, #tpu.memory_space<vmem>>, vector<32x32xf32>
    tpu.vector_store %arg8[%c0_6, %c0_7], %14 {strides = array<i32>} : memref<32x32xf32, #tpu.memory_space<vmem>>, vector<32x32xf32>,
    %cst_8 = arith.constant 0.000000e+00 : f32
    %16 = vector.broadcast %cst_8 : f32 to vector<2x512xf32>
    %c0_9 = arith.constant 0 : index
    %c0_10 = arith.constant 0 : index
    %17 = vector.load %arg8[%c0_9, %c0_10] : memref<32x32xf32, #tpu.memory_space<vmem>>, vector<2x32xf32>
    %c0_11 = arith.constant 0 : index
    %c0_12 = arith.constant 0 : index
    %18 = vector.load %arg3[%c0_11, %c0_12] : memref<512x512xf32, #tpu.memory_space<vmem>>, vector<32x512xf32>
    %cst_13 = arith.constant dense<0.000000e+00> : vector<2x512xf32>
    %19 = tpu.matmul %17, %18, %cst_13 {dimension_numbers = #tpu.dot_dimension_numbers<[1], [0], [0], [1], [0, 0, 1, 1], [], []>} : vector<2x32xf32>, vector<32x512xf32>, vector<2x512xf32> -> vector<2x512xf32>
    %20 = arith.addf %16, %19 : vector<2x512xf32>
    %c2 = arith.constant 2 : index
    %c0_14 = arith.constant 0 : index
    %21 = vector.load %arg8[%c2, %c0_14] : memref<32x32xf32, #tpu.memory_space<vmem>>, vector<2x32xf32>
    %c32 = arith.constant 32 : index
    %c0_15 = arith.constant 0 : index
    %22 = vector.load %arg3[%c32, %c0_15] : memref<512x512xf32, #tpu.memory_space<vmem>>, vector<32x512xf32>
    %cst_16 = arith.constant dense<0.000000e+00> : vector<2x512xf32>
    %23 = tpu.matmul %21, %22, %cst_16 {dimension_numbers = #tpu.dot_dimension_numbers<[1], [0], [0], [1], [0, 0, 1, 1], [], []>} : vector<2x32xf32>, vector<32x512xf32>, vector<2x512xf32> -> vector<2x512xf32>
    %24 = arith.addf %20, %23 : vector<2x512xf32>
    %c4 = arith.constant 4 : index
    %c0_17 = arith.constant 0 : index
    %25 = vector.load %arg8[%c4, %c0_17] : memref<32x32xf32, #tpu.memory_space<vmem>>, vector<2x32xf32>
    %c64 = arith.constant 64 : index
    %c0_18 = arith.constant 0 : index
    %26 = vector.load %arg3[%c64, %c0_18] : memref<512x512xf32, #tpu.memory_space<vmem>>, vector<32x512xf32>
    %cst_19 = arith.constant dense<0.000000e+00> : vector<2x512xf32>
    %27 = tpu.matmul %25, %26, %cst_19 {dimension_numbers = #tpu.dot_dimension_numbers<[1], [0], [0], [1], [0, 0, 1, 1], [], []>} : vector<2x32xf32>, vector<32x512xf32>, vector<2x512xf32> -> vector<2x512xf32>
    %28 = arith.addf %24, %27 : vector<2x512xf32>
    %c6 = arith.constant 6 : index
    %c0_20 = arith.constant 0 : index
    %29 = vector.load %arg8[%c6, %c0_20] : memref<32x32xf32, #tpu.memory_space<vmem>>, vector<2x32xf32>
    %c96 = arith.constant 96 : index
    %c0_21 = arith.constant 0 : index
    %30 = vector.load %arg3[%c96, %c0_21] : memref<512x512xf32, #tpu.memory_space<vmem>>, vector<32x512xf32>
    %cst_22 = arith.constant dense<0.000000e+00> : vector<2x512xf32>
    %31 = tpu.matmul %29, %30, %cst_22 {dimension_numbers = #tpu.dot_dimension_numbers<[1], [0], [0], [1], [0, 0, 1, 1], [], []>} : vector<2x32xf32>, vector<32x512xf32>, vector<2x512xf32> -> vector<2x512xf32>
    %32 = arith.addf %28, %31 : vector<2x512xf32>
    %c8 = arith.constant 8 : index
    %c0_23 = arith.constant 0 : index
    %33 = vector.load %arg8[%c8, %c0_23] : memref<32x32xf32, #tpu.memory_space<vmem>>, vector<2x32xf32>
    %c128 = arith.constant 128 : index
    %c0_24 = arith.constant 0 : index
    %34 = vector.load %arg3[%c128, %c0_24] : memref<512x512xf32, #tpu.memory_space<vmem>>, vector<32x512xf32>
    %cst_25 = arith.constant dense<0.000000e+00> : vector<2x512xf32>
    %35 = tpu.matmul %33, %34, %cst_25 {dimension_numbers = #tpu.dot_dimension_numbers<[1], [0], [0], [1], [0, 0, 1, 1], [], []>} : vector<2x32xf32>, vector<32x512xf32>, vector<2x512xf32> -> vector<2x512xf32>
    %36 = arith.addf %32, %35 : vector<2x512xf32>
    %c10 = arith.constant 10 : index
    %c0_26 = arith.constant 0 : index
    %37 = vector.load %arg8[%c10, %c0_26] : memref<32x32xf32, #tpu.memory_space<vmem>>, vector<2x32xf32>
    %c160 = arith.constant 160 : index
    %c0_27 = arith.constant 0 : index
    %38 = vector.load %arg3[%c160, %c0_27] : memref<512x512xf32, #tpu.memory_space<vmem>>, vector<32x512xf32>
    %cst_28 = arith.constant dense<0.000000e+00> : vector<2x512xf32>
    %39 = tpu.matmul %37, %38, %cst_28 {dimension_numbers = #tpu.dot_dimension_numbers<[1], [0], [0], [1], [0, 0, 1, 1], [], []>} : vector<2x32xf32>, vector<32x512xf32>, vector<2x512xf32> -> vector<2x512xf32>
    %40 = arith.addf %36, %39 : vector<2x512xf32>
    %c12 = arith.constant 12 : index
    %c0_29 = arith.constant 0 : index
    %41 = vector.load %arg8[%c12, %c0_29] : memref<32x32xf32, #tpu.memory_space<vmem>>, vector<2x32xf32>
    %c192 = arith.constant 192 : index
    %c0_30 = arith.constant 0 : index
    %42 = vector.load %arg3[%c192, %c0_30] : memref<512x512xf32, #tpu.memory_space<vmem>>, vector<32x512xf32>
    %cst_31 = arith.constant dense<0.000000e+00> : vector<2x512xf32>
    %43 = tpu.matmul %41, %42, %cst_31 {dimension_numbers = #tpu.dot_dimension_numbers<[1], [0], [0], [1], [0, 0, 1, 1], [], []>} : vector<2x32xf32>, vector<32x512xf32>, vector<2x512xf32> -> vector<2x512xf32>
    %44 = arith.addf %40, %43 : vector<2x512xf32>
    %c14 = arith.constant 14 : index
    %c0_32 = arith.constant 0 : index
    %45 = vector.load %arg8[%c14, %c0_32] : memref<32x32xf32, #tpu.memory_space<vmem>>, vector<2x32xf32>
    %c224 = arith.constant 224 : index
    %c0_33 = arith.constant 0 : index
    %46 = vector.load %arg3[%c224, %c0_33] : memref<512x512xf32, #tpu.memory_space<vmem>>, vector<32x512xf32>
    %cst_34 = arith.constant dense<0.000000e+00> : vector<2x512xf32>
    %47 = tpu.matmul %45, %46, %cst_34 {dimension_numbers = #tpu.dot_dimension_numbers<[1], [0], [0], [1], [0, 0, 1, 1], [], []>} : vector<2x32xf32>, vector<32x512xf32>, vector<2x512xf32> -> vector<2x512xf32>
    %48 = arith.addf %44, %47 : vector<2x512xf32>
    %c16 = arith.constant 16 : index
    %c0_35 = arith.constant 0 : index
    %49 = vector.load %arg8[%c16, %c0_35] : memref<32x32xf32, #tpu.memory_space<vmem>>, vector<2x32xf32>
    %c256 = arith.constant 256 : index
    %c0_36 = arith.constant 0 : index
    %50 = vector.load %arg3[%c256, %c0_36] : memref<512x512xf32, #tpu.memory_space<vmem>>, vector<32x512xf32>
    %cst_37 = arith.constant dense<0.000000e+00> : vector<2x512xf32>
    %51 = tpu.matmul %49, %50, %cst_37 {dimension_numbers = #tpu.dot_dimension_numbers<[1], [0], [0], [1], [0, 0, 1, 1], [], []>} : vector<2x32xf32>, vector<32x512xf32>, vector<2x512xf32> -> vector<2x512xf32>
    %52 = arith.addf %48, %51 : vector<2x512xf32>
    %c18 = arith.constant 18 : index
    %c0_38 = arith.constant 0 : index
    %53 = vector.load %arg8[%c18, %c0_38] : memref<32x32xf32, #tpu.memory_space<vmem>>, vector<2x32xf32>
    %c288 = arith.constant 288 : index
    %c0_39 = arith.constant 0 : index
    %54 = vector.load %arg3[%c288, %c0_39] : memref<512x512xf32, #tpu.memory_space<vmem>>, vector<32x512xf32>
    %cst_40 = arith.constant dense<0.000000e+00> : vector<2x512xf32>
    %55 = tpu.matmul %53, %54, %cst_40 {dimension_numbers = #tpu.dot_dimension_numbers<[1], [0], [0], [1], [0, 0, 1, 1], [], []>} : vector<2x32xf32>, vector<32x512xf32>, vector<2x512xf32> -> vector<2x512xf32>
    %56 = arith.addf %52, %55 : vector<2x512xf32>
    %c20 = arith.constant 20 : index
    %c0_41 = arith.constant 0 : index
    %57 = vector.load %arg8[%c20, %c0_41] : memref<32x32xf32, #tpu.memory_space<vmem>>, vector<2x32xf32>
    %c320 = arith.constant 320 : index
    %c0_42 = arith.constant 0 : index
    %58 = vector.load %arg3[%c320, %c0_42] : memref<512x512xf32, #tpu.memory_space<vmem>>, vector<32x512xf32>
    %cst_43 = arith.constant dense<0.000000e+00> : vector<2x512xf32>
    %59 = tpu.matmul %57, %58, %cst_43 {dimension_numbers = #tpu.dot_dimension_numbers<[1], [0], [0], [1], [0, 0, 1, 1], [], []>} : vector<2x32xf32>, vector<32x512xf32>, vector<2x512xf32> -> vector<2x512xf32>
    %60 = arith.addf %56, %59 : vector<2x512xf32>
    %c22 = arith.constant 22 : index
    %c0_44 = arith.constant 0 : index
    %61 = vector.load %arg8[%c22, %c0_44] : memref<32x32xf32, #tpu.memory_space<vmem>>, vector<2x32xf32>
    %c352 = arith.constant 352 : index
    %c0_45 = arith.constant 0 : index
    %62 = vector.load %arg3[%c352, %c0_45] : memref<512x512xf32, #tpu.memory_space<vmem>>, vector<32x512xf32>
    %cst_46 = arith.constant dense<0.000000e+00> : vector<2x512xf32>
    %63 = tpu.matmul %61, %62, %cst_46 {dimension_numbers = #tpu.dot_dimension_numbers<[1], [0], [0], [1], [0, 0, 1, 1], [], []>} : vector<2x32xf32>, vector<32x512xf32>, vector<2x512xf32> -> vector<2x512xf32>
    %64 = arith.addf %60, %63 : vector<2x512xf32>
    %c24 = arith.constant 24 : index
    %c0_47 = arith.constant 0 : index
    %65 = vector.load %arg8[%c24, %c0_47] : memref<32x32xf32, #tpu.memory_space<vmem>>, vector<2x32xf32>
    %c384 = arith.constant 384 : index
    %c0_48 = arith.constant 0 : index
    %66 = vector.load %arg3[%c384, %c0_48] : memref<512x512xf32, #tpu.memory_space<vmem>>, vector<32x512xf32>
    %cst_49 = arith.constant dense<0.000000e+00> : vector<2x512xf32>
    %67 = tpu.matmul %65, %66, %cst_49 {dimension_numbers = #tpu.dot_dimension_numbers<[1], [0], [0], [1], [0, 0, 1, 1], [], []>} : vector<2x32xf32>, vector<32x512xf32>, vector<2x512xf32> -> vector<2x512xf32>
    %68 = arith.addf %64, %67 : vector<2x512xf32>
    %c26 = arith.constant 26 : index
    %c0_50 = arith.constant 0 : index
    %69 = vector.load %arg8[%c26, %c0_50] : memref<32x32xf32, #tpu.memory_space<vmem>>, vector<2x32xf32>
    %c416 = arith.constant 416 : index
    %c0_51 = arith.constant 0 : index
    %70 = vector.load %arg3[%c416, %c0_51] : memref<512x512xf32, #tpu.memory_space<vmem>>, vector<32x512xf32>
    %cst_52 = arith.constant dense<0.000000e+00> : vector<2x512xf32>
    %71 = tpu.matmul %69, %70, %cst_52 {dimension_numbers = #tpu.dot_dimension_numbers<[1], [0], [0], [1], [0, 0, 1, 1], [], []>} : vector<2x32xf32>, vector<32x512xf32>, vector<2x512xf32> -> vector<2x512xf32>
    %72 = arith.addf %68, %71 : vector<2x512xf32>
    %c28 = arith.constant 28 : index
    %c0_53 = arith.constant 0 : index
    %73 = vector.load %arg8[%c28, %c0_53] : memref<32x32xf32, #tpu.memory_space<vmem>>, vector<2x32xf32>
    %c448 = arith.constant 448 : index
    %c0_54 = arith.constant 0 : index
    %74 = vector.load %arg3[%c448, %c0_54] : memref<512x512xf32, #tpu.memory_space<vmem>>, vector<32x512xf32>
    %cst_55 = arith.constant dense<0.000000e+00> : vector<2x512xf32>
    %75 = tpu.matmul %73, %74, %cst_55 {dimension_numbers = #tpu.dot_dimension_numbers<[1], [0], [0], [1], [0, 0, 1, 1], [], []>} : vector<2x32xf32>, vector<32x512xf32>, vector<2x512xf32> -> vector<2x512xf32>
    %76 = arith.addf %72, %75 : vector<2x512xf32>
    %c30 = arith.constant 30 : index
    %c0_56 = arith.constant 0 : index
    %77 = vector.load %arg8[%c30, %c0_56] : memref<32x32xf32, #tpu.memory_space<vmem>>, vector<2x32xf32>
    %c480 = arith.constant 480 : index
    %c0_57 = arith.constant 0 : index
    %78 = vector.load %arg3[%c480, %c0_57] : memref<512x512xf32, #tpu.memory_space<vmem>>, vector<32x512xf32>
    %cst_58 = arith.constant dense<0.000000e+00> : vector<2x512xf32>
    %79 = tpu.matmul %77, %78, %cst_58 {dimension_numbers = #tpu.dot_dimension_numbers<[1], [0], [0], [1], [0, 0, 1, 1], [], []>} : vector<2x32xf32>, vector<32x512xf32>, vector<2x512xf32> -> vector<2x512xf32>
    %80 = arith.addf %76, %79 : vector<2x512xf32>
    %c0_59 = arith.constant 0 : index
    %c0_60 = arith.constant 0 : index
    %81 = vector.load %arg4[%c0_59, %c0_60] : memref<1x512xf32, #tpu.memory_space<vmem>>, vector<1x512xf32>
    %82 = vector.broadcast %81 : vector<1x512xf32> to vector<2x512xf32>
    %83 = arith.addf %80, %82 : vector<2x512xf32>
    %cst_61 = arith.constant 0.000000e+00 : f32
    %84 = vector.broadcast %cst_61 : f32 to vector<2x512xf32>
    %85 = arith.maximumf %83, %84 : vector<2x512xf32>
    %c0_62 = arith.constant 0 : index
    %c0_63 = arith.constant 0 : index
    %86 = vector.load %arg5[%c0_62, %c0_63] : memref<512x10xf32, #tpu.memory_space<vmem>>, vector<512x10xf32>
    %cst_64 = arith.constant dense<0.000000e+00> : vector<2x10xf32>
    %87 = tpu.matmul %85, %86, %cst_64 {dimension_numbers = #tpu.dot_dimension_numbers<[1], [0], [0], [1], [0, 0, 1, 1], [], []>} : vector<2x512xf32>, vector<512x10xf32>, vector<2x10xf32> -> vector<2x10xf32>
    %c0_65 = arith.constant 0 : index
    %c0_66 = arith.constant 0 : index
    %88 = vector.load %arg6[%c0_65, %c0_66] : memref<1x10xf32, #tpu.memory_space<vmem>>, vector<1x10xf32>
    %89 = vector.broadcast %88 : vector<1x10xf32> to vector<2x10xf32>
    %90 = arith.addf %87, %89 : vector<2x10xf32>
    %c0_67 = arith.constant 0 : index
    %c0_68 = arith.constant 0 : index
    %91 = vector.load %arg7[%c0_67, %c0_68] : memref<2x10xf32, #tpu.memory_space<vmem>>, vector<2x10xf32>
    tpu.vector_store %arg7[%c0_67, %c0_68], %90 {strides = array<i32>} : memref<2x10xf32, #tpu.memory_space<vmem>>, vector<2x10xf32>,
    return
  }
}

</mosaic_0001>

<bundles_post_ra>
// kernel: model_forward.2
= control target key start
LH: loop header
LB: loop body
LE: loop exit
PB: predicated region body
PF: predicated region fallthrough
CT: control target
= control target key end

     0   :  { %vm602_vm0 = vcmask 1040384   ;;  %vm169_vm1 = vcmask 203776   ;;  %vm1643_vm2 = vcmask 130048   ;;  %s3636_s1 = inlined_call_operand.vmem [shape: f32[25,16], index: 1, kind: input, shape index: {}]   ;;  %s3637_s0 = inlined_call_operand.vmem [shape: f32[1152,25], index: 0, kind: input, shape index: {}]   ;;  %s3638_s2 = inlined_call_operand.vmem [shape: f32[1,16], index: 2, kind: input, shape index: {}]   ;;  %s3639_s3 = inlined_call_operand.vmem [shape: f32[288,16], index: 3, kind: output, shape index: {}]  }
   0x1   :  { %v161_v0 = vld [vmem:[%s3636_s1 + $0x18] sm:$0x1]  ;;  %v160_v1 = vld [vmem:[%s3636_s1 + $0x10] sm:$0xff]  ;;  %v159_v2 = vld [vmem:[%s3636_s1 + $0x8] sm:$0xff] }
   0x2   :  { %1978 = vmatprep.subr.msk.mxu0 %vm602_vm0, %v161_v0  ;;  %2202 = vmatprep.subr.msk.mxu1 %vm602_vm0, %v161_v0  ;;  %v158_v3 = vld [vmem:[%s3636_s1] sm:$0xff]  ;;  %v15_v6 = vld [vmem:[%s3637_s0 + $0x8] sm:$0xff]  ;;  %v16_v8 = vld [vmem:[%s3637_s0 + $0x10] sm:$0xff] }
   0x3   :  { %1979 = vmatpush3.msk.msra.mxu0 %vm602_vm0, %v161_v0  ;;  %2206 = vmatpush3.msk.msra.mxu1 %vm602_vm0, %v161_v0  ;;  %v14_v4 = vld [vmem:[%s3637_s0] sm:$0xff]  ;;  %v87_v7 = vld [vmem:[%s3637_s0 + $0x248] sm:$0xff]  ;;  %v88_v9 = vld [vmem:[%s3637_s0 + $0x250] sm:$0xff] }
   0x4   :  { %1980 = vmatprep.subr.mxu0 %v160_v1  ;;  %2203 = vmatprep.subr.mxu1 %v160_v1  ;;  %v86_v5 = vld [vmem:[%s3637_s0 + $0x240] sm:$0xff]  ;;  %v17_v10 = vld [vmem:[%s3637_s0 + $0x18] sm:$0xff]  ;;  %v19_v14 = vld [vmem:[%s3637_s0 + $0x28] sm:$0xff] }
   0x5   :  { %1981 = vmatpush3.msra.mxu0 %v160_v1  ;;  %2207 = vmatpush3.msra.mxu1 %v160_v1  ;;  %v89_v11 = vld [vmem:[%s3637_s0 + $0x258] sm:$0xff]  ;;  %v18_v12 = vld [vmem:[%s3637_s0 + $0x20] sm:$0xff]  ;;  %v91_v15 = vld [vmem:[%s3637_s0 + $0x268] sm:$0xff] }
   0x6   :  { %1982 = vmatprep.subr.mxu0 %v159_v2  ;;  %2204 = vmatprep.subr.mxu1 %v159_v2  ;;  %v90_v13 = vld [vmem:[%s3637_s0 + $0x260] sm:$0xff]  ;;  %v20_v16 = vld [vmem:[%s3637_s0 + $0x30] sm:$0xff]  ;;  %v21_v18 = vld [vmem:[%s3637_s0 + $0x38] sm:$0xff] }
   0x7   :  { %1983 = vmatpush3.msra.mxu0 %v159_v2  ;;  %2208 = vmatpush3.msra.mxu1 %v159_v2  ;;  %v92_v17 = vld [vmem:[%s3637_s0 + $0x270] sm:$0xff]  ;;  %v93_v19 = vld [vmem:[%s3637_s0 + $0x278] sm:$0xff]  ;;  %v22_v20 = vld [vmem:[%s3637_s0 + $0x40] sm:$0xff] }
   0x8   :  { %1984 = vmatprep.subr.mxu0 %v158_v3  ;;  %2205 = vmatprep.subr.mxu1 %v158_v3  ;;  %v94_v21 = vld [vmem:[%s3637_s0 + $0x280] sm:$0xff]  ;;  %v23_v22 = vld [vmem:[%s3637_s0 + $0x48] sm:$0xff]  ;;  %v24_v24 = vld [vmem:[%s3637_s0 + $0x50] sm:$0xff] }
   0x9   :  { %1985 = vmatpush3.msra.mxu0 %v158_v3  ;;  %2209 = vmatpush3.msra.mxu1 %v158_v3  ;;  %v95_v23 = vld [vmem:[%s3637_s0 + $0x288] sm:$0xff]  ;;  %v96_v25 = vld [vmem:[%s3637_s0 + $0x290] sm:$0xff]  ;;  %v25_v26 = vld [vmem:[%s3637_s0 + $0x58] sm:$0xff] }
   0xa   :  { %1986 = vmatprep.mubr.msk.f32.mxu0 %vm169_vm1, %v14_v4  ;;  %2094 = vmatprep.mubr.msk.f32.mxu1 %vm169_vm1, %v86_v5  ;;  %v97_v27 = vld [vmem:[%s3637_s0 + $0x298] sm:$0xff]  ;;  %v26_v28 = vld [vmem:[%s3637_s0 + $0x60] sm:$0xff]  ;;  %v27_v30 = vld [vmem:[%s3637_s0 + $0x68] sm:$0xff] }
   0xb   :  { %1987 = vmatmul.mubr.msk.f32.vlgmr.msra.gmra.mxu0 %vm169_vm1, %v15_v6  ;;  %2095 = vmatmul.mubr.msk.f32.vlgmr.msra.gmra.mxu1 %vm169_vm1, %v87_v7  ;;  %v98_v29 = vld [vmem:[%s3637_s0 + $0x2a0] sm:$0xff]  ;;  %v99_v31 = vld [vmem:[%s3637_s0 + $0x2a8] sm:$0xff]  ;;  %v28_v32 = vld [vmem:[%s3637_s0 + $0x70] sm:$0xff] }
   0xc   :  { %1989 = vmatprep.mubr.msk.f32.mxu0 %vm169_vm1, %v16_v8  ;;  %2097 = vmatprep.mubr.msk.f32.mxu1 %vm169_vm1, %v88_v9  ;;  %v100_v33 = vld [vmem:[%s3637_s0 + $0x2b0] sm:$0xff]  ;;  %v29_v34 = vld [vmem:[%s3637_s0 + $0x78] sm:$0xff]  ;;  %v30_v36 = vld [vmem:[%s3637_s0 + $0x80] sm:$0xff] }
   0xd   :  { %v101_v35 = vld [vmem:[%s3637_s0 + $0x2b8] sm:$0xff]  ;;  %v102_v37 = vld [vmem:[%s3637_s0 + $0x2c0] sm:$0xff]  ;;  %v31_v38 = vld [vmem:[%s3637_s0 + $0x88] sm:$0xff] }
   0xe   :  { %v103_v39 = vld [vmem:[%s3637_s0 + $0x2c8] sm:$0xff]  ;;  %v32_v40 = vld [vmem:[%s3637_s0 + $0x90] sm:$0xff]  ;;  %v33_v42 = vld [vmem:[%s3637_s0 + $0x98] sm:$0xff] }
   0xf   :  { %1990 = vmatmul.mubr.msk.f32.gmra.mxu0 %vm169_vm1, %v17_v10  ;;  %2098 = vmatmul.mubr.msk.f32.gmra.mxu1 %vm169_vm1, %v89_v11  ;;  %v104_v41 = vld [vmem:[%s3637_s0 + $0x2d0] sm:$0xff]  ;;  %v105_v43 = vld [vmem:[%s3637_s0 + $0x2d8] sm:$0xff]  ;;  %v34_v44 = vld [vmem:[%s3637_s0 + $0xa0] sm:$0xff] }
  0x10   :  { %1992 = vmatprep.mubr.msk.f32.mxu0 %vm169_vm1, %v18_v12  ;;  %2100 = vmatprep.mubr.msk.f32.mxu1 %vm169_vm1, %v90_v13  ;;  %v106_v45 = vld [vmem:[%s3637_s0 + $0x2e0] sm:$0xff]  ;;  %v35_v46 = vld [vmem:[%s3637_s0 + $0xa8] sm:$0xff]  ;;  %v36_v48 = vld [vmem:[%s3637_s0 + $0xb0] sm:$0xff] }
  0x11   :  { %v107_v47 = vld [vmem:[%s3637_s0 + $0x2e8] sm:$0xff]  ;;  %v108_v49 = vld [vmem:[%s3637_s0 + $0x2f0] sm:$0xff]  ;;  %v37_v50 = vld [vmem:[%s3637_s0 + $0xb8] sm:$0xff] }
  0x12   :  { %v109_v51 = vld [vmem:[%s3637_s0 + $0x2f8] sm:$0xff]  ;;  %v38_v52 = vld [vmem:[%s3637_s0 + $0xc0] sm:$0xff]  ;;  %v39_v54 = vld [vmem:[%s3637_s0 + $0xc8] sm:$0xff] }
  0x13   :  { %1993 = vmatmul.mubr.msk.f32.gmra.mxu0 %vm169_vm1, %v19_v14  ;;  %2101 = vmatmul.mubr.msk.f32.gmra.mxu1 %vm169_vm1, %v91_v15  ;;  %v110_v53 = vld [vmem:[%s3637_s0 + $0x300] sm:$0xff]  ;;  %v111_v55 = vld [vmem:[%s3637_s0 + $0x308] sm:$0xff]  ;;  %v40_v56 = vld [vmem:[%s3637_s0 + $0xd0] sm:$0xff] }
  0x14   :  { %1995 = vmatprep.mubr.msk.f32.mxu0 %vm169_vm1, %v20_v16  ;;  %2103 = vmatprep.mubr.msk.f32.mxu1 %vm169_vm1, %v92_v17  ;;  %v112_v57 = vld [vmem:[%s3637_s0 + $0x310] sm:$0xff]  ;;  %v41_v58 = vld [vmem:[%s3637_s0 + $0xd8] sm:$0xff]  ;;  %v42_v60 = vld [vmem:[%s3637_s0 + $0xe0] sm:$0xff] }
  0x15   :  { %v113_v59 = vld [vmem:[%s3637_s0 + $0x318] sm:$0xff]  ;;  %v114_v61 = vld [vmem:[%s3637_s0 + $0x320] sm:$0xff]  ;;  %v43_v62 = vld [vmem:[%s3637_s0 + $0xe8] sm:$0xff] }
  0x16   :  { %v115_v63 = vld [vmem:[%s3637_s0 + $0x328] sm:$0xff]  ;;  %v44_v0 = vld [vmem:[%s3637_s0 + $0xf0] sm:$0xff]  ;;  %v45_v2 = vld [vmem:[%s3637_s0 + $0xf8] sm:$0xff] }
  0x17   :  { %1996 = vmatmul.mubr.msk.f32.gmra.mxu0 %vm169_vm1, %v21_v18  ;;  %2104 = vmatmul.mubr.msk.f32.gmra.mxu1 %vm169_vm1, %v93_v19  ;;  %v116_v1 = vld [vmem:[%s3637_s0 + $0x330] sm:$0xff]  ;;  %v117_v3 = vld [vmem:[%s3637_s0 + $0x338] sm:$0xff]  ;;  %v46_v4 = vld [vmem:[%s3637_s0 + $0x100] sm:$0xff] }
  0x18   :  { %1998 = vmatprep.mubr.msk.f32.mxu0 %vm169_vm1, %v22_v20  ;;  %2106 = vmatprep.mubr.msk.f32.mxu1 %vm169_vm1, %v94_v21  ;;  %v118_v5 = vld [vmem:[%s3637_s0 + $0x340] sm:$0xff]  ;;  %v47_v6 = vld [vmem:[%s3637_s0 + $0x108] sm:$0xff]  ;;  %v48_v8 = vld [vmem:[%s3637_s0 + $0x110] sm:$0xff] }
  0x19   :  { %v119_v7 = vld [vmem:[%s3637_s0 + $0x348] sm:$0xff]  ;;  %v120_v9 = vld [vmem:[%s3637_s0 + $0x350] sm:$0xff]  ;;  %v49_v10 = vld [vmem:[%s3637_s0 + $0x118] sm:$0xff] }
  0x1a   :  { %v121_v11 = vld [vmem:[%s3637_s0 + $0x358] sm:$0xff]  ;;  %v50_v12 = vld [vmem:[%s3637_s0 + $0x120] sm:$0xff]  ;;  %v51_v14 = vld [vmem:[%s3637_s0 + $0x128] sm:$0xff] }
  0x1b   :  { %1999 = vmatmul.mubr.msk.f32.gmra.mxu0 %vm169_vm1, %v23_v22  ;;  %2107 = vmatmul.mubr.msk.f32.gmra.mxu1 %vm169_vm1, %v95_v23  ;;  %v122_v13 = vld [vmem:[%s3637_s0 + $0x360] sm:$0xff]  ;;  %v123_v15 = vld [vmem:[%s3637_s0 + $0x368] sm:$0xff]  ;;  %v52_v16 = vld [vmem:[%s3637_s0 + $0x130] sm:$0xff] }
  0x1c   :  { %2001 = vmatprep.mubr.msk.f32.mxu0 %vm169_vm1, %v24_v24  ;;  %2109 = vmatprep.mubr.msk.f32.mxu1 %vm169_vm1, %v96_v25  ;;  %v124_v17 = vld [vmem:[%s3637_s0 + $0x370] sm:$0xff]  ;;  %v53_v18 = vld [vmem:[%s3637_s0 + $0x138] sm:$0xff]  ;;  %v54_v20 = vld [vmem:[%s3637_s0 + $0x140] sm:$0xff] }
  0x1d   :  { %v125_v19 = vld [vmem:[%s3637_s0 + $0x378] sm:$0xff]  ;;  %v126_v21 = vld [vmem:[%s3637_s0 + $0x380] sm:$0xff]  ;;  %v55_v22 = vld [vmem:[%s3637_s0 + $0x148] sm:$0xff] }
  0x1e   :  { %v127_v23 = vld [vmem:[%s3637_s0 + $0x388] sm:$0xff]  ;;  %v56_v24 = vld [vmem:[%s3637_s0 + $0x150] sm:$0xff] }
  0x1f   :  { %2002 = vmatmul.mubr.msk.f32.gmra.mxu0 %vm169_vm1, %v25_v26  ;;  %2110 = vmatmul.mubr.msk.f32.gmra.mxu1 %vm169_vm1, %v97_v27  ;;  %v128_v25 = vld [vmem:[%s3637_s0 + $0x390] sm:$0xff]  ;;  %v57_v26 = vld [vmem:[%s3637_s0 + $0x158] sm:$0xff] }
  0x20   :  { %2004 = vmatprep.mubr.msk.f32.mxu0 %vm169_vm1, %v26_v28  ;;  %2112 = vmatprep.mubr.msk.f32.mxu1 %vm169_vm1, %v98_v29  ;;  %v129_v27 = vld [vmem:[%s3637_s0 + $0x398] sm:$0xff]  ;;  %v58_v28 = vld [vmem:[%s3637_s0 + $0x160] sm:$0xff] }
  0x21   :  { %v130_v29 = vld [vmem:[%s3637_s0 + $0x3a0] sm:$0xff] }
  0x23   :  { %2005 = vmatmul.mubr.msk.f32.gmra.mxu0 %vm169_vm1, %v27_v30  ;;  %2113 = vmatmul.mubr.msk.f32.gmra.mxu1 %vm169_vm1, %v99_v31  ;;  %v59_v30 = vld [vmem:[%s3637_s0 + $0x168] sm:$0xff] }
  0x24   :  { %2007 = vmatprep.mubr.msk.f32.mxu0 %vm169_vm1, %v28_v32  ;;  %2115 = vmatprep.mubr.msk.f32.mxu1 %vm169_vm1, %v100_v33  ;;  %v131_v31 = vld [vmem:[%s3637_s0 + $0x3a8] sm:$0xff]  ;;  %v60_v32 = vld [vmem:[%s3637_s0 + $0x170] sm:$0xff] }
  0x25   :  { %v132_v33 = vld [vmem:[%s3637_s0 + $0x3b0] sm:$0xff] }
  0x27   :  { %2008 = vmatmul.mubr.msk.f32.gmra.mxu0 %vm169_vm1, %v29_v34  ;;  %2116 = vmatmul.mubr.msk.f32.gmra.mxu1 %vm169_vm1, %v101_v35  ;;  %v61_v34 = vld [vmem:[%s3637_s0 + $0x178] sm:$0xff] }
  0x28   :  { %2010 = vmatprep.mubr.msk.f32.mxu0 %vm169_vm1, %v30_v36  ;;  %2118 = vmatprep.mubr.msk.f32.mxu1 %vm169_vm1, %v102_v37  ;;  %v133_v35 = vld [vmem:[%s3637_s0 + $0x3b8] sm:$0xff]  ;;  %v62_v36 = vld [vmem:[%s3637_s0 + $0x180] sm:$0xff] }
  0x29   :  { %v134_v37 = vld [vmem:[%s3637_s0 + $0x3c0] sm:$0xff] }
  0x2b   :  { %2011 = vmatmul.mubr.msk.f32.gmra.mxu0 %vm169_vm1, %v31_v38  ;;  %2119 = vmatmul.mubr.msk.f32.gmra.mxu1 %vm169_vm1, %v103_v39  ;;  %v63_v38 = vld [vmem:[%s3637_s0 + $0x188] sm:$0xff] }
  0x2c   :  { %2013 = vmatprep.mubr.msk.f32.mxu0 %vm169_vm1, %v32_v40  ;;  %2121 = vmatprep.mubr.msk.f32.mxu1 %vm169_vm1, %v104_v41  ;;  %v135_v39 = vld [vmem:[%s3637_s0 + $0x3c8] sm:$0xff]  ;;  %v64_v40 = vld [vmem:[%s3637_s0 + $0x190] sm:$0xff] }
  0x2d   :  { %v136_v41 = vld [vmem:[%s3637_s0 + $0x3d0] sm:$0xff] }
  0x2f   :  { %2014 = vmatmul.mubr.msk.f32.gmra.mxu0 %vm169_vm1, %v33_v42  ;;  %2122 = vmatmul.mubr.msk.f32.gmra.mxu1 %vm169_vm1, %v105_v43  ;;  %v65_v42 = vld [vmem:[%s3637_s0 + $0x198] sm:$0xff] }
  0x30   :  { %2016 = vmatprep.mubr.msk.f32.mxu0 %vm169_vm1, %v34_v44  ;;  %2124 = vmatprep.mubr.msk.f32.mxu1 %vm169_vm1, %v106_v45  ;;  %v137_v43 = vld [vmem:[%s3637_s0 + $0x3d8] sm:$0xff]  ;;  %v66_v44 = vld [vmem:[%s3637_s0 + $0x1a0] sm:$0xff] }
  0x31   :  { %v138_v45 = vld [vmem:[%s3637_s0 + $0x3e0] sm:$0xff] }
  0x33   :  { %2017 = vmatmul.mubr.msk.f32.gmra.mxu0 %vm169_vm1, %v35_v46  ;;  %2125 = vmatmul.mubr.msk.f32.gmra.mxu1 %vm169_vm1, %v107_v47  ;;  %v67_v46 = vld [vmem:[%s3637_s0 + $0x1a8] sm:$0xff] }
  0x34   :  { %2019 = vmatprep.mubr.msk.f32.mxu0 %vm169_vm1, %v36_v48  ;;  %2127 = vmatprep.mubr.msk.f32.mxu1 %vm169_vm1, %v108_v49  ;;  %v139_v47 = vld [vmem:[%s3637_s0 + $0x3e8] sm:$0xff]  ;;  %v68_v48 = vld [vmem:[%s3637_s0 + $0x1b0] sm:$0xff] }
  0x35   :  { %v140_v49 = vld [vmem:[%s3637_s0 + $0x3f0] sm:$0xff] }
  0x37   :  { %2020 = vmatmul.mubr.msk.f32.gmra.mxu0 %vm169_vm1, %v37_v50  ;;  %2128 = vmatmul.mubr.msk.f32.gmra.mxu1 %vm169_vm1, %v109_v51  ;;  %v69_v50 = vld [vmem:[%s3637_s0 + $0x1b8] sm:$0xff] }
  0x38   :  { %2022 = vmatprep.mubr.msk.f32.mxu0 %vm169_vm1, %v38_v52  ;;  %2130 = vmatprep.mubr.msk.f32.mxu1 %vm169_vm1, %v110_v53  ;;  %v141_v51 = vld [vmem:[%s3637_s0 + $0x3f8] sm:$0xff]  ;;  %v70_v52 = vld [vmem:[%s3637_s0 + $0x1c0] sm:$0xff] }
  0x39   :  { %v142_v53 = vld [vmem:[%s3637_s0 + $0x400] sm:$0xff] }
  0x3b   :  { %2023 = vmatmul.mubr.msk.f32.gmra.mxu0 %vm169_vm1, %v39_v54  ;;  %2131 = vmatmul.mubr.msk.f32.gmra.mxu1 %vm169_vm1, %v111_v55  ;;  %v71_v54 = vld [vmem:[%s3637_s0 + $0x1c8] sm:$0xff] }
  0x3c   :  { %2025 = vmatprep.mubr.msk.f32.mxu0 %vm169_vm1, %v40_v56  ;;  %2133 = vmatprep.mubr.msk.f32.mxu1 %vm169_vm1, %v112_v57  ;;  %v143_v55 = vld [vmem:[%s3637_s0 + $0x408] sm:$0xff]  ;;  %v72_v56 = vld [vmem:[%s3637_s0 + $0x1d0] sm:$0xff] }
  0x3d   :  { %v144_v57 = vld [vmem:[%s3637_s0 + $0x410] sm:$0xff] }
  0x3f   :  { %2026 = vmatmul.mubr.msk.f32.gmra.mxu0 %vm169_vm1, %v41_v58  ;;  %2134 = vmatmul.mubr.msk.f32.gmra.mxu1 %vm169_vm1, %v113_v59  ;;  %v73_v58 = vld [vmem:[%s3637_s0 + $0x1d8] sm:$0xff] }
  0x40   :  { %2028 = vmatprep.mubr.msk.f32.mxu0 %vm169_vm1, %v42_v60  ;;  %2136 = vmatprep.mubr.msk.f32.mxu1 %vm169_vm1, %v114_v61  ;;  %v145_v59 = vld [vmem:[%s3637_s0 + $0x418] sm:$0xff]  ;;  %v74_v60 = vld [vmem:[%s3637_s0 + $0x1e0] sm:$0xff] }
  0x41   :  { %v146_v61 = vld [vmem:[%s3637_s0 + $0x420] sm:$0xff] }
  0x43   :  { %2029 = vmatmul.mubr.msk.f32.gmra.mxu0 %vm169_vm1, %v43_v62  ;;  %2137 = vmatmul.mubr.msk.f32.gmra.mxu1 %vm169_vm1, %v115_v63  ;;  %v75_v62 = vld [vmem:[%s3637_s0 + $0x1e8] sm:$0xff] }
  0x44   :  { %2031 = vmatprep.mubr.msk.f32.mxu0 %vm169_vm1, %v44_v0  ;;  %2139 = vmatprep.mubr.msk.f32.mxu1 %vm169_vm1, %v116_v1  ;;  %v147_v63 = vld [vmem:[%s3637_s0 + $0x428] sm:$0xff]  ;;  %v76_v0 = vld [vmem:[%s3637_s0 + $0x1f0] sm:$0xff] }
  0x45   :  { %v148_v1 = vld [vmem:[%s3637_s0 + $0x430] sm:$0xff] }
  0x47   :  { %2032 = vmatmul.mubr.msk.f32.gmra.mxu0 %vm169_vm1, %v45_v2  ;;  %2140 = vmatmul.mubr.msk.f32.gmra.mxu1 %vm169_vm1, %v117_v3  ;;  %v77_v2 = vld [vmem:[%s3637_s0 + $0x1f8] sm:$0xff] }
  0x48   :  { %2034 = vmatprep.mubr.msk.f32.mxu0 %vm169_vm1, %v46_v4  ;;  %2142 = vmatprep.mubr.msk.f32.mxu1 %vm169_vm1, %v118_v5  ;;  %v149_v3 = vld [vmem:[%s3637_s0 + $0x438] sm:$0xff]  ;;  %v78_v4 = vld [vmem:[%s3637_s0 + $0x200] sm:$0xff] }
  0x49   :  { %v150_v5 = vld [vmem:[%s3637_s0 + $0x440] sm:$0xff] }
  0x4b   :  { %2035 = vmatmul.mubr.msk.f32.gmra.mxu0 %vm169_vm1, %v47_v6  ;;  %2143 = vmatmul.mubr.msk.f32.gmra.mxu1 %vm169_vm1, %v119_v7  ;;  %v79_v6 = vld [vmem:[%s3637_s0 + $0x208] sm:$0xff] }
  0x4c   :  { %2037 = vmatprep.mubr.msk.f32.mxu0 %vm169_vm1, %v48_v8  ;;  %2145 = vmatprep.mubr.msk.f32.mxu1 %vm169_vm1, %v120_v9  ;;  %v151_v7 = vld [vmem:[%s3637_s0 + $0x448] sm:$0xff]  ;;  %v80_v8 = vld [vmem:[%s3637_s0 + $0x210] sm:$0xff] }
  0x4d   :  { %v152_v9 = vld [vmem:[%s3637_s0 + $0x450] sm:$0xff] }
  0x4f   :  { %2038 = vmatmul.mubr.msk.f32.gmra.mxu0 %vm169_vm1, %v49_v10  ;;  %2146 = vmatmul.mubr.msk.f32.gmra.mxu1 %vm169_vm1, %v121_v11  ;;  %v81_v10 = vld [vmem:[%s3637_s0 + $0x218] sm:$0xff] }
  0x50   :  { %2040 = vmatprep.mubr.msk.f32.mxu0 %vm169_vm1, %v50_v12  ;;  %2148 = vmatprep.mubr.msk.f32.mxu1 %vm169_vm1, %v122_v13  ;;  %v153_v11 = vld [vmem:[%s3637_s0 + $0x458] sm:$0xff]  ;;  %v82_v12 = vld [vmem:[%s3637_s0 + $0x220] sm:$0xff] }
  0x51   :  { %v154_v13 = vld [vmem:[%s3637_s0 + $0x460] sm:$0xff] }
  0x53   :  { %2041 = vmatmul.mubr.msk.f32.gmra.mxu0 %vm169_vm1, %v51_v14  ;;  %2149 = vmatmul.mubr.msk.f32.gmra.mxu1 %vm169_vm1, %v123_v15  ;;  %v83_v14 = vld [vmem:[%s3637_s0 + $0x228] sm:$0xff] }
  0x54   :  { %2043 = vmatprep.mubr.msk.f32.mxu0 %vm169_vm1, %v52_v16  ;;  %2151 = vmatprep.mubr.msk.f32.mxu1 %vm169_vm1, %v124_v17  ;;  %v155_v15 = vld [vmem:[%s3637_s0 + $0x468] sm:$0xff]  ;;  %v84_v16 = vld [vmem:[%s3637_s0 + $0x230] sm:$0xff] }
  0x55   :  { %v156_v17 = vld [vmem:[%s3637_s0 + $0x470] sm:$0xff] }
  0x57   :  { %2044 = vmatmul.mubr.msk.f32.gmra.mxu0 %vm169_vm1, %v53_v18  ;;  %2152 = vmatmul.mubr.msk.f32.gmra.mxu1 %vm169_vm1, %v125_v19  ;;  %v85_v18 = vld [vmem:[%s3637_s0 + $0x238] sm:$0xff] }
  0x58   :  { %2046 = vmatprep.mubr.msk.f32.mxu0 %vm169_vm1, %v54_v20  ;;  %2154 = vmatprep.mubr.msk.f32.mxu1 %vm169_vm1, %v126_v21  ;;  %v157_v19 = vld [vmem:[%s3637_s0 + $0x478] sm:$0xff] }
  0x5b   :  { %2047 = vmatmul.mubr.msk.f32.gmra.mxu0 %vm169_vm1, %v55_v22  ;;  %2155 = vmatmul.mubr.msk.f32.gmra.mxu1 %vm169_vm1, %v127_v23 }
  0x5c   :  { %2049 = vmatprep.mubr.msk.f32.mxu0 %vm169_vm1, %v56_v24  ;;  %2157 = vmatprep.mubr.msk.f32.mxu1 %vm169_vm1, %v128_v25 }
  0x5f   :  { %2050 = vmatmul.mubr.msk.f32.gmra.mxu0 %vm169_vm1, %v57_v26  ;;  %2158 = vmatmul.mubr.msk.f32.gmra.mxu1 %vm169_vm1, %v129_v27 }
  0x60   :  { %2052 = vmatprep.mubr.msk.f32.mxu0 %vm169_vm1, %v58_v28  ;;  %2160 = vmatprep.mubr.msk.f32.mxu1 %vm169_vm1, %v130_v29 }
  0x63   :  { %2053 = vmatmul.mubr.msk.f32.gmra.mxu0 %vm169_vm1, %v59_v30  ;;  %2161 = vmatmul.mubr.msk.f32.gmra.mxu1 %vm169_vm1, %v131_v31 }
  0x64   :  { %2055 = vmatprep.mubr.msk.f32.mxu0 %vm169_vm1, %v60_v32  ;;  %2163 = vmatprep.mubr.msk.f32.mxu1 %vm169_vm1, %v132_v33 }
  0x67   :  { %2056 = vmatmul.mubr.msk.f32.gmra.mxu0 %vm169_vm1, %v61_v34  ;;  %2164 = vmatmul.mubr.msk.f32.gmra.mxu1 %vm169_vm1, %v133_v35 }
  0x68   :  { %2058 = vmatprep.mubr.msk.f32.mxu0 %vm169_vm1, %v62_v36  ;;  %2166 = vmatprep.mubr.msk.f32.mxu1 %vm169_vm1, %v134_v37 }
  0x6b   :  { %2059 = vmatmul.mubr.msk.f32.gmra.mxu0 %vm169_vm1, %v63_v38  ;;  %2167 = vmatmul.mubr.msk.f32.gmra.mxu1 %vm169_vm1, %v135_v39 }
  0x6c   :  { %2061 = vmatprep.mubr.msk.f32.mxu0 %vm169_vm1, %v64_v40  ;;  %2169 = vmatprep.mubr.msk.f32.mxu1 %vm169_vm1, %v136_v41 }
  0x6f   :  { %2062 = vmatmul.mubr.msk.f32.gmra.mxu0 %vm169_vm1, %v65_v42  ;;  %2170 = vmatmul.mubr.msk.f32.gmra.mxu1 %vm169_vm1, %v137_v43 }
  0x70   :  { %2064 = vmatprep.mubr.msk.f32.mxu0 %vm169_vm1, %v66_v44  ;;  %2172 = vmatprep.mubr.msk.f32.mxu1 %vm169_vm1, %v138_v45 }
  0x73   :  { %2065 = vmatmul.mubr.msk.f32.gmra.mxu0 %vm169_vm1, %v67_v46  ;;  %2173 = vmatmul.mubr.msk.f32.gmra.mxu1 %vm169_vm1, %v139_v47 }
  0x74   :  { %2067 = vmatprep.mubr.msk.f32.mxu0 %vm169_vm1, %v68_v48  ;;  %2175 = vmatprep.mubr.msk.f32.mxu1 %vm169_vm1, %v140_v49 }
  0x77   :  { %2068 = vmatmul.mubr.msk.f32.gmra.mxu0 %vm169_vm1, %v69_v50  ;;  %2176 = vmatmul.mubr.msk.f32.gmra.mxu1 %vm169_vm1, %v141_v51 }
  0x78   :  { %2070 = vmatprep.mubr.msk.f32.mxu0 %vm169_vm1, %v70_v52  ;;  %2178 = vmatprep.mubr.msk.f32.mxu1 %vm169_vm1, %v142_v53 }
  0x7b   :  { %2071 = vmatmul.mubr.msk.f32.gmra.mxu0 %vm169_vm1, %v71_v54  ;;  %2179 = vmatmul.mubr.msk.f32.gmra.mxu1 %vm169_vm1, %v143_v55 }
  0x7c   :  { %2073 = vmatprep.mubr.msk.f32.mxu0 %vm169_vm1, %v72_v56  ;;  %2181 = vmatprep.mubr.msk.f32.mxu1 %vm169_vm1, %v144_v57 }
  0x7f   :  { %2074 = vmatmul.mubr.msk.f32.gmra.mxu0 %vm169_vm1, %v73_v58  ;;  %2182 = vmatmul.mubr.msk.f32.gmra.mxu1 %vm169_vm1, %v145_v59 }
  0x80   :  { %2076 = vmatprep.mubr.msk.f32.mxu0 %vm169_vm1, %v74_v60  ;;  %2184 = vmatprep.mubr.msk.f32.mxu1 %vm169_vm1, %v146_v61 }
  0x83   :  { %2077 = vmatmul.mubr.msk.f32.gmra.mxu0 %vm169_vm1, %v75_v62  ;;  %2185 = vmatmul.mubr.msk.f32.gmra.mxu1 %vm169_vm1, %v147_v63 }
  0x84   :  { %2079 = vmatprep.mubr.msk.f32.mxu0 %vm169_vm1, %v76_v0  ;;  %2187 = vmatprep.mubr.msk.f32.mxu1 %vm169_vm1, %v148_v1  ;;  %v2886_v0 = vld [vmem:[%s3638_s2] ss:$0 sm:$0xff] }
  0x87   :  { %2080 = vmatmul.mubr.msk.f32.gmra.mxu0 %vm169_vm1, %v77_v2  ;;  %2188 = vmatmul.mubr.msk.f32.gmra.mxu1 %vm169_vm1, %v149_v3 }
  0x88   :  { %2082 = vmatprep.mubr.msk.f32.mxu0 %vm169_vm1, %v78_v4  ;;  %2190 = vmatprep.mubr.msk.f32.mxu1 %vm169_vm1, %v150_v5 }
  0x8b   :  { %2083 = vmatmul.mubr.msk.f32.gmra.mxu0 %vm169_vm1, %v79_v6  ;;  %2191 = vmatmul.mubr.msk.f32.gmra.mxu1 %vm169_vm1, %v151_v7 }
  0x8c   :  { %2085 = vmatprep.mubr.msk.f32.mxu0 %vm169_vm1, %v80_v8  ;;  %2193 = vmatprep.mubr.msk.f32.mxu1 %vm169_vm1, %v152_v9 }
  0x8f   :  { %2086 = vmatmul.mubr.msk.f32.gmra.mxu0 %vm169_vm1, %v81_v10  ;;  %2194 = vmatmul.mubr.msk.f32.gmra.mxu1 %vm169_vm1, %v153_v11 }
  0x90   :  { %2088 = vmatprep.mubr.msk.f32.mxu0 %vm169_vm1, %v82_v12  ;;  %2196 = vmatprep.mubr.msk.f32.mxu1 %vm169_vm1, %v154_v13 }
  0x93   :  { %2089 = vmatmul.mubr.msk.f32.gmra.mxu0 %vm169_vm1, %v83_v14  ;;  %2197 = vmatmul.mubr.msk.f32.gmra.mxu1 %vm169_vm1, %v155_v15 }
  0x94   :  { %2091 = vmatprep.mubr.msk.f32.mxu0 %vm169_vm1, %v84_v16  ;;  %2199 = vmatprep.mubr.msk.f32.mxu1 %vm169_vm1, %v156_v17 }
  0x97   :  { %2092 = vmatmul.mubr.msk.f32.gmra.mxu0 %vm169_vm1, %v85_v18  ;;  %2200 = vmatmul.mubr.msk.f32.gmra.mxu1 %vm169_vm1, %v157_v19 }
  0xcb   :  { %v1988_v20 = vpop.f32.mrf.mxu0  ;;  %v2096_v21 = vpop.f32.mrf.mxu1 }
  0xcc   :  { %v2893_v3 = vadd.f32 %v1988_v20, %v2886_v0  ;;  %v2900_v6 = vadd.f32 %v2096_v21, %v2886_v0 }
  0xcd   :  { %v672_v22 = vpop.f32.mrf.mxu0  ;;  %v1032_v23 = vpop.f32.mrf.mxu1 }
  0xce   :  { %v2903_v7 = vadd.f32 %v2886_v0, %v672_v22  ;;  %v2906_v8 = vadd.f32 %v2886_v0, %v1032_v23 }
  0xcf   :  { %v1991_v24 = vpop.f32.mrf.mxu0  ;;  %v2099_v25 = vpop.f32.mrf.mxu1 }
  0xd0   :  { %v2909_v9 = vadd.f32 %v1991_v24, %v2886_v0  ;;  %v2916_v12 = vadd.f32 %v2099_v25, %v2886_v0 }
  0xd1   :  { %v682_v26 = vpop.f32.mrf.mxu0  ;;  %v1042_v27 = vpop.f32.mrf.mxu1 }
  0xd2   :  { %v2919_v13 = vadd.f32 %v2886_v0, %v682_v26  ;;  %v2923_v15 = vadd.f32 %v2886_v0, %v1042_v27 }
  0xd3   :  { %v1994_v28 = vpop.f32.mrf.mxu0  ;;  %v2102_v29 = vpop.f32.mrf.mxu1 }
  0xd4   :  { %v2930_v18 = vadd.f32 %v1994_v28, %v2886_v0  ;;  %v2933_v19 = vadd.f32 %v2102_v29, %v2886_v0 }
  0xd5   :  { %v692_v30 = vpop.f32.mrf.mxu0  ;;  %v1052_v31 = vpop.f32.mrf.mxu1 }
  0xd6   :  { %v2936_v20 = vadd.f32 %v2886_v0, %v692_v30  ;;  %v2939_v21 = vadd.f32 %v2886_v0, %v1052_v31 }
  0xd7   :  { %v2819_v32 = vpop.f32.mrf.mxu0  ;;  %v2821_v33 = vpop.f32.mrf.mxu1 }
  0xd8   :  { %3654 = vst [vmem:[#allocation2_spill] sm:$0xff] %v2936_v20  ;;  %3655 = vst [vmem:[#allocation3_spill] sm:$0xff] %v2939_v21  ;;  %v2953_v30 = vadd.f32 %v2819_v32, %v2886_v0  ;;  %v2957_v31 = vadd.f32 %v2821_v33, %v2886_v0 }
  0xd9   :  { %v2823_v34 = vpop.f32.mrf.mxu0  ;;  %v2825_v35 = vpop.f32.mrf.mxu1 }
  0xda   :  { %v2962_v25 = vadd.f32 %v2886_v0, %v2823_v34  ;;  %v2966_v23 = vadd.f32 %v2886_v0, %v2825_v35 }
  0xdb   :  { %v2827_v36 = vpop.f32.mrf.mxu0  ;;  %v2829_v37 = vpop.f32.mrf.mxu1 }
  0xdc   :  { %v2970_v29 = vadd.f32 %v2827_v36, %v2886_v0  ;;  %v2982_v35 = vadd.f32 %v2829_v37, %v2886_v0 }
  0xdd   :  { %v2831_v38 = vpop.f32.mrf.mxu0  ;;  %v2833_v39 = vpop.f32.mrf.mxu1 }
  0xde   :  { %3656 = vst [vmem:[#allocation4_spill] sm:$0xff] %v2970_v29  ;;  %v2986_v36 = vadd.f32 %v2886_v0, %v2831_v38  ;;  %v2990_v14 = vadd.f32 %v2886_v0, %v2833_v39 }
  0xdf   :  { %v2835_v40 = vpop.f32.mrf.mxu0  ;;  %v2837_v41 = vpop.f32.mrf.mxu1 }
  0xe0   :  { %v2994_v33 = vadd.f32 %v2835_v40, %v2886_v0  ;;  %v3004_v38 = vadd.f32 %v2837_v41, %v2886_v0 }
  0xe1   :  { %v2839_v42 = vpop.f32.mrf.mxu0  ;;  %v2841_v43 = vpop.f32.mrf.mxu1 }
  0xe2   :  { %v3008_v39 = vadd.f32 %v2886_v0, %v2839_v42 }
  0xe3   :  { %v2843_v44 = vpop.f32.mrf.mxu0  ;;  %v2845_v45 = vpop.f32.mrf.mxu1 }
  0xe4   :  { %v3023_v41 = vadd.f32 %v2843_v44, %v2886_v0  ;;  %v3027_v42 = vadd.f32 %v2845_v45, %v2886_v0 }
  0xe5   :  { %v2847_v46 = vpop.f32.mrf.mxu0  ;;  %v2849_v47 = vpop.f32.mrf.mxu1 }
  0xe6   :  { %v3031_v40 = vadd.f32 %v2886_v0, %v2847_v46 }
  0xe7   :  { %v2851_v48 = vpop.f32.mrf.mxu0  ;;  %v2853_v49 = vpop.f32.mrf.mxu1 }
  0xe8   :  { %v3053_v20 = vadd.f32 %v2853_v49, %v2886_v0 }
  0xe9   :  { %v2855_v50 = vpop.f32.mrf.mxu0  ;;  %v2857_v51 = vpop.f32.mrf.mxu1 }
  0xea   :  { %v3058_v44 = vadd.f32 %v2886_v0, %v2855_v50  ;;  %v3062_v21 = vadd.f32 %v2886_v0, %v2857_v51 }
  0xeb   :  { %v2859_v52 = vpop.f32.mrf.mxu0  ;;  %v2861_v53 = vpop.f32.mrf.mxu1 }
  0xec   :  { %v3066_v46 = vadd.f32 %v2859_v52, %v2886_v0  ;;  %v3078_v51 = vadd.f32 %v2861_v53, %v2886_v0 }
  0xed   :  { %v2863_v54 = vpop.f32.mrf.mxu0  ;;  %v2865_v55 = vpop.f32.mrf.mxu1 }
  0xee   :  { %3661 = vst [vmem:[#allocation9_spill] sm:$0xff] %v3066_v46  ;;  %v3082_v52 = vadd.f32 %v2886_v0, %v2863_v54 }
  0xef   :  { %v2867_v56 = vpop.f32.mrf.mxu0  ;;  %v2869_v57 = vpop.f32.mrf.mxu1 }
  0xf0   :  { %v3090_v49 = vadd.f32 %v2867_v56, %v2886_v0  ;;  %v3100_v54 = vadd.f32 %v2869_v57, %v2886_v0 }
  0xf1   :  { %v2871_v58 = vpop.f32.mrf.mxu0  ;;  %v2873_v59 = vpop.f32.mrf.mxu1 }
  0xf3   :  { %v2875_v60 = vpop.f32.mrf.mxu0  ;;  %v2877_v61 = vpop.f32.mrf.mxu1 }
  0xf4   :  { %v3119_v57 = vadd.f32 %v2875_v60, %v2886_v0 }
  0xf5   :  { %v2879_v62 = vpop.f32.mrf.mxu0  ;;  %v2881_v63 = vpop.f32.mrf.mxu1 }
  0xf6   :  { %3668 = vst [vmem:[#allocation16_spill] sm:$0xff] %v3119_v57  ;;  %v3127_v56 = vadd.f32 %v2886_v0, %v2879_v62 }
  0xf7   :  { %v2888_v1 = vpop.f32.mrf.mxu0  ;;  %v2890_v2 = vpop.f32.mrf.mxu1 }
  0xf8   :  { %3670 = vst [vmem:[#allocation18_spill] sm:$0xff] %v3127_v56 }
  0xf9   :  { %v2895_v4 = vpop.f32.mrf.mxu0  ;;  %v2897_v5 = vpop.f32.mrf.mxu1 }
  0xfa   :  { %v3154_v60 = vadd.f32 %v2886_v0, %v2895_v4 }
  0xfb   :  { %v2911_v10 = vpop.f32.mrf.mxu0  ;;  %v2913_v11 = vpop.f32.mrf.mxu1 }
  0xfc   :  { %3675 = vst [vmem:[#allocation23_spill] sm:$0xff] %v3154_v60  ;;  %v3162_v62 = vadd.f32 %v2911_v10, %v2886_v0 }
  0xfd   :  { %v2925_v16 = vpop.f32.mrf.mxu0  ;;  %v2927_v17 = vpop.f32.mrf.mxu1 }
  0xfe   :  { %3677 = vst [vmem:[#allocation25_spill] sm:$0xff] %v3162_v62  ;;  %v3178_v10 = vadd.f32 %v2886_v0, %v2925_v16 }
  0xff   :  { %v2945_v26 = vpop.f32.mrf.mxu0  ;;  %v2947_v27 = vpop.f32.mrf.mxu1 }
 0x101   :  { %v2972_v32 = vpop.f32.mrf.mxu0  ;;  %v2974_v28 = vpop.f32.mrf.mxu1 }
 0x103   :  { %v2996_v24 = vpop.f32.mrf.mxu0  ;;  %v2998_v22 = vpop.f32.mrf.mxu1 }
 0x104   :  { %3657 = vst [vmem:[#allocation5_spill] sm:$0xff] %v2998_v22  ;;  %v3015_v22 = vadd.f32 %v2886_v0, %v2841_v43  ;;  %v3035_v43 = vadd.f32 %v2886_v0, %v2849_v47  ;;  %v3049_v47 = vadd.f32 %v2851_v48, %v2886_v0 }
 0x105   :  { %v3017_v34 = vpop.f32.mrf.mxu0  ;;  %v3019_v37 = vpop.f32.mrf.mxu1 }
 0x106   :  { %3658 = vst [vmem:[#allocation6_spill] sm:$0xff] %v3017_v34  ;;  %3659 = vst [vmem:[#allocation7_spill] sm:$0xff] %v3019_v37 }
 0x107   :  { %v3041_v34 = vpop.f32.mrf.mxu0  ;;  %v3043_v45 = vpop.f32.mrf.mxu1 }
 0x108   :  { %3660 = vst [vmem:[#allocation8_spill] sm:$0xff] %v3043_v45 }
 0x109   :  { %v3068_v48 = vpop.f32.mrf.mxu0  ;;  %v3070_v29 = vpop.f32.mrf.mxu1 }
 0x10a   :  { %3662 = vst [vmem:[#allocation10_spill] sm:$0xff] %v3068_v48  ;;  %3663 = vst [vmem:[#allocation11_spill] sm:$0xff] %v3070_v29  ;;  %v3086_v48 = vadd.f32 %v2886_v0, %v2865_v55  ;;  %v3104_v55 = vadd.f32 %v2886_v0, %v2871_v58  ;;  %v3123_v58 = vadd.f32 %v2877_v61, %v2886_v0 }
 0x10b   :  { %v3092_v37 = vpop.f32.mrf.mxu0  ;;  %v3094_v45 = vpop.f32.mrf.mxu1  ;;  %v3158_v29 = vadd.f32 %v2886_v0, %v2897_v5  ;;  %v3174_v5 = vadd.f32 %v2913_v11, %v2886_v0 }
 0x10c   :  { %3664 = vst [vmem:[#allocation12_spill] sm:$0xff] %v3092_v37  ;;  %3665 = vst [vmem:[#allocation13_spill] sm:$0xff] %v3094_v45  ;;  %v3111_v45 = vadd.f32 %v2886_v0, %v2873_v59  ;;  %v3131_v59 = vadd.f32 %v2886_v0, %v2881_v63  ;;  %v3145_v63 = vadd.f32 %v2888_v1, %v2886_v0 }
 0x10d   :  { %v3113_v50 = vpop.f32.mrf.mxu0  ;;  %v3115_v53 = vpop.f32.mrf.mxu1  ;;  %3669 = vst [vmem:[#allocation17_spill] sm:$0xff] %v3123_v58  ;;  %v3149_v37 = vadd.f32 %v2890_v2, %v2886_v0  ;;  %3676 = vst [vmem:[#allocation24_spill] sm:$0xff] %v3158_v29  ;;  %v3186_v2 = vadd.f32 %v2945_v26, %v2886_v0  ;;  %v3197_v26 = vadd.f32 %v2947_v27, %v2886_v0  ;;  %v3682_v27 = vmax.f32 %v2893_v3, 0.0 }
 0x10e   :  { %3666 = vst [vmem:[#allocation14_spill] sm:$0xff] %v3113_v50  ;;  %3667 = vst [vmem:[#allocation15_spill] sm:$0xff] %v3115_v53  ;;  %v3684_v3 = vmax.f32 %v2903_v7, 0.0 }
 0x10f   :  { %3671 = vst [vmem:[#allocation19_spill] sm:$0xff] %v3131_v59  ;;  %v3137_v50 = vpop.f32.mrf.mxu0  ;;  %v3139_v61 = vpop.f32.mrf.mxu1  ;;  %3674 = vst [vmem:[#allocation22_spill] sm:$0xff] %v3149_v37 }
 0x110   :  { %3672 = vst [vmem:[#allocation20_spill] sm:$0xff] %v3137_v50  ;;  %3673 = vst [vmem:[#allocation21_spill] sm:$0xff] %v3139_v61 }
 0x111   :  { %v3164_v1 = vpop.f32.mrf.mxu0  ;;  %v3166_v46 = vpop.f32.mrf.mxu1  ;;  %3681 = vst [vmem:[#allocation29_spill] sm:$0xff] %v3186_v2 }
 0x112   :  { %3678 = vst [vmem:[#allocation26_spill] sm:$0xff] %v3164_v1  ;;  %3679 = vst [vmem:[#allocation27_spill] sm:$0xff] %v3166_v46  ;;  %v3182_v46 = vadd.f32 %v2886_v0, %v2927_v17 }
 0x113   :  { %v2042_v53 = vpop.f32.mrf.mxu0  ;;  %v2150_v4 = vpop.f32.mrf.mxu1 }
 0x114   :  { %3680 = vst [vmem:[#allocation28_spill] sm:$0xff] %v3182_v46  ;;  %v858_v11 = vadd.f32 %v2042_v53, %v2886_v0  ;;  %v1218_v50 = vadd.f32 %v2150_v4, %v2886_v0  ;;  %v3212_v4 = vadd.f32 %v2886_v0, %v2972_v32 }
 0x115   :  { %v852_v56 = vpop.f32.mrf.mxu0  ;;  %v1212_v58 = vpop.f32.mrf.mxu1 }
 0x116   :  { %v1428_v57 = vmax.f32 %v858_v11, 0.0  ;;  %v1500_v61 = vmax.f32 %v1218_v50, 0.0  ;;  %v853_v1 = vadd.f32 %v2886_v0, %v852_v56  ;;  %v1213_v53 = vadd.f32 %v2886_v0, %v1212_v58 }
 0x117   :  { %v2045_v62 = vpop.f32.mrf.mxu0  ;;  %v2153_v29 = vpop.f32.mrf.mxu1  ;;  %v3683_v11 = vmax.f32 %v2900_v6, 0.0  ;;  %v1490_v58 = vmax.f32 %v3197_v26, 0.0  ;;  %v3685_v6 = vmax.f32 %v2906_v8, 0.0 }
 0x118   :  { %v1536_v60 = vmax.f32 %v3682_v27, %v1428_v57  ;;  %v1427_v37 = vmax.f32 %v853_v1, 0.0  ;;  %v1499_v56 = vmax.f32 %v1213_v53, 0.0  ;;  %v868_v59 = vadd.f32 %v2045_v62, %v2886_v0 }
 0x119   :  { %v1572_v50 = vmax.f32 %v3683_v11, %v1500_v61  ;;  %v1228_v17 = vadd.f32 %v2153_v29, %v2886_v0  ;;  %v862_v16 = vpop.f32.mrf.mxu0  ;;  %v1222_v2 = vpop.f32.mrf.mxu1  ;;  %v3223_v53 = vadd.f32 %v2886_v0, %v2974_v28  ;;  %v1417_v28 = vmax.f32 %v3212_v4, 0.0 }
 0x11a   :  { %v1535_v57 = vmax.f32 %v3684_v3, %v1427_v37  ;;  %v1571_v61 = vmax.f32 %v3685_v6, %v1499_v56  ;;  %v863_v1 = vadd.f32 %v2886_v0, %v862_v16  ;;  %v1430_v32 = vmax.f32 %v868_v59, 0.0 }
 0x11b   :  { %v1608_v46 = vmax.f32 %v1536_v60, %v1572_v50  ;;  %v1502_v27 = vmax.f32 %v1228_v17, 0.0  ;;  %v1223_v62 = vadd.f32 %v2886_v0, %v1222_v2  ;;  %v2048_v29 = vpop.f32.mrf.mxu0  ;;  %v2156_v11 = vpop.f32.mrf.mxu1  ;;  %v3686_v59 = vmax.f32 %v2909_v9, 0.0 }
 0x11c   :  { %v1607_v7 = vmax.f32 %v1535_v57, %v1571_v61  ;;  %v1429_v8 = vmax.f32 %v863_v1, 0.0  ;;  %v878_v37 = vadd.f32 %v2048_v29, %v2886_v0  ;;  %v1238_v60 = vadd.f32 %v2156_v11, %v2886_v0 }
 0x11d   :  { %1645 = vst.msk [vmem:[%s3639_s3 + $0x8] sm:$0xff] %vm1643_vm2, %v1608_v46  ;;  %v1538_v16 = vmax.f32 %v3686_v59, %v1430_v32  ;;  %v3687_v2 = vmax.f32 %v2916_v12, 0.0  ;;  %v1501_v50 = vmax.f32 %v1223_v62, 0.0  ;;  %v872_v56 = vpop.f32.mrf.mxu0  ;;  %v1232_v3 = vpop.f32.mrf.mxu1  ;;  %v3688_v46 = vmax.f32 %v2919_v13, 0.0 }
 0x11e   :  { %1644 = vst.msk [vmem:[%s3639_s3] sm:$0xff] %vm1643_vm2, %v1607_v7  ;;  %v1432_v6 = vmax.f32 %v878_v37, 0.0  ;;  %v1504_v61 = vmax.f32 %v1238_v60, 0.0  ;;  %v873_v1 = vadd.f32 %v2886_v0, %v872_v56  ;;  %v1489_v9 = vmax.f32 %v3223_v53, 0.0  ;;  %v3692_v56 = vld [vmem:[#allocation2_spill] sm:$0xff] }
 0x11f   :  { %v1574_v17 = vmax.f32 %v3687_v2, %v1502_v27  ;;  %v1537_v57 = vmax.f32 %v3688_v46, %v1429_v8  ;;  %v3689_v12 = vmax.f32 %v2923_v15, 0.0  ;;  %v1233_v62 = vadd.f32 %v2886_v0, %v1232_v3  ;;  %v2051_v29 = vpop.f32.mrf.mxu0  ;;  %v2159_v11 = vpop.f32.mrf.mxu1 }
 0x120   :  { %v3690_v59 = vmax.f32 %v2930_v18, 0.0  ;;  %v3691_v13 = vmax.f32 %v2933_v19, 0.0  ;;  %v1431_v37 = vmax.f32 %v873_v1, 0.0  ;;  %v888_v60 = vadd.f32 %v2051_v29, %v2886_v0 }
 0x121   :  { %v1610_v32 = vmax.f32 %v1538_v16, %v1574_v17  ;;  %v1573_v27 = vmax.f32 %v3689_v12, %v1501_v50  ;;  %v3255_v2 = vadd.f32 %v2996_v24, %v2886_v0  ;;  %v1503_v16 = vmax.f32 %v1233_v62, 0.0  ;;  %v882_v17 = vpop.f32.mrf.mxu0  ;;  %v1242_v50 = vpop.f32.mrf.mxu1  ;;  %v3694_v24 = vld [vmem:[#allocation5_spill] sm:$0xff] }
 0x122   :  { %v1540_v7 = vmax.f32 %v3690_v59, %v1432_v6  ;;  %v1576_v8 = vmax.f32 %v3691_v13, %v1504_v61  ;;  %v1248_v18 = vadd.f32 %v2159_v11, %v2886_v0  ;;  %v3693_v3 = vmax.f32 %v3692_v56, 0.0 }
 0x123   :  { %1647 = vst.msk [vmem:[%s3639_s3 + $0x18] sm:$0xff] %vm1643_vm2, %v1610_v32  ;;  %v1609_v15 = vmax.f32 %v1537_v57, %v1573_v27  ;;  %v1434_v6 = vmax.f32 %v888_v60, 0.0  ;;  %v883_v61 = vadd.f32 %v2886_v0, %v882_v17  ;;  %v3267_v1 = vadd.f32 %v3694_v24, %v2886_v0  ;;  %v3695_v57 = vld [vmem:[#allocation3_spill] sm:$0xff]  ;;  %v2054_v29 = vpop.f32.mrf.mxu0  ;;  %v2162_v11 = vpop.f32.mrf.mxu1 }
 0x124   :  { %v1612_v19 = vmax.f32 %v1540_v7, %v1576_v8  ;;  %v1539_v46 = vmax.f32 %v3693_v3, %v1431_v37  ;;  %v3696_v32 = vmax.f32 %v3695_v57, 0.0  ;;  %v1506_v27 = vmax.f32 %v1248_v18, 0.0 }
 0x125   :  { %1646 = vst.msk [vmem:[%s3639_s3 + $0x10] sm:$0xff] %vm1643_vm2, %v1609_v15  ;;  %v1243_v62 = vadd.f32 %v2886_v0, %v1242_v50  ;;  %v3697_v59 = vmax.f32 %v2953_v30, 0.0  ;;  %v1433_v13 = vmax.f32 %v883_v61, 0.0  ;;  %v898_v8 = vadd.f32 %v2054_v29, %v2886_v0  ;;  %v892_v50 = vpop.f32.mrf.mxu0  ;;  %v1252_v56 = vpop.f32.mrf.mxu1 }
 0x126   :  { %v1575_v12 = vmax.f32 %v3696_v32, %v1503_v16  ;;  %1649 = vst.msk [vmem:[%s3639_s3 + $0x28] sm:$0xff] %vm1643_vm2, %v1612_v19  ;;  %v1258_v37 = vadd.f32 %v2162_v11, %v2886_v0  ;;  %v1420_v60 = vmax.f32 %v3255_v2, 0.0  ;;  %v3698_v16 = vmax.f32 %v2957_v31, 0.0 }
 0x127   :  { %v1542_v7 = vmax.f32 %v3697_v59, %v1434_v6  ;;  %v1505_v17 = vmax.f32 %v1243_v62, 0.0  ;;  %v3699_v3 = vmax.f32 %v2962_v25, 0.0  ;;  %v1436_v24 = vmax.f32 %v898_v8, 0.0  ;;  %v2165_v25 = vpop.f32.mrf.mxu1 }
 0x128   :  { %v1611_v15 = vmax.f32 %v1539_v46, %v1575_v12  ;;  %v1578_v18 = vmax.f32 %v3698_v16, %v1506_v27  ;;  %v1508_v30 = vmax.f32 %v1258_v37, 0.0  ;;  %v893_v6 = vadd.f32 %v2886_v0, %v892_v50  ;;  %v2057_v12 = vpop.f32.mrf.mxu0  ;;  %v3701_v27 = vld [vmem:[#allocation4_spill] sm:$0xff]  ;;  %v3704_v37 = vld [vmem:[#allocation6_spill] sm:$0xff] }
 0x129   :  { %v1541_v19 = vmax.f32 %v3699_v3, %v1433_v13  ;;  %v1492_v61 = vmax.f32 %v3267_v1, 0.0  ;;  %v3700_v31 = vmax.f32 %v2966_v23, 0.0  ;;  %v1253_v32 = vadd.f32 %v2886_v0, %v1252_v56 }
 0x12a   :  { %1648 = vst.msk [vmem:[%s3639_s3 + $0x20] sm:$0xff] %vm1643_vm2, %v1611_v15  ;;  %v1614_v46 = vmax.f32 %v1542_v7, %v1578_v18  ;;  %v3702_v62 = vmax.f32 %v3701_v27, 0.0  ;;  %v3703_v11 = vmax.f32 %v2982_v35, 0.0  ;;  %v1435_v13 = vmax.f32 %v893_v6, 0.0  ;;  %v902_v18 = vpop.f32.mrf.mxu0 }
 0x12b   :  { %v1577_v57 = vmax.f32 %v3700_v31, %v1505_v17  ;;  %v908_v8 = vadd.f32 %v2057_v12, %v2886_v0  ;;  %v3305_v15 = vadd.f32 %v2886_v0, %v3704_v37  ;;  %v1507_v7 = vmax.f32 %v1253_v32, 0.0  ;;  %v1262_v17 = vpop.f32.mrf.mxu1 }
 0x12c   :  { %v1544_v29 = vmax.f32 %v3702_v62, %v1436_v24  ;;  %v1580_v59 = vmax.f32 %v3703_v11, %v1508_v30  ;;  %1651 = vst.msk [vmem:[%s3639_s3 + $0x38] sm:$0xff] %vm1643_vm2, %v1614_v46  ;;  %v1268_v16 = vadd.f32 %v2165_v25, %v2886_v0  ;;  %v3705_v50 = vmax.f32 %v2986_v36, 0.0  ;;  %v3706_v30 = vld [vmem:[#allocation7_spill] sm:$0xff]  ;;  %v2060_v36 = vpop.f32.mrf.mxu0 }
 0x12d   :  { %v1613_v23 = vmax.f32 %v1541_v19, %v1577_v57  ;;  %v1438_v3 = vmax.f32 %v908_v8, 0.0  ;;  %v903_v24 = vadd.f32 %v2886_v0, %v902_v18  ;;  %v3317_v6 = vadd.f32 %v2886_v0, %v3706_v30  ;;  %v2168_v32 = vpop.f32.mrf.mxu1 }
 0x12e   :  { %v1616_v35 = vmax.f32 %v1544_v29, %v1580_v59  ;;  %v1543_v56 = vmax.f32 %v3705_v50, %v1435_v13  ;;  %v3707_v19 = vmax.f32 %v2990_v14, 0.0  ;;  %v1510_v31 = vmax.f32 %v1268_v16, 0.0  ;;  %v912_v37 = vpop.f32.mrf.mxu0 }
 0x12f   :  { %1650 = vst.msk [vmem:[%s3639_s3 + $0x30] sm:$0xff] %vm1643_vm2, %v1613_v23  ;;  %v1263_v57 = vadd.f32 %v2886_v0, %v1262_v17  ;;  %v3708_v12 = vmax.f32 %v2994_v33, 0.0  ;;  %v1437_v27 = vmax.f32 %v903_v24, 0.0  ;;  %v918_v62 = vadd.f32 %v2060_v36, %v2886_v0  ;;  %v1272_v23 = vpop.f32.mrf.mxu1 }
 0x130   :  { %v1579_v46 = vmax.f32 %v3707_v19, %v1507_v7  ;;  %1653 = vst.msk [vmem:[%s3639_s3 + $0x48] sm:$0xff] %vm1643_vm2, %v1616_v35  ;;  %v1278_v29 = vadd.f32 %v2168_v32, %v2886_v0  ;;  %v1419_v14 = vmax.f32 %v3305_v15, 0.0  ;;  %v3709_v59 = vmax.f32 %v3004_v38, 0.0  ;;  %v2063_v24 = vpop.f32.mrf.mxu0 }
 0x131   :  { %v1546_v25 = vmax.f32 %v3708_v12, %v1438_v3  ;;  %v1509_v8 = vmax.f32 %v1263_v57, 0.0  ;;  %v3710_v7 = vmax.f32 %v3008_v39, 0.0  ;;  %v1440_v18 = vmax.f32 %v918_v62, 0.0  ;;  %v2171_v39 = vpop.f32.mrf.mxu1 }
 0x132   :  { %v1615_v11 = vmax.f32 %v1543_v56, %v1579_v46  ;;  %v1582_v13 = vmax.f32 %v3709_v59, %v1510_v31  ;;  %v1512_v33 = vmax.f32 %v1278_v29, 0.0  ;;  %v913_v17 = vadd.f32 %v2886_v0, %v912_v37 }
 0x133   :  { %v1545_v16 = vmax.f32 %v3710_v7, %v1437_v27  ;;  %v1491_v35 = vmax.f32 %v3317_v6, 0.0  ;;  %v3711_v38 = vmax.f32 %v3015_v22, 0.0  ;;  %v1273_v3 = vadd.f32 %v2886_v0, %v1272_v23  ;;  %v1282_v27 = vpop.f32.mrf.mxu1 }
 0x134   :  { %1652 = vst.msk [vmem:[%s3639_s3 + $0x40] sm:$0xff] %vm1643_vm2, %v1615_v11  ;;  %v1618_v50 = vmax.f32 %v1546_v25, %v1582_v13  ;;  %v3712_v30 = vmax.f32 %v3023_v41, 0.0  ;;  %v3713_v46 = vmax.f32 %v3027_v42, 0.0  ;;  %v1439_v57 = vmax.f32 %v913_v17, 0.0  ;;  %v922_v25 = vpop.f32.mrf.mxu0 }
 0x135   :  { %v1581_v56 = vmax.f32 %v3711_v38, %v1509_v8  ;;  %v928_v36 = vadd.f32 %v2063_v24, %v2886_v0  ;;  %v3355_v32 = vadd.f32 %v3041_v34, %v2886_v0  ;;  %v1511_v12 = vmax.f32 %v1273_v3, 0.0  ;;  %v3715_v34 = vld [vmem:[#allocation8_spill] sm:$0xff] }
 0x136   :  { %v1548_v19 = vmax.f32 %v3712_v30, %v1440_v18  ;;  %v1584_v31 = vmax.f32 %v3713_v46, %v1512_v33  ;;  %1655 = vst.msk [vmem:[%s3639_s3 + $0x58] sm:$0xff] %vm1643_vm2, %v1618_v50  ;;  %v1288_v41 = vadd.f32 %v2171_v39, %v2886_v0  ;;  %v3714_v62 = vmax.f32 %v3031_v40, 0.0  ;;  %v2066_v40 = vpop.f32.mrf.mxu0 }
 0x137   :  { %v1617_v22 = vmax.f32 %v1545_v16, %v1581_v56  ;;  %v1442_v11 = vmax.f32 %v928_v36, 0.0  ;;  %v923_v59 = vadd.f32 %v2886_v0, %v922_v25  ;;  %v3367_v13 = vadd.f32 %v3715_v34, %v2886_v0  ;;  %v2174_v16 = vpop.f32.mrf.mxu1 }
 0x138   :  { %v1620_v42 = vmax.f32 %v1548_v19, %v1584_v31  ;;  %v1547_v29 = vmax.f32 %v3714_v62, %v1439_v57  ;;  %v3716_v8 = vmax.f32 %v3035_v43, 0.0  ;;  %v1514_v23 = vmax.f32 %v1288_v41, 0.0  ;;  %v932_v30 = vpop.f32.mrf.mxu0 }
 0x139   :  { %1654 = vst.msk [vmem:[%s3639_s3 + $0x50] sm:$0xff] %vm1643_vm2, %v1617_v22  ;;  %v1283_v7 = vadd.f32 %v2886_v0, %v1282_v27  ;;  %v3717_v18 = vmax.f32 %v3049_v47, 0.0  ;;  %v1441_v17 = vmax.f32 %v923_v59, 0.0  ;;  %v938_v50 = vadd.f32 %v2066_v40, %v2886_v0  ;;  %v1292_v19 = vpop.f32.mrf.mxu1 }
 0x13a   :  { %v1583_v37 = vmax.f32 %v3716_v8, %v1511_v12  ;;  %1657 = vst.msk [vmem:[%s3639_s3 + $0x68] sm:$0xff] %vm1643_vm2, %v1620_v42  ;;  %v1298_v38 = vadd.f32 %v2174_v16, %v2886_v0  ;;  %v1422_v43 = vmax.f32 %v3355_v32, 0.0  ;;  %v3718_v3 = vmax.f32 %v3053_v20, 0.0  ;;  %v2069_v27 = vpop.f32.mrf.mxu0  ;;  %v3721_v42 = vld [vmem:[#allocation9_spill] sm:$0xff] }
 0x13b   :  { %v1550_v33 = vmax.f32 %v3717_v18, %v1442_v11  ;;  %v1513_v39 = vmax.f32 %v1283_v7, 0.0  ;;  %v3719_v46 = vmax.f32 %v3058_v44, 0.0  ;;  %v1444_v57 = vmax.f32 %v938_v50, 0.0  ;;  %v2177_v44 = vpop.f32.mrf.mxu1 }
 0x13c   :  { %v1619_v56 = vmax.f32 %v1547_v29, %v1583_v37  ;;  %v1586_v24 = vmax.f32 %v3718_v3, %v1514_v23  ;;  %v1516_v47 = vmax.f32 %v1298_v38, 0.0  ;;  %v933_v36 = vadd.f32 %v2886_v0, %v932_v30  ;;  %v3724_v37 = vld [vmem:[#allocation10_spill] sm:$0xff]  ;;  %v942_v16 = vpop.f32.mrf.mxu0 }
 0x13d   :  { %v1549_v31 = vmax.f32 %v3719_v46, %v1441_v17  ;;  %v1494_v22 = vmax.f32 %v3367_v13, 0.0  ;;  %v3720_v20 = vmax.f32 %v3062_v21, 0.0  ;;  %v1293_v25 = vadd.f32 %v2886_v0, %v1292_v19  ;;  %v1302_v18 = vpop.f32.mrf.mxu1 }
 0x13e   :  { %1656 = vst.msk [vmem:[%s3639_s3 + $0x60] sm:$0xff] %vm1643_vm2, %v1619_v56  ;;  %v1622_v12 = vmax.f32 %v1550_v33, %v1586_v24  ;;  %v3722_v62 = vmax.f32 %v3721_v42, 0.0  ;;  %v3723_v11 = vmax.f32 %v3078_v51, 0.0  ;;  %v1443_v34 = vmax.f32 %v933_v36, 0.0  ;;  %v3726_v56 = vld [vmem:[#allocation11_spill] sm:$0xff] }
 0x13f   :  { %v1585_v41 = vmax.f32 %v3720_v20, %v1513_v39  ;;  %v948_v8 = vadd.f32 %v2069_v27, %v2886_v0  ;;  %v3405_v23 = vadd.f32 %v2886_v0, %v3724_v37  ;;  %v1515_v7 = vmax.f32 %v1293_v25, 0.0  ;;  %v2180_v46 = vpop.f32.mrf.mxu1 }
 0x140   :  { %v1552_v29 = vmax.f32 %v3722_v62, %v1444_v57  ;;  %v1588_v59 = vmax.f32 %v3723_v11, %v1516_v47  ;;  %1659 = vst.msk [vmem:[%s3639_s3 + $0x78] sm:$0xff] %vm1643_vm2, %v1622_v12  ;;  %v1308_v40 = vadd.f32 %v2177_v44, %v2886_v0  ;;  %v3725_v33 = vmax.f32 %v3082_v52, 0.0  ;;  %v2072_v52 = vpop.f32.mrf.mxu0 }
 0x141   :  { %v1621_v21 = vmax.f32 %v1549_v31, %v1585_v41  ;;  %v1446_v50 = vmax.f32 %v948_v8, 0.0  ;;  %v943_v38 = vadd.f32 %v2886_v0, %v942_v16  ;;  %v3417_v3 = vadd.f32 %v2886_v0, %v3726_v56  ;;  %v1312_v42 = vpop.f32.mrf.mxu1  ;;  %v3736_v56 = vld [vmem:[#allocation12_spill] sm:$0xff] }
 0x142   :  { %v1624_v51 = vmax.f32 %v1552_v29, %v1588_v59  ;;  %v1551_v17 = vmax.f32 %v3725_v33, %v1443_v34  ;;  %v3727_v24 = vmax.f32 %v3086_v48, 0.0  ;;  %v1518_v30 = vmax.f32 %v1308_v40, 0.0  ;;  %v952_v44 = vpop.f32.mrf.mxu0  ;;  %v3732_v40 = vld [vmem:[#allocation16_spill] sm:$0xff] }
 0x143   :  { %1658 = vst.msk [vmem:[%s3639_s3 + $0x70] sm:$0xff] %vm1643_vm2, %v1621_v21  ;;  %v1303_v19 = vadd.f32 %v2886_v0, %v1302_v18  ;;  %v3728_v31 = vmax.f32 %v3090_v49, 0.0  ;;  %v1445_v47 = vmax.f32 %v943_v38, 0.0  ;;  %v958_v36 = vadd.f32 %v2072_v52, %v2886_v0 }
 0x144   :  { %v1587_v39 = vmax.f32 %v3727_v24, %v1515_v7  ;;  %1661 = vst.msk [vmem:[%s3639_s3 + $0x88] sm:$0xff] %vm1643_vm2, %v1624_v51  ;;  %v1318_v12 = vadd.f32 %v2180_v46, %v2886_v0  ;;  %v1421_v48 = vmax.f32 %v3405_v23, 0.0  ;;  %v3729_v41 = vmax.f32 %v3100_v54, 0.0  ;;  %v2075_v7 = vpop.f32.mrf.mxu0  ;;  %v3734_v51 = vld [vmem:[#allocation17_spill] sm:$0xff] }
 0x145   :  { %v1554_v57 = vmax.f32 %v3728_v31, %v1446_v50  ;;  %v1517_v27 = vmax.f32 %v1303_v19, 0.0  ;;  %v3730_v62 = vmax.f32 %v3104_v55, 0.0  ;;  %v1448_v11 = vmax.f32 %v958_v36, 0.0  ;;  %v2183_v55 = vpop.f32.mrf.mxu1  ;;  %v3737_v31 = vld [vmem:[#allocation18_spill] sm:$0xff] }
 0x146   :  { %v1623_v20 = vmax.f32 %v1551_v17, %v1587_v39  ;;  %v1590_v25 = vmax.f32 %v3729_v41, %v1518_v30  ;;  %v1520_v49 = vmax.f32 %v1318_v12, 0.0  ;;  %v953_v59 = vadd.f32 %v2886_v0, %v952_v44  ;;  %v962_v19 = vpop.f32.mrf.mxu0 }
 0x147   :  { %v1553_v29 = vmax.f32 %v3730_v62, %v1445_v47  ;;  %v1493_v34 = vmax.f32 %v3417_v3, 0.0  ;;  %v3731_v54 = vmax.f32 %v3111_v45, 0.0  ;;  %v1313_v21 = vadd.f32 %v2886_v0, %v1312_v42  ;;  %v1322_v52 = vpop.f32.mrf.mxu1 }
 0x148   :  { %1660 = vst.msk [vmem:[%s3639_s3 + $0x80] sm:$0xff] %vm1643_vm2, %v1623_v20  ;;  %v1626_v8 = vmax.f32 %v1554_v57, %v1590_v25  ;;  %v3733_v16 = vmax.f32 %v3732_v40, 0.0  ;;  %v3735_v33 = vmax.f32 %v3734_v51, 0.0  ;;  %v1447_v50 = vmax.f32 %v953_v59, 0.0  ;;  %v3739_v20 = vld [vmem:[#allocation13_spill] sm:$0xff]  ;;  %v3740_v25 = vld [vmem:[#allocation19_spill] sm:$0xff] }
 0x149   :  { %v1589_v37 = vmax.f32 %v3731_v54, %v1517_v27  ;;  %v968_v38 = vadd.f32 %v2075_v7, %v2886_v0  ;;  %v3455_v24 = vadd.f32 %v3736_v56, %v2886_v0  ;;  %v1519_v39 = vmax.f32 %v1313_v21, 0.0 }
 0x14a   :  { %v1556_v18 = vmax.f32 %v3733_v16, %v1448_v11  ;;  %v1592_v17 = vmax.f32 %v3735_v33, %v1520_v49  ;;  %1663 = vst.msk [vmem:[%s3639_s3 + $0x98] sm:$0xff] %vm1643_vm2, %v1626_v8  ;;  %v1328_v30 = vadd.f32 %v2183_v55, %v2886_v0  ;;  %v3738_v57 = vmax.f32 %v3737_v31, 0.0  ;;  %v2186_v11 = vpop.f32.mrf.mxu1  ;;  %v3743_v55 = vld [vmem:[#allocation22_spill] sm:$0xff] }
 0x14b   :  { %v1625_v45 = vmax.f32 %v1553_v29, %v1589_v37  ;;  %v1450_v36 = vmax.f32 %v968_v38, 0.0  ;;  %v963_v12 = vadd.f32 %v2886_v0, %v962_v19  ;;  %v3467_v41 = vadd.f32 %v3739_v20, %v2886_v0  ;;  %v2078_v29 = vpop.f32.mrf.mxu0  ;;  %v3747_v19 = vld [vmem:[#allocation24_spill] sm:$0xff] }
 0x14c   :  { %v1628_v46 = vmax.f32 %v1556_v18, %v1592_v17  ;;  %v1555_v47 = vmax.f32 %v3738_v57, %v1447_v50  ;;  %v3741_v27 = vmax.f32 %v3740_v25, 0.0  ;;  %v1522_v42 = vmax.f32 %v1328_v30, 0.0  ;;  %v1332_v33 = vpop.f32.mrf.mxu1  ;;  %v3745_v17 = vld [vmem:[#allocation23_spill] sm:$0xff] }
 0x14d   :  { %1662 = vst.msk [vmem:[%s3639_s3 + $0x90] sm:$0xff] %vm1643_vm2, %v1625_v45  ;;  %v1323_v62 = vadd.f32 %v2886_v0, %v1322_v52  ;;  %v3742_v49 = vmax.f32 %v3145_v63, 0.0  ;;  %v1449_v8 = vmax.f32 %v963_v12, 0.0  ;;  %v978_v54 = vadd.f32 %v2078_v29, %v2886_v0  ;;  %v972_v51 = vpop.f32.mrf.mxu0 }
 0x14e   :  { %v1591_v44 = vmax.f32 %v3741_v27, %v1519_v39  ;;  %1665 = vst.msk [vmem:[%s3639_s3 + $0xa8] sm:$0xff] %vm1643_vm2, %v1628_v46  ;;  %v1338_v37 = vadd.f32 %v2186_v11, %v2886_v0  ;;  %v1424_v21 = vmax.f32 %v3455_v24, 0.0  ;;  %v3744_v40 = vmax.f32 %v3743_v55, 0.0 }
 0x14f   :  { %v1558_v59 = vmax.f32 %v3742_v49, %v1450_v36  ;;  %v1521_v18 = vmax.f32 %v1323_v62, 0.0  ;;  %v3746_v50 = vmax.f32 %v3745_v17, 0.0  ;;  %v1452_v56 = vmax.f32 %v978_v54, 0.0  ;;  %v2081_v57 = vpop.f32.mrf.mxu0  ;;  %v3749_v36 = vld [vmem:[#allocation25_spill] sm:$0xff]  ;;  %v3752_v62 = vld [vmem:[#allocation14_spill] sm:$0xff] }
 0x150   :  { %v1627_v7 = vmax.f32 %v1555_v47, %v1591_v44  ;;  %v1594_v16 = vmax.f32 %v3744_v40, %v1522_v42  ;;  %v1524_v63 = vmax.f32 %v1338_v37, 0.0  ;;  %v973_v45 = vadd.f32 %v2886_v0, %v972_v51  ;;  %v2189_v47 = vpop.f32.mrf.mxu1  ;;  %v3755_v51 = vld [vmem:[#allocation28_spill] sm:$0xff] }
 0x151   :  { %v1557_v38 = vmax.f32 %v3746_v50, %v1449_v8  ;;  %v1496_v39 = vmax.f32 %v3467_v41, 0.0  ;;  %v3748_v52 = vmax.f32 %v3747_v19, 0.0  ;;  %v1333_v31 = vadd.f32 %v2886_v0, %v1332_v33  ;;  %v982_v8 = vpop.f32.mrf.mxu0 }
 0x152   :  { %1664 = vst.msk [vmem:[%s3639_s3 + $0xa0] sm:$0xff] %vm1643_vm2, %v1627_v7  ;;  %v1630_v30 = vmax.f32 %v1558_v59, %v1594_v16  ;;  %v3750_v12 = vmax.f32 %v3749_v36, 0.0  ;;  %v3751_v25 = vmax.f32 %v3174_v5, 0.0  ;;  %v1451_v44 = vmax.f32 %v973_v45, 0.0  ;;  %v1342_v54 = vpop.f32.mrf.mxu1  ;;  %v3754_v16 = vld [vmem:[#allocation15_spill] sm:$0xff] }
 0x153   :  { %v1593_v46 = vmax.f32 %v3748_v52, %v1521_v18  ;;  %v988_v42 = vadd.f32 %v2081_v57, %v2886_v0  ;;  %v3505_v29 = vadd.f32 %v2886_v0, %v3752_v62  ;;  %v1523_v49 = vmax.f32 %v1333_v31, 0.0 }
 0x154   :  { %v1560_v20 = vmax.f32 %v3750_v12, %v1452_v56  ;;  %v1596_v27 = vmax.f32 %v3751_v25, %v1524_v63  ;;  %1667 = vst.msk [vmem:[%s3639_s3 + $0xb8] sm:$0xff] %vm1643_vm2, %v1630_v30  ;;  %v1348_v59 = vadd.f32 %v2189_v47, %v2886_v0  ;;  %v3753_v37 = vmax.f32 %v3178_v10, 0.0  ;;  %v2084_v10 = vpop.f32.mrf.mxu0  ;;  %v2192_v56 = vpop.f32.mrf.mxu1  ;;  %v3757_v63 = vld [vmem:[#allocation29_spill] sm:$0xff] }
 0x155   :  { %v1629_v11 = vmax.f32 %v1557_v38, %v1593_v46  ;;  %v1454_v55 = vmax.f32 %v988_v42, 0.0  ;;  %v983_v40 = vadd.f32 %v2886_v0, %v982_v8  ;;  %v3517_v18 = vadd.f32 %v2886_v0, %v3754_v16  ;;  %v3760_v16 = vld [vmem:[#allocation21_spill] sm:$0xff] }
 0x156   :  { %v1632_v5 = vmax.f32 %v1560_v20, %v1596_v27  ;;  %v1559_v7 = vmax.f32 %v3753_v37, %v1451_v44  ;;  %v3756_v33 = vmax.f32 %v3755_v51, 0.0  ;;  %v1526_v50 = vmax.f32 %v1348_v59, 0.0  ;;  %v992_v12 = vpop.f32.mrf.mxu0  ;;  %v1352_v20 = vpop.f32.mrf.mxu1 }
 0x157   :  { %1666 = vst.msk [vmem:[%s3639_s3 + $0xb0] sm:$0xff] %vm1643_vm2, %v1629_v11  ;;  %v1343_v38 = vadd.f32 %v2886_v0, %v1342_v54  ;;  %v3758_v45 = vmax.f32 %v3757_v63, 0.0  ;;  %v1453_v19 = vmax.f32 %v983_v40, 0.0  ;;  %v998_v52 = vadd.f32 %v2084_v10, %v2886_v0 }
 0x158   :  { %v1595_v17 = vmax.f32 %v3756_v33, %v1523_v49  ;;  %1669 = vst.msk [vmem:[%s3639_s3 + $0xc8] sm:$0xff] %vm1643_vm2, %v1632_v5  ;;  %v1358_v46 = vadd.f32 %v2192_v56, %v2886_v0  ;;  %v1423_v31 = vmax.f32 %v3505_v29, 0.0  ;;  %v1598_v47 = vmax.f32 %v1490_v58, %v1526_v50  ;;  %v2087_v49 = vpop.f32.mrf.mxu0  ;;  %v2195_v4 = vpop.f32.mrf.mxu1  ;;  %v3759_v5 = vld [vmem:[#allocation20_spill] sm:$0xff] }
 0x159   :  { %v1562_v30 = vmax.f32 %v3758_v45, %v1454_v55  ;;  %v1525_v36 = vmax.f32 %v1343_v38, 0.0  ;;  %v1561_v25 = vmax.f32 %v1417_v28, %v1453_v19  ;;  %v1456_v27 = vmax.f32 %v998_v52, 0.0 }
 0x15a   :  { %v1631_v57 = vmax.f32 %v1559_v7, %v1595_v17  ;;  %v1528_v44 = vmax.f32 %v1358_v46, 0.0  ;;  %v993_v42 = vadd.f32 %v2886_v0, %v992_v12  ;;  %v1495_v62 = vmax.f32 %v3517_v18, 0.0  ;;  %v1362_v7 = vpop.f32.mrf.mxu1 }
 0x15b   :  { %v1634_v11 = vmax.f32 %v1562_v30, %v1598_v47  ;;  %v1597_v26 = vmax.f32 %v1489_v9, %v1525_v36  ;;  %v1353_v58 = vadd.f32 %v2886_v0, %v1352_v20  ;;  %v1564_v28 = vmax.f32 %v1420_v60, %v1456_v27  ;;  %v1002_v60 = vpop.f32.mrf.mxu0  ;;  %v3761_v47 = vld [vmem:[#allocation26_spill] sm:$0xff] }
 0x15c   :  { %1668 = vst.msk [vmem:[%s3639_s3 + $0xc0] sm:$0xff] %vm1643_vm2, %v1631_v57  ;;  %v1600_v59 = vmax.f32 %v1492_v61, %v1528_v44  ;;  %v1455_v8 = vmax.f32 %v993_v42, 0.0  ;;  %v1008_v54 = vadd.f32 %v2087_v49, %v2886_v0  ;;  %v3555_v37 = vadd.f32 %v3759_v5, %v2886_v0  ;;  %v2198_v15 = vpop.f32.mrf.mxu1  ;;  %v3762_v42 = vld [vmem:[#allocation27_spill] sm:$0xff]  ;;  %v2210_v49 = vld [vmem:[%s3638_s2] ss:$0 sm:$0xff] }
 0x15d   :  { %1671 = vst.msk [vmem:[%s3639_s3 + $0xd8] sm:$0xff] %vm1643_vm2, %v1634_v11  ;;  %v1633_v53 = vmax.f32 %v1561_v25, %v1597_v26  ;;  %v1527_v9 = vmax.f32 %v1353_v58, 0.0  ;;  %v1368_v2 = vadd.f32 %v2195_v4, %v2886_v0  ;;  %v1003_v40 = vadd.f32 %v2886_v0, %v1002_v60  ;;  %v2090_v38 = vpop.f32.mrf.mxu0 }
 0x15e   :  { %v1636_v1 = vmax.f32 %v1564_v28, %v1600_v59  ;;  %v1563_v61 = vmax.f32 %v1419_v14, %v1455_v8  ;;  %v1458_v55 = vmax.f32 %v1008_v54, 0.0  ;;  %v1208_v51 = vadd.f32 %v3760_v16, %v2886_v0  ;;  %v1372_v52 = vpop.f32.mrf.mxu1 }
 0x15f   :  { %1670 = vst.msk [vmem:[%s3639_s3 + $0xd0] sm:$0xff] %vm1643_vm2, %v1633_v53  ;;  %v1599_v33 = vmax.f32 %v1491_v35, %v1527_v9  ;;  %v1530_v17 = vmax.f32 %v1368_v2, 0.0  ;;  %v1363_v50 = vadd.f32 %v2886_v0, %v1362_v7  ;;  %v1457_v10 = vmax.f32 %v1003_v40, 0.0  ;;  %v1012_v19 = vpop.f32.mrf.mxu0 }
 0x160   :  { %1673 = vst.msk [vmem:[%s3639_s3 + $0xe8] sm:$0xff] %vm1643_vm2, %v1636_v1  ;;  %v1566_v14 = vmax.f32 %v1422_v43, %v1458_v55  ;;  %v1018_v56 = vadd.f32 %v2090_v38, %v2886_v0  ;;  %v1378_v63 = vadd.f32 %v2198_v15, %v2886_v0  ;;  %v1426_v6 = vmax.f32 %v3555_v37, 0.0 }
 0x161   :  { %v1635_v35 = vmax.f32 %v1563_v61, %v1599_v33  ;;  %v1602_v45 = vmax.f32 %v1494_v22, %v1530_v17  ;;  %v1529_v30 = vmax.f32 %v1363_v50, 0.0  ;;  %v1565_v46 = vmax.f32 %v1421_v48, %v1457_v10  ;;  %v2093_v23 = vpop.f32.mrf.mxu0  ;;  %v2201_v48 = vpop.f32.mrf.mxu1 }
 0x162   :  { %v1460_v57 = vmax.f32 %v1018_v56, 0.0  ;;  %v1532_v32 = vmax.f32 %v1378_v63, 0.0  ;;  %v1013_v43 = vadd.f32 %v2886_v0, %v1012_v19  ;;  %v843_v36 = vadd.f32 %v2886_v0, %v3761_v47 }
 0x163   :  { %1672 = vst.msk [vmem:[%s3639_s3 + $0xe0] sm:$0xff] %vm1643_vm2, %v1635_v35  ;;  %v1638_v13 = vmax.f32 %v1566_v14, %v1602_v45  ;;  %v1601_v22 = vmax.f32 %v1493_v34, %v1529_v30  ;;  %v1373_v12 = vadd.f32 %v2886_v0, %v1372_v52  ;;  %v1028_v44 = vadd.f32 %v2093_v23, %v2886_v0  ;;  %v1022_v24 = vpop.f32.mrf.mxu0 }
 0x164   :  { %v1568_v20 = vmax.f32 %v1424_v21, %v1460_v57  ;;  %v1604_v25 = vmax.f32 %v1496_v39, %v1532_v32  ;;  %v1459_v27 = vmax.f32 %v1013_v43, 0.0  ;;  %v1203_v11 = vadd.f32 %v2886_v0, %v3762_v42  ;;  %v1382_v21 = vpop.f32.mrf.mxu1 }
 0x165   :  { %1675 = vst.msk [vmem:[%s3639_s3 + $0xf8] sm:$0xff] %vm1643_vm2, %v1638_v13  ;;  %v1637_v3 = vmax.f32 %v1565_v46, %v1601_v22  ;;  %v1531_v34 = vmax.f32 %v1373_v12, 0.0  ;;  %v1388_v26 = vadd.f32 %v2201_v48, %v2886_v0  ;;  %v1462_v39 = vmax.f32 %v1028_v44, 0.0 }
 0x166   :  { %v1640_v58 = vmax.f32 %v1568_v20, %v1604_v25  ;;  %v1567_v41 = vmax.f32 %v1423_v31, %v1459_v27  ;;  %v1023_v4 = vadd.f32 %v2210_v49, %v1022_v24  ;;  %v1498_v28 = vmax.f32 %v1208_v51, 0.0 }
 0x167   :  { %1674 = vst.msk [vmem:[%s3639_s3 + $0xf0] sm:$0xff] %vm1643_vm2, %v1637_v3  ;;  %v1603_v0 = vmax.f32 %v1495_v62, %v1531_v34  ;;  %v1534_v59 = vmax.f32 %v1388_v26, 0.0  ;;  %v1383_v8 = vadd.f32 %v2210_v49, %v1382_v21  ;;  %v1425_v54 = vmax.f32 %v843_v36, 0.0 }
 0x168   :  { %1677 = vst.msk [vmem:[%s3639_s3 + $0x108] sm:$0xff] %vm1643_vm2, %v1640_v58  ;;  %v1570_v29 = vmax.f32 %v1426_v6, %v1462_v39  ;;  %v1461_v31 = vmax.f32 %v1023_v4, 0.0  ;;  %v1497_v5 = vmax.f32 %v1203_v11, 0.0 }
 0x169   :  { %v1639_v37 = vmax.f32 %v1567_v41, %v1603_v0  ;;  %v1606_v53 = vmax.f32 %v1498_v28, %v1534_v59  ;;  %v1533_v9 = vmax.f32 %v1383_v8, 0.0 }
 0x16a   :  { %v1569_v2 = vmax.f32 %v1425_v54, %v1461_v31 }
 0x16b   :  { %1676 = vst.msk [vmem:[%s3639_s3 + $0x100] sm:$0xff] %vm1643_vm2, %v1639_v37  ;;  %v1642_v18 = vmax.f32 %v1570_v29, %v1606_v53  ;;  %v1605_v62 = vmax.f32 %v1497_v5, %v1533_v9 }
 0x16d   :  { %1679 = vst.msk [vmem:[%s3639_s3 + $0x118] sm:$0xff] %vm1643_vm2, %v1642_v18  ;;  %v1641_v60 = vmax.f32 %v1569_v2, %v1605_v62 }
 0x16f   :  { %1678 = vst.msk [vmem:[%s3639_s3 + $0x110] sm:$0xff] %vm1643_vm2, %v1641_v60 }

// kernel: model_forward.3
= control target key start
LH: loop header
LB: loop body
LE: loop exit
PB: predicated region body
PF: predicated region fallthrough
CT: control target
= control target key end

     0   :  { %v3649_v3 = vmov 0.0   ;;  %vm148_vm0 = vcmask 130048   ;;  %s5149_s0 = inlined_call_operand.vmem [shape: f32[128,400], index: 0, kind: input, shape index: {}]   ;;  %s5150_s1 = inlined_call_operand.vmem [shape: f32[400,32], index: 1, kind: input, shape index: {}]   ;;  %s5151_s2 = inlined_call_operand.vmem [shape: f32[1,32], index: 2, kind: input, shape index: {}]   ;;  %s5152_s3 = inlined_call_operand.vmem [shape: f32[512,512], index: 3, kind: input, shape index: {}]   ;;  %s5153_s4 = inlined_call_operand.vmem [shape: f32[1,512], index: 4, kind: input, shape index: {}]   ;;  %s5154_s5 = inlined_call_operand.vmem [shape: f32[512,10], index: 5, kind: input, shape index: {}]   ;;  %s5155_s6 = inlined_call_operand.vmem [shape: f32[1,10], index: 6, kind: input, shape index: {}]   ;;  %s5156_s7 = inlined_call_operand.hbm [shape: f32[2,10], index: 7, kind: output, shape index: {}]  }
   0x1   :  { %v122_v0 = vld [vmem:[%s5150_s1 + $0xf8] sm:$0xff]  ;;  %342 = vmatprep.subr.mxu1 %v3649_v3  ;;  %v121_v4 = vld [vmem:[%s5150_s1 + $0xf0] sm:$0xff]  ;;  %v120_v7 = vld [vmem:[%s5150_s1 + $0xe8] sm:$0xff] }
   0x2   :  { %v106_v1 = vld [vmem:[%s5150_s1 + $0x78] sm:$0xff]  ;;  %3475 = vmatprep.subr.mxu0 %v122_v0  ;;  %v105_v5 = vld [vmem:[%s5150_s1 + $0x70] sm:$0xff]  ;;  %v104_v8 = vld [vmem:[%s5150_s1 + $0x68] sm:$0xff] }
   0x3   :  { %v138_v2 = vld [vmem:[%s5150_s1 + $0x178] sm:$0xff]  ;;  %v137_v6 = vld [vmem:[%s5150_s1 + $0x170] sm:$0xff]  ;;  %3476 = vmatpush3.msra.mxu0 %v106_v1  ;;  %v136_v9 = vld [vmem:[%s5150_s1 + $0x168] sm:$0xff] }
   0x4   :  { %343 = vmatpush1.msra.mxu1 %v138_v2  ;;  %3477 = vmatprep.subr.mxu0 %v121_v4  ;;  %v119_v10 = vld [vmem:[%s5150_s1 + $0xe0] sm:$0xff]  ;;  %v118_v13 = vld [vmem:[%s5150_s1 + $0xd8] sm:$0xff]  ;;  %v117_v16 = vld [vmem:[%s5150_s1 + $0xd0] sm:$0xff] }
   0x5   :  { %344 = vmatprep.subr.mxu1 %v3649_v3  ;;  %3478 = vmatpush3.msra.mxu0 %v105_v5  ;;  %v103_v11 = vld [vmem:[%s5150_s1 + $0x60] sm:$0xff]  ;;  %v102_v14 = vld [vmem:[%s5150_s1 + $0x58] sm:$0xff]  ;;  %v101_v17 = vld [vmem:[%s5150_s1 + $0x50] sm:$0xff] }
   0x6   :  { %345 = vmatpush1.msra.mxu1 %v137_v6  ;;  %3479 = vmatprep.subr.mxu0 %v120_v7  ;;  %v135_v12 = vld [vmem:[%s5150_s1 + $0x160] sm:$0xff]  ;;  %v134_v15 = vld [vmem:[%s5150_s1 + $0x158] sm:$0xff]  ;;  %v133_v18 = vld [vmem:[%s5150_s1 + $0x150] sm:$0xff] }
   0x7   :  { %346 = vmatprep.subr.mxu1 %v3649_v3  ;;  %3480 = vmatpush3.msra.mxu0 %v104_v8  ;;  %v116_v19 = vld [vmem:[%s5150_s1 + $0xc8] sm:$0xff]  ;;  %v115_v22 = vld [vmem:[%s5150_s1 + $0xc0] sm:$0xff]  ;;  %v114_v25 = vld [vmem:[%s5150_s1 + $0xb8] sm:$0xff] }
   0x8   :  { %347 = vmatpush1.msra.mxu1 %v136_v9  ;;  %3481 = vmatprep.subr.mxu0 %v119_v10  ;;  %v100_v20 = vld [vmem:[%s5150_s1 + $0x48] sm:$0xff]  ;;  %v99_v23 = vld [vmem:[%s5150_s1 + $0x40] sm:$0xff]  ;;  %v98_v26 = vld [vmem:[%s5150_s1 + $0x38] sm:$0xff] }
   0x9   :  { %348 = vmatprep.subr.mxu1 %v3649_v3  ;;  %3482 = vmatpush3.msra.mxu0 %v103_v11  ;;  %v132_v21 = vld [vmem:[%s5150_s1 + $0x148] sm:$0xff]  ;;  %v131_v24 = vld [vmem:[%s5150_s1 + $0x140] sm:$0xff]  ;;  %v130_v27 = vld [vmem:[%s5150_s1 + $0x138] sm:$0xff] }
   0xa   :  { %349 = vmatpush1.msra.mxu1 %v135_v12  ;;  %3483 = vmatprep.subr.mxu0 %v118_v13  ;;  %v113_v28 = vld [vmem:[%s5150_s1 + $0xb0] sm:$0xff]  ;;  %v112_v31 = vld [vmem:[%s5150_s1 + $0xa8] sm:$0xff]  ;;  %v111_v34 = vld [vmem:[%s5150_s1 + $0xa0] sm:$0xff] }
   0xb   :  { %350 = vmatprep.subr.mxu1 %v3649_v3  ;;  %3484 = vmatpush3.msra.mxu0 %v102_v14  ;;  %v97_v29 = vld [vmem:[%s5150_s1 + $0x30] sm:$0xff]  ;;  %v96_v32 = vld [vmem:[%s5150_s1 + $0x28] sm:$0xff]  ;;  %v95_v35 = vld [vmem:[%s5150_s1 + $0x20] sm:$0xff] }
   0xc   :  { %351 = vmatpush1.msra.mxu1 %v134_v15  ;;  %3485 = vmatprep.subr.mxu0 %v117_v16  ;;  %v129_v30 = vld [vmem:[%s5150_s1 + $0x130] sm:$0xff]  ;;  %v128_v33 = vld [vmem:[%s5150_s1 + $0x128] sm:$0xff]  ;;  %v127_v36 = vld [vmem:[%s5150_s1 + $0x120] sm:$0xff] }
   0xd   :  { %352 = vmatprep.subr.mxu1 %v3649_v3  ;;  %3486 = vmatpush3.msra.mxu0 %v101_v17  ;;  %v110_v37 = vld [vmem:[%s5150_s1 + $0x98] sm:$0xff]  ;;  %v109_v40 = vld [vmem:[%s5150_s1 + $0x90] sm:$0xff]  ;;  %v108_v43 = vld [vmem:[%s5150_s1 + $0x88] sm:$0xff] }
   0xe   :  { %353 = vmatpush1.msra.mxu1 %v133_v18  ;;  %3487 = vmatprep.subr.mxu0 %v116_v19  ;;  %v94_v38 = vld [vmem:[%s5150_s1 + $0x18] sm:$0xff]  ;;  %v93_v41 = vld [vmem:[%s5150_s1 + $0x10] sm:$0xff]  ;;  %v92_v44 = vld [vmem:[%s5150_s1 + $0x8] sm:$0xff] }
   0xf   :  { %354 = vmatprep.subr.mxu1 %v3649_v3  ;;  %3488 = vmatpush3.msra.mxu0 %v100_v20  ;;  %v126_v39 = vld [vmem:[%s5150_s1 + $0x118] sm:$0xff]  ;;  %v125_v42 = vld [vmem:[%s5150_s1 + $0x110] sm:$0xff]  ;;  %v124_v45 = vld [vmem:[%s5150_s1 + $0x108] sm:$0xff] }
  0x10   :  { %355 = vmatpush1.msra.mxu1 %v132_v21  ;;  %3489 = vmatprep.subr.mxu0 %v115_v22  ;;  %v107_v46 = vld [vmem:[%s5150_s1 + $0x80] sm:$0xff]  ;;  %v28_v48 = vld [vmem:[%s5149_s0 + $0x8] sm:$0xff]  ;;  %v30_v53 = vld [vmem:[%s5149_s0 + $0x18] sm:$0xff] }
  0x11   :  { %356 = vmatprep.subr.mxu1 %v3649_v3  ;;  %3490 = vmatpush3.msra.mxu0 %v99_v23  ;;  %v91_v47 = vld [vmem:[%s5150_s1] sm:$0xff]  ;;  %v32_v51 = vld [vmem:[%s5149_s0 + $0x28] sm:$0xff]  ;;  %v29_v56 = vld [vmem:[%s5149_s0 + $0x10] sm:$0xff] }
  0x12   :  { %357 = vmatpush1.msra.mxu1 %v131_v24  ;;  %3491 = vmatprep.subr.mxu0 %v114_v25  ;;  %v123_v49 = vld [vmem:[%s5150_s1 + $0x100] sm:$0xff]  ;;  %v140_v52 = vld [vmem:[%s5150_s1 + $0x188] sm:$0xff]  ;;  %v34_v58 = vld [vmem:[%s5149_s0 + $0x38] sm:$0xff] }
  0x13   :  { %358 = vmatprep.subr.mxu1 %v3649_v3  ;;  %3492 = vmatpush3.msra.mxu0 %v98_v26  ;;  %v27_v50 = vld [vmem:[%s5149_s0] sm:$0xff]  ;;  %v36_v57 = vld [vmem:[%s5149_s0 + $0x48] sm:$0xff] }
  0x14   :  { %359 = vmatpush1.msra.mxu1 %v130_v27  ;;  %3493 = vmatprep.subr.mxu0 %v113_v28  ;;  %v139_v54 = vld [vmem:[%s5150_s1 + $0x180] sm:$0xff] }
  0x15   :  { %360 = vmatprep.subr.mxu1 %v3649_v3  ;;  %3494 = vmatpush3.msra.mxu0 %v97_v29  ;;  %v31_v55 = vld [vmem:[%s5149_s0 + $0x20] sm:$0xff] }
  0x16   :  { %361 = vmatpush1.msra.mxu1 %v129_v30  ;;  %3495 = vmatprep.subr.mxu0 %v112_v31  ;;  %v35_v59 = vld [vmem:[%s5149_s0 + $0x40] sm:$0xff] }
  0x17   :  { %362 = vmatprep.subr.mxu1 %v3649_v3  ;;  %3496 = vmatpush3.msra.mxu0 %v96_v32 }
  0x18   :  { %363 = vmatpush1.msra.mxu1 %v128_v33  ;;  %3497 = vmatprep.subr.mxu0 %v111_v34 }
  0x19   :  { %364 = vmatprep.subr.mxu1 %v3649_v3  ;;  %3498 = vmatpush3.msra.mxu0 %v95_v35 }
  0x1a   :  { %365 = vmatpush1.msra.mxu1 %v127_v36  ;;  %3499 = vmatprep.subr.mxu0 %v110_v37 }
  0x1b   :  { %366 = vmatprep.subr.mxu1 %v3649_v3  ;;  %3500 = vmatpush3.msra.mxu0 %v94_v38 }
  0x1c   :  { %367 = vmatpush1.msra.mxu1 %v126_v39  ;;  %3501 = vmatprep.subr.mxu0 %v109_v40 }
  0x1d   :  { %368 = vmatprep.subr.mxu1 %v3649_v3  ;;  %3502 = vmatpush3.msra.mxu0 %v93_v41 }
  0x1e   :  { %369 = vmatpush1.msra.mxu1 %v125_v42  ;;  %3503 = vmatprep.subr.mxu0 %v108_v43 }
  0x1f   :  { %370 = vmatprep.subr.mxu1 %v3649_v3  ;;  %3504 = vmatpush3.msra.mxu0 %v92_v44 }
  0x20   :  { %371 = vmatpush1.msra.mxu1 %v124_v45  ;;  %3505 = vmatprep.subr.mxu0 %v107_v46 }
  0x21   :  { %372 = vmatprep.subr.mxu1 %v3649_v3  ;;  %3506 = vmatpush3.msra.mxu0 %v91_v47 }
  0x22   :  { %261 = vmatprep.mubr.f32.mxu0 %v28_v48  ;;  %373 = vmatpush1.msra.mxu1 %v123_v49 }
  0x23   :  { %262 = vmatmul.mubr.f32.vlgmr.msra.gmra.mxu0 %v27_v50  ;;  %402 = vmatprep.subr.mxu1 %v3649_v3 }
  0x24   :  { %266 = vmatprep.mubr.f32.mxu0 %v32_v51  ;;  %403 = vmatpush2.msra.mxu1 %v140_v52 }
  0x25   :  { %3426 = vmatprep.mubr.msk.f32.mxu1 %vm148_vm0, %v30_v53  ;;  %404 = vmatprep.subr.mxu1 %v3649_v3 }
  0x26   :  { %405 = vmatpush2.msra.mxu1 %v139_v54 }
  0x27   :  { %267 = vmatmul.mubr.f32.gmra.mxu0 %v31_v55  ;;  %407 = vmatmul.mubr.f32.vlgmr.msra.gmra.mxu1 %v29_v56 }
  0x28   :  { %271 = vmatprep.mubr.f32.mxu0 %v36_v57 }
  0x29   :  { %12 = vsyncpa [#allocation4], 0  ;;  %3427 = vmatprep.mubr.msk.f32.mxu1 %vm148_vm0, %v34_v58  ;;  %v33_v60 = vld [vmem:[%s5149_s0 + $0x30] sm:$0xff]  ;;  %v40_v61 = vld [vmem:[%s5149_s0 + $0x68] sm:$0xff]  ;;  %vm515_vm1 = vcmask 261120   ;;  %s3650_s30 = smov [#allocation3]  }
  0x2a   :  { %v38_v62 = vld [vmem:[%s5149_s0 + $0x58] sm:$0xff]  ;;  %v39_v63 = vld [vmem:[%s5149_s0 + $0x60] sm:$0xff]  ;;  %v37_v0 = vld [vmem:[%s5149_s0 + $0x50] sm:$0xff]  ;;  %s3417_s8 = sshll.u32 %s3650_s30, 4  ;;  %vm3409_vm2 = vcmask 74752   ;;  %s3418_s8 = int_to_ptr.vmem [resolvable:$true] %s3417_s8 }
  0x2b   :  { %272 = vmatmul.mubr.f32.gmra.mxu0 %v35_v59  ;;  %412 = vmatmul.mubr.f32.gmra.mxu1 %v33_v60  ;;  %v44_v1 = vld [vmem:[%s5149_s0 + $0x88] sm:$0xff]  ;;  %v42_v2 = vld [vmem:[%s5149_s0 + $0x78] sm:$0xff]  ;;  %v43_v4 = vld [vmem:[%s5149_s0 + $0x80] sm:$0xff]  ;;  %s3627_s9 = scalar_lea.vmem %s3418_s8, 32  ;;  %p3632_p1 = scmp.lt.s32.totalorder %s3418_s8, %s3418_s8 }
  0x2c   :  { %276 = vmatprep.mubr.f32.mxu0 %v40_v61  ;;  %3428 = vmatprep.mubr.msk.f32.mxu1 %vm148_vm0, %v38_v62  ;;  %v41_v5 = vld [vmem:[%s5149_s0 + $0x70] sm:$0xff]  ;;  %v48_v6 = vld [vmem:[%s5149_s0 + $0xa8] sm:$0xff]  ;;  %v46_v7 = vld [vmem:[%s5149_s0 + $0x98] sm:$0xff]  ;;  %p3628_p0 = scmp.ne.s32.totalorder %s3418_s8, %s3627_s9  ;;  %p3633_p2 = scmp.lt.s32.totalorder %s3627_s9, %s3627_s9 }
  0x2d   :  { %v47_v8 = vld [vmem:[%s5149_s0 + $0xa0] sm:$0xff]  ;;  %v45_v9 = vld [vmem:[%s5149_s0 + $0x90] sm:$0xff]  ;;  %v52_v10 = vld [vmem:[%s5149_s0 + $0xc8] sm:$0xff] }
  0x2e   :  { %v50_v11 = vld [vmem:[%s5149_s0 + $0xb8] sm:$0xff]  ;;  %v51_v12 = vld [vmem:[%s5149_s0 + $0xc0] sm:$0xff]  ;;  %v49_v13 = vld [vmem:[%s5149_s0 + $0xb0] sm:$0xff]  ;;  %p3634_p3 = por %p3633_p2, %p3632_p1 }
  0x2f   :  { %277 = vmatmul.mubr.f32.gmra.mxu0 %v39_v63  ;;  %417 = vmatmul.mubr.f32.gmra.mxu1 %v37_v0  ;;  %v56_v14 = vld [vmem:[%s5149_s0 + $0xe8] sm:$0xff]  ;;  %v54_v15 = vld [vmem:[%s5149_s0 + $0xd8] sm:$0xff]  ;;  %v55_v16 = vld [vmem:[%s5149_s0 + $0xe0] sm:$0xff] }
  0x30   :  { %281 = vmatprep.mubr.f32.mxu0 %v44_v1  ;;  %3429 = vmatprep.mubr.msk.f32.mxu1 %vm148_vm0, %v42_v2  ;;  %v53_v17 = vld [vmem:[%s5149_s0 + $0xd0] sm:$0xff]  ;;  %v60_v18 = vld [vmem:[%s5149_s0 + $0x108] sm:$0xff]  ;;  %v58_v19 = vld [vmem:[%s5149_s0 + $0xf8] sm:$0xff]  ;;  %p3635_p4 = pnand %p3634_p3, %p3628_p0 }
  0x31   :  { %v59_v20 = vld [vmem:[%s5149_s0 + $0x100] sm:$0xff]  ;;  %v57_v21 = vld [vmem:[%s5149_s0 + $0xf0] sm:$0xff]  ;;  %v64_v22 = vld [vmem:[%s5149_s0 + $0x128] sm:$0xff] }
  0x32   :  { %v62_v23 = vld [vmem:[%s5149_s0 + $0x118] sm:$0xff]  ;;  %v63_v24 = vld [vmem:[%s5149_s0 + $0x120] sm:$0xff]  ;;  %v61_v25 = vld [vmem:[%s5149_s0 + $0x110] sm:$0xff] }
  0x33   :  { %282 = vmatmul.mubr.f32.gmra.mxu0 %v43_v4  ;;  %422 = vmatmul.mubr.f32.gmra.mxu1 %v41_v5  ;;  %v68_v26 = vld [vmem:[%s5149_s0 + $0x148] sm:$0xff]  ;;  %v66_v27 = vld [vmem:[%s5149_s0 + $0x138] sm:$0xff]  ;;  %v67_v28 = vld [vmem:[%s5149_s0 + $0x140] sm:$0xff] }
  0x34   :  { %286 = vmatprep.mubr.f32.mxu0 %v48_v6  ;;  %3430 = vmatprep.mubr.msk.f32.mxu1 %vm148_vm0, %v46_v7  ;;  %v65_v29 = vld [vmem:[%s5149_s0 + $0x130] sm:$0xff]  ;;  %v72_v30 = vld [vmem:[%s5149_s0 + $0x168] sm:$0xff]  ;;  %v70_v31 = vld [vmem:[%s5149_s0 + $0x158] sm:$0xff] }
  0x35   :  { %v71_v32 = vld [vmem:[%s5149_s0 + $0x160] sm:$0xff]  ;;  %v69_v33 = vld [vmem:[%s5149_s0 + $0x150] sm:$0xff]  ;;  %v76_v34 = vld [vmem:[%s5149_s0 + $0x188] sm:$0xff] }
  0x36   :  { %v74_v35 = vld [vmem:[%s5149_s0 + $0x178] sm:$0xff]  ;;  %v75_v36 = vld [vmem:[%s5149_s0 + $0x180] sm:$0xff]  ;;  %v73_v37 = vld [vmem:[%s5149_s0 + $0x170] sm:$0xff] }
  0x37   :  { %287 = vmatmul.mubr.f32.gmra.mxu0 %v47_v8  ;;  %427 = vmatmul.mubr.f32.gmra.mxu1 %v45_v9  ;;  %v80_v38 = vld [vmem:[%s5149_s0 + $0x1a8] sm:$0xff]  ;;  %v78_v39 = vld [vmem:[%s5149_s0 + $0x198] sm:$0xff]  ;;  %v79_v40 = vld [vmem:[%s5149_s0 + $0x1a0] sm:$0xff] }
  0x38   :  { %291 = vmatprep.mubr.f32.mxu0 %v52_v10  ;;  %3431 = vmatprep.mubr.msk.f32.mxu1 %vm148_vm0, %v50_v11  ;;  %v77_v41 = vld [vmem:[%s5149_s0 + $0x190] sm:$0xff]  ;;  %v84_v42 = vld [vmem:[%s5149_s0 + $0x1c8] sm:$0xff]  ;;  %v82_v43 = vld [vmem:[%s5149_s0 + $0x1b8] sm:$0xff] }
  0x39   :  { %v83_v44 = vld [vmem:[%s5149_s0 + $0x1c0] sm:$0xff]  ;;  %v81_v45 = vld [vmem:[%s5149_s0 + $0x1b0] sm:$0xff]  ;;  %v88_v46 = vld [vmem:[%s5149_s0 + $0x1e8] sm:$0xff] }
  0x3a   :  { %v86_v47 = vld [vmem:[%s5149_s0 + $0x1d8] sm:$0xff]  ;;  %v87_v48 = vld [vmem:[%s5149_s0 + $0x1e0] sm:$0xff]  ;;  %v85_v49 = vld [vmem:[%s5149_s0 + $0x1d0] sm:$0xff] }
  0x3b   :  { %292 = vmatmul.mubr.f32.gmra.mxu0 %v51_v12  ;;  %432 = vmatmul.mubr.f32.gmra.mxu1 %v49_v13  ;;  %v90_v50 = vld [vmem:[%s5149_s0 + $0x1f8] sm:$0xff]  ;;  %v89_v51 = vld [vmem:[%s5149_s0 + $0x1f0] sm:$0xff]  ;;  %v551_v52 = vld [vmem:[%s5152_s3 + $0xe8] sm:$0xff] }
  0x3c   :  { %296 = vmatprep.mubr.f32.mxu0 %v56_v14  ;;  %3432 = vmatprep.mubr.msk.f32.mxu1 %vm148_vm0, %v54_v15  ;;  %v550_v53 = vld [vmem:[%s5152_s3 + $0xe0] sm:$0xff]  ;;  %v553_v54 = vld [vmem:[%s5152_s3 + $0xf8] sm:$0xff]  ;;  %v552_v55 = vld [vmem:[%s5152_s3 + $0xf0] sm:$0xff] }
  0x3d   :  { %581 = vmatprep.subr.mxu0 %v551_v52  ;;  %652 = vmatprep.subr.mxu1 %v553_v54  ;;  %v547_v56 = vld [vmem:[%s5152_s3 + $0xc8] sm:$0xff]  ;;  %v546_v57 = vld [vmem:[%s5152_s3 + $0xc0] sm:$0xff]  ;;  %v549_v58 = vld [vmem:[%s5152_s3 + $0xd8] sm:$0xff] }
  0x3e   :  { %582 = vmatpush1.msra.mxu0 %v550_v53  ;;  %653 = vmatpush1.msra.mxu1 %v552_v55  ;;  %v548_v59 = vld [vmem:[%s5152_s3 + $0xd0] sm:$0xff]  ;;  %v543_v60 = vld [vmem:[%s5152_s3 + $0xa8] sm:$0xff]  ;;  %v542_v61 = vld [vmem:[%s5152_s3 + $0xa0] sm:$0xff] }
  0x3f   :  { %297 = vmatmul.mubr.f32.gmra.mxu0 %v55_v16  ;;  %437 = vmatmul.mubr.f32.gmra.mxu1 %v53_v17  ;;  %v545_v62 = vld [vmem:[%s5152_s3 + $0xb8] sm:$0xff]  ;;  %v544_v63 = vld [vmem:[%s5152_s3 + $0xb0] sm:$0xff]  ;;  %v539_v0 = vld [vmem:[%s5152_s3 + $0x88] sm:$0xff] }
  0x40   :  { %301 = vmatprep.mubr.f32.mxu0 %v60_v18  ;;  %3433 = vmatprep.mubr.msk.f32.mxu1 %vm148_vm0, %v58_v19  ;;  %v538_v1 = vld [vmem:[%s5152_s3 + $0x80] sm:$0xff]  ;;  %v541_v2 = vld [vmem:[%s5152_s3 + $0x98] sm:$0xff]  ;;  %v540_v4 = vld [vmem:[%s5152_s3 + $0x90] sm:$0xff] }
  0x41   :  { %583 = vmatprep.subr.mxu0 %v547_v56  ;;  %654 = vmatprep.subr.mxu1 %v549_v58  ;;  %v534_v5 = vld [vmem:[%s5152_s3 + $0x68] sm:$0xff]  ;;  %v536_v6 = vld [vmem:[%s5152_s3 + $0x78] sm:$0xff] }
  0x42   :  { %584 = vmatpush1.msra.mxu0 %v546_v57  ;;  %655 = vmatpush1.msra.mxu1 %v548_v59 }
  0x43   :  { %302 = vmatmul.mubr.f32.gmra.mxu0 %v59_v20  ;;  %442 = vmatmul.mubr.f32.gmra.mxu1 %v57_v21 }
  0x44   :  { %306 = vmatprep.mubr.f32.mxu0 %v64_v22  ;;  %3434 = vmatprep.mubr.msk.f32.mxu1 %vm148_vm0, %v62_v23 }
  0x45   :  { %585 = vmatprep.subr.mxu0 %v543_v60  ;;  %656 = vmatprep.subr.mxu1 %v545_v62 }
  0x46   :  { %586 = vmatpush1.msra.mxu0 %v542_v61  ;;  %657 = vmatpush1.msra.mxu1 %v544_v63 }
  0x47   :  { %307 = vmatmul.mubr.f32.gmra.mxu0 %v63_v24  ;;  %447 = vmatmul.mubr.f32.gmra.mxu1 %v61_v25 }
  0x48   :  { %311 = vmatprep.mubr.f32.mxu0 %v68_v26  ;;  %3435 = vmatprep.mubr.msk.f32.mxu1 %vm148_vm0, %v66_v27 }
  0x49   :  { %587 = vmatprep.subr.mxu0 %v539_v0  ;;  %658 = vmatprep.subr.mxu1 %v541_v2 }
  0x4a   :  { %588 = vmatpush1.msra.mxu0 %v538_v1  ;;  %659 = vmatpush1.msra.mxu1 %v540_v4 }
  0x4b   :  { %312 = vmatmul.mubr.f32.gmra.mxu0 %v67_v28  ;;  %452 = vmatmul.mubr.f32.gmra.mxu1 %v65_v29 }
  0x4c   :  { %316 = vmatprep.mubr.f32.mxu0 %v72_v30  ;;  %3436 = vmatprep.mubr.msk.f32.mxu1 %vm148_vm0, %v70_v31 }
  0x4d   :  { %726 = vmatprep.subr.mxu0 %v534_v5  ;;  %797 = vmatprep.subr.mxu1 %v536_v6 }
  0x4f   :  { %317 = vmatmul.mubr.f32.gmra.mxu0 %v71_v32  ;;  %457 = vmatmul.mubr.f32.gmra.mxu1 %v69_v33 }
  0x50   :  { %321 = vmatprep.mubr.f32.mxu0 %v76_v34  ;;  %3437 = vmatprep.mubr.msk.f32.mxu1 %vm148_vm0, %v74_v35 }
  0x53   :  { %322 = vmatmul.mubr.f32.gmra.mxu0 %v75_v36  ;;  %462 = vmatmul.mubr.f32.gmra.mxu1 %v73_v37 }
  0x54   :  { %326 = vmatprep.mubr.f32.mxu0 %v80_v38  ;;  %3438 = vmatprep.mubr.msk.f32.mxu1 %vm148_vm0, %v78_v39 }
  0x57   :  { %327 = vmatmul.mubr.f32.gmra.mxu0 %v79_v40  ;;  %467 = vmatmul.mubr.f32.gmra.mxu1 %v77_v41 }
  0x58   :  { %331 = vmatprep.mubr.f32.mxu0 %v84_v42  ;;  %3439 = vmatprep.mubr.msk.f32.mxu1 %vm148_vm0, %v82_v43 }
  0x5b   :  { %332 = vmatmul.mubr.f32.gmra.mxu0 %v83_v44  ;;  %472 = vmatmul.mubr.f32.gmra.mxu1 %v81_v45 }
  0x5c   :  { %336 = vmatprep.mubr.f32.mxu0 %v88_v46  ;;  %3440 = vmatprep.mubr.msk.f32.mxu1 %vm148_vm0, %v86_v47 }
  0x5f   :  { %337 = vmatmul.mubr.f32.gmra.mxu0 %v87_v48  ;;  %477 = vmatmul.mubr.f32.gmra.mxu1 %v85_v49 }
  0x60   :  { %621 = vmatprep.mubr.f32.mxu0 %v3649_v3  ;;  %3441 = vmatprep.mubr.msk.f32.mxu1 %vm148_vm0, %v90_v50 }
  0x63   :  { %482 = vmatmul.mubr.f32.gmra.mxu1 %v89_v51  ;;  %v4140_v51 = vld [vmem:[%s5151_s2] ss:$0 sm:$0xff] }
  0x64   :  { %692 = vmatprep.mubr.f32.mxu1 %v3649_v3 }
  0xe3   :  { %v3507_v7 = vpop.f32.mrf.mxu0 }
  0xe5   :  { %v3508_v8 = vpop.f32.mrf.mxu0 }
  0xe6   :  { %v3509_v49 = vadd.f32 %v3508_v8, %v3507_v7 }
  0xe7   :  { %v3510_v9 = vpop.f32.mrf.mxu0  ;;  %v408_v10 = vpop.f32.mrf.mxu1 }
  0xe8   :  { %v264_v59 = vadd.f32 %v3509_v49, %v4140_v51 }
  0xe9   :  { %v3511_v11 = vpop.f32.mrf.mxu0  ;;  %v410_v12 = vpop.f32.mrf.mxu1 }
  0xea   :  { %v3512_v55 = vadd.f32 %v3511_v11, %v3510_v9  ;;  %v409_v7 = vadd.f32 %v408_v10, %v264_v59 }
  0xeb   :  { %v3513_v13 = vpop.f32.mrf.mxu0  ;;  %v4123_v14 = vpop.f32.mrf.mxu1 }
  0xec   :  { %v269_v1 = vadd.f32 %v3512_v55, %v4140_v51  ;;  %v487_v10 = vmax.f32 %v409_v7, 0.0 }
  0xed   :  { %v3514_v15 = vpop.f32.mrf.mxu0  ;;  %v415_v16 = vpop.f32.mrf.mxu1 }
  0xee   :  { %v3515_v11 = vadd.f32 %v3514_v15, %v3513_v13 }
  0xef   :  { %v4125_v17 = vpop.f32.mrf.mxu0  ;;  %v4127_v18 = vpop.f32.mrf.mxu1 }
  0xf1   :  { %v4129_v19 = vpop.f32.mrf.mxu0  ;;  %v420_v20 = vpop.f32.mrf.mxu1 }
  0xf3   :  { %v3519_v21 = vpop.f32.mrf.mxu0  ;;  %v4131_v22 = vpop.f32.mrf.mxu1 }
  0xf5   :  { %v3520_v23 = vpop.f32.mrf.mxu0  ;;  %v425_v24 = vpop.f32.mrf.mxu1 }
  0xf6   :  { %v3521_v47 = vadd.f32 %v3520_v23, %v3519_v21 }
  0xf7   :  { %v3522_v25 = vpop.f32.mrf.mxu0  ;;  %v428_v26 = vpop.f32.mrf.mxu1 }
  0xf8   :  { %v284_v56 = vadd.f32 %v3521_v47, %v4140_v51 }
  0xf9   :  { %v3523_v27 = vpop.f32.mrf.mxu0  ;;  %v430_v28 = vpop.f32.mrf.mxu1 }
  0xfa   :  { %v3524_v57 = vadd.f32 %v3523_v27, %v3522_v25  ;;  %v429_v2 = vadd.f32 %v428_v26, %v284_v56  ;;  %v414_v25 = vadd.f32 %v4123_v14, %v269_v1 }
  0xfb   :  { %v3525_v29 = vpop.f32.mrf.mxu0  ;;  %v433_v30 = vpop.f32.mrf.mxu1 }
  0xfc   :  { %v289_v4 = vadd.f32 %v3524_v57, %v4140_v51  ;;  %v491_v26 = vmax.f32 %v429_v2, 0.0 }
  0xfd   :  { %v3526_v31 = vpop.f32.mrf.mxu0  ;;  %v435_v32 = vpop.f32.mrf.mxu1 }
  0xfe   :  { %v3527_v5 = vadd.f32 %v3526_v31, %v3525_v29  ;;  %v434_v27 = vadd.f32 %v433_v30, %v289_v4 }
  0xff   :  { %v3528_v33 = vpop.f32.mrf.mxu0  ;;  %v4133_v34 = vpop.f32.mrf.mxu1 }
 0x100   :  { %v294_v28 = vadd.f32 %v3527_v5, %v4140_v51 }
 0x101   :  { %v3529_v35 = vpop.f32.mrf.mxu0  ;;  %v440_v36 = vpop.f32.mrf.mxu1 }
 0x102   :  { %v3530_v31 = vadd.f32 %v3529_v35, %v3528_v33  ;;  %v274_v36 = vadd.f32 %v3515_v11, %v4140_v51  ;;  %v503_v33 = vmax.f32 %v487_v10, %v491_v26  ;;  %v492_v35 = vmax.f32 %v434_v27, 0.0  ;;  %v530_v10 = vld [vmem:[%s5152_s3 + $0x48] sm:$0xff] }
 0x103   :  { %v3531_v37 = vpop.f32.mrf.mxu0  ;;  %v4135_v38 = vpop.f32.mrf.mxu1  ;;  %v439_v47 = vadd.f32 %v4133_v34, %v294_v28 }
 0x104   :  { %v299_v49 = vadd.f32 %v3530_v31, %v4140_v51  ;;  %v532_v31 = vld [vmem:[%s5152_s3 + $0x58] sm:$0xff] }
 0x105   :  { %v3532_v39 = vpop.f32.mrf.mxu0  ;;  %v445_v40 = vpop.f32.mrf.mxu1 }
 0x106   :  { %v3533_v53 = vadd.f32 %v3532_v39, %v3531_v37  ;;  %v3518_v37 = vadd.f32 %v4129_v19, %v4125_v17  ;;  %v444_v2 = vadd.f32 %v4135_v38, %v299_v49  ;;  %v854_v49 = vld [vmem:[%s5152_s3 + $0x148] sm:$0xff] }
 0x107   :  { %v3534_v41 = vpop.f32.mrf.mxu0  ;;  %v448_v42 = vpop.f32.mrf.mxu1 }
 0x108   :  { %v304_v63 = vadd.f32 %v3533_v53, %v4140_v51  ;;  %v419_v53 = vadd.f32 %v4127_v18, %v274_v36  ;;  %v531_v36 = vld [vmem:[%s5152_s3 + $0x50] sm:$0xff] }
 0x109   :  { %v3535_v43 = vpop.f32.mrf.mxu0  ;;  %v450_v44 = vpop.f32.mrf.mxu1 }
 0x10a   :  { %v3536_v61 = vadd.f32 %v3535_v43, %v3534_v41  ;;  %v449_v21 = vadd.f32 %v448_v42, %v304_v63  ;;  %v493_v63 = vmax.f32 %v439_v47, 0.0  ;;  %v857_v47 = vld [vmem:[%s5152_s3 + $0x160] sm:$0xff] }
 0x10b   :  { %v3537_v45 = vpop.f32.mrf.mxu0  ;;  %v453_v46 = vpop.f32.mrf.mxu1 }
 0x10c   :  { %v309_v12 = vadd.f32 %v3536_v61, %v4140_v51  ;;  %v495_v14 = vmax.f32 %v449_v21, 0.0 }
 0x10d   :  { %v3538_v48 = vpop.f32.mrf.mxu0  ;;  %v455_v50 = vpop.f32.mrf.mxu1 }
 0x10e   :  { %v3539_v16 = vadd.f32 %v3538_v48, %v3537_v45  ;;  %v454_v39 = vadd.f32 %v453_v46, %v309_v12  ;;  %v488_v45 = vmax.f32 %v414_v25, 0.0 }
 0x10f   :  { %v3540_v52 = vpop.f32.mrf.mxu0  ;;  %v458_v54 = vpop.f32.mrf.mxu1 }
 0x110   :  { %v314_v40 = vadd.f32 %v3539_v16, %v4140_v51  ;;  %v496_v55 = vmax.f32 %v454_v39, 0.0  ;;  %v528_v39 = vld [vmem:[%s5152_s3 + $0x38] sm:$0xff] }
 0x111   :  { %v3541_v58 = vpop.f32.mrf.mxu0  ;;  %v460_v60 = vpop.f32.mrf.mxu1 }
 0x112   :  { %v3542_v42 = vadd.f32 %v3541_v58, %v3540_v52  ;;  %v279_v52 = vadd.f32 %v3518_v37, %v4140_v51  ;;  %v459_v56 = vadd.f32 %v458_v54, %v314_v40  ;;  %v489_v54 = vmax.f32 %v419_v53, 0.0  ;;  %v526_v37 = vld [vmem:[%s5152_s3 + $0x28] sm:$0xff]  ;;  %v852_v53 = vld [vmem:[%s5152_s3 + $0x138] sm:$0xff] }
 0x113   :  { %v3543_v62 = vpop.f32.mrf.mxu0  ;;  %v4145_v0 = vpop.f32.mrf.mxu1 }
 0x114   :  { %v319_v58 = vadd.f32 %v3542_v42, %v4140_v51  ;;  %v424_v7 = vadd.f32 %v4131_v22, %v279_v52  ;;  %v505_v21 = vmax.f32 %v489_v54, %v493_v63  ;;  %v533_v22 = vld [vmem:[%s5152_s3 + $0x60] sm:$0xff]  ;;  %v522_v42 = vld [vmem:[%s5152_s3 + $0x8] sm:$0xff]  ;;  %v1025_v63 = vld [vmem:[%s5152_s3 + $0x1f0] sm:$0xff] }
 0x115   :  { %v3544_v6 = vpop.f32.mrf.mxu0  ;;  %v465_v9 = vpop.f32.mrf.mxu1  ;;  %v849_v52 = vld [vmem:[%s5152_s3 + $0x120] sm:$0xff] }
 0x116   :  { %v3545_v8 = vadd.f32 %v3544_v6, %v3543_v62  ;;  %v504_v62 = vmax.f32 %v488_v45, %v492_v35  ;;  %v464_v9 = vadd.f32 %v4145_v0, %v319_v58  ;;  %v490_v26 = vmax.f32 %v424_v7, 0.0  ;;  %v858_v45 = vld [vmem:[%s5152_s3 + $0x168] sm:$0xff]  ;;  %v845_v58 = vld [vmem:[%s5152_s3 + $0x100] sm:$0xff]  ;;  %v1017_v7 = vld [vmem:[%s5152_s3 + $0x1b0] sm:$0xff] }
 0x117   :  { %v3546_v20 = vpop.f32.mrf.mxu0  ;;  %v468_v24 = vpop.f32.mrf.mxu1  ;;  %v1015_v54 = vld [vmem:[%s5152_s3 + $0x1a0] sm:$0xff] }
 0x118   :  { %v324_v23 = vadd.f32 %v3545_v8, %v4140_v51  ;;  %v497_v8 = vmax.f32 %v459_v56, 0.0  ;;  %v498_v27 = vmax.f32 %v464_v9, 0.0  ;;  %v846_v56 = vld [vmem:[%s5152_s3 + $0x108] sm:$0xff]  ;;  %v1014_v9 = vld [vmem:[%s5152_s3 + $0x198] sm:$0xff] }
 0x119   :  { %v3547_v29 = vpop.f32.mrf.mxu0  ;;  %v470_v15 = vpop.f32.mrf.mxu1 }
 0x11a   :  { %v469_v32 = vadd.f32 %v468_v24, %v324_v23  ;;  %v3548_v13 = vadd.f32 %v3547_v29, %v3546_v20  ;;  %v494_v23 = vmax.f32 %v444_v2, 0.0  ;;  %v529_v15 = vld [vmem:[%s5152_s3 + $0x40] sm:$0xff]  ;;  %v1022_v2 = vld [vmem:[%s5152_s3 + $0x1d8] sm:$0xff] }
 0x11b   :  { %v3549_v41 = vpop.f32.mrf.mxu0  ;;  %v473_v44 = vpop.f32.mrf.mxu1 }
 0x11c   :  { %v499_v30 = vmax.f32 %v469_v32, 0.0  ;;  %v329_v43 = vadd.f32 %v3548_v13, %v4140_v51  ;;  %v506_v32 = vmax.f32 %v490_v26, %v494_v23  ;;  %v1189_v23 = vld [vmem:[%s5152_s3 + $0x260] sm:$0xff] }
 0x11d   :  { %v3550_v48 = vpop.f32.mrf.mxu0  ;;  %v475_v46 = vpop.f32.mrf.mxu1  ;;  %v1185_v26 = vld [vmem:[%s5152_s3 + $0x240] sm:$0xff] }
 0x11e   :  { %v507_v50 = vmax.f32 %v495_v14, %v499_v30  ;;  %v3551_v17 = vadd.f32 %v3550_v48, %v3549_v41  ;;  %v474_v19 = vadd.f32 %v473_v44, %v329_v43  ;;  %v525_v41 = vld [vmem:[%s5152_s3 + $0x20] sm:$0xff]  ;;  %v527_v14 = vld [vmem:[%s5152_s3 + $0x30] sm:$0xff]  ;;  %v524_v30 = vld [vmem:[%s5152_s3 + $0x18] sm:$0xff] }
 0x11f   :  { %v3552_v57 = vpop.f32.mrf.mxu0  ;;  %v478_v61 = vpop.f32.mrf.mxu1  ;;  %v521_v43 = vld [vmem:[%s5152_s3] sm:$0xff]  ;;  %v523_v44 = vld [vmem:[%s5152_s3 + $0x10] sm:$0xff]  ;;  %v850_v46 = vld [vmem:[%s5152_s3 + $0x128] sm:$0xff] }
 0x120   :  { %v511_v59 = vmax.f32 %v503_v33, %v507_v50  ;;  %v500_v60 = vmax.f32 %v474_v19, 0.0  ;;  %v334_v34 = vadd.f32 %v3551_v17, %v4140_v51  ;;  %v860_v33 = vld [vmem:[%s5152_s3 + $0x178] sm:$0xff]  ;;  %v859_v48 = vld [vmem:[%s5152_s3 + $0x170] sm:$0xff]  ;;  %v853_v17 = vld [vmem:[%s5152_s3 + $0x140] sm:$0xff] }
 0x121   :  { %v3553_v1 = vpop.f32.mrf.mxu0  ;;  %v480_v6 = vpop.f32.mrf.mxu1  ;;  %v856_v50 = vld [vmem:[%s5152_s3 + $0x158] sm:$0xff]  ;;  %v855_v19 = vld [vmem:[%s5152_s3 + $0x150] sm:$0xff] }
 0x122   :  { %516 = vst.msk [vmem:[#allocation2] sm:$0xff] %vm515_vm1, %v511_v59  ;;  %v508_v18 = vmax.f32 %v496_v55, %v500_v60  ;;  %v3554_v4 = vadd.f32 %v3553_v1, %v3552_v57  ;;  %v479_v5 = vadd.f32 %v478_v61, %v334_v34  ;;  %v851_v55 = vld [vmem:[%s5152_s3 + $0x130] sm:$0xff]  ;;  %v848_v57 = vld [vmem:[%s5152_s3 + $0x118] sm:$0xff]  ;;  %v1024_v60 = vld [vmem:[%s5152_s3 + $0x1e8] sm:$0xff] }
 0x123   :  { %v483_v20 = vpop.f32.mrf.mxu1  ;;  %v847_v59 = vld [vmem:[%s5152_s3 + $0x110] sm:$0xff]  ;;  %v1026_v34 = vld [vmem:[%s5152_s3 + $0x1f8] sm:$0xff]  ;;  %v1020_v1 = vld [vmem:[%s5152_s3 + $0x1c8] sm:$0xff] }
 0x124   :  { %v512_v11 = vmax.f32 %v504_v62, %v508_v18  ;;  %v501_v12 = vmax.f32 %v479_v5, 0.0  ;;  %v339_v16 = vadd.f32 %v3554_v4, %v4140_v51  ;;  %v535_v51 = vld [vmem:[%s5152_s3 + $0x70] sm:$0xff]  ;;  %v1023_v62 = vld [vmem:[%s5152_s3 + $0x1e0] sm:$0xff]  ;;  %v1016_v5 = vld [vmem:[%s5152_s3 + $0x1a8] sm:$0xff] }
 0x125   :  { %v485_v25 = vpop.f32.mrf.mxu1  ;;  %v1019_v18 = vld [vmem:[%s5152_s3 + $0x1c0] sm:$0xff]  ;;  %v1021_v4 = vld [vmem:[%s5152_s3 + $0x1d0] sm:$0xff]  ;;  %v1018_v6 = vld [vmem:[%s5152_s3 + $0x1b8] sm:$0xff] }
 0x126   :  { %517 = vst.msk [vmem:[#allocation2 + $0x8] sm:$0xff] %vm515_vm1, %v512_v11  ;;  %v509_v38 = vmax.f32 %v497_v8, %v501_v12  ;;  %v484_v24 = vadd.f32 %v483_v20, %v339_v16  ;;  %v1012_v8 = vld [vmem:[%s5152_s3 + $0x188] sm:$0xff]  ;;  %v1011_v11 = vld [vmem:[%s5152_s3 + $0x180] sm:$0xff]  ;;  %v1013_v12 = vld [vmem:[%s5152_s3 + $0x190] sm:$0xff] }
 0x127   :  { %v1190_v16 = vld [vmem:[%s5152_s3 + $0x268] sm:$0xff]  ;;  %v1192_v20 = vld [vmem:[%s5152_s3 + $0x278] sm:$0xff] }
 0x128   :  { %v513_v28 = vmax.f32 %v505_v21, %v509_v38  ;;  %v502_v29 = vmax.f32 %v484_v24, 0.0  ;;  %v1191_v38 = vld [vmem:[%s5152_s3 + $0x270] sm:$0xff]  ;;  %v1186_v24 = vld [vmem:[%s5152_s3 + $0x248] sm:$0xff]  ;;  %v1188_v25 = vld [vmem:[%s5152_s3 + $0x258] sm:$0xff] }
 0x129   :  { %v537_v0 = vld [vmem:[#allocation2 + $0x2] sm:$0x3]  ;;  %v520_v35 = vld [vmem:[#allocation2] sm:$0x3]  ;;  %v844_v61 = vld [vmem:[#allocation2 + $0x4] sm:$0x3] }
 0x12a   :  { %518 = vst.msk [vmem:[#allocation2 + $0x10] sm:$0xff] %vm515_vm1, %v513_v28  ;;  %v510_v13 = vmax.f32 %v498_v27, %v502_v29  ;;  %3442 = vmatmul.mubr.msk.f32.vlgmr.msra.gmra.mxu0 %vm515_vm1, %v537_v0  ;;  %3443 = vmatmul.mubr.msk.f32.vlgmr.msra.gmra.mxu1 %vm515_vm1, %v537_v0  ;;  %v1010_v21 = vld [vmem:[#allocation2 + $0x6] sm:$0x3]  ;;  %v1187_v27 = vld [vmem:[%s5152_s3 + $0x250] sm:$0xff]  ;;  %v1182_v28 = vld [vmem:[%s5152_s3 + $0x228] sm:$0xff] }
 0x12b   :  { %727 = vmatpush1.msra.mxu0 %v533_v22  ;;  %798 = vmatpush1.msra.mxu1 %v535_v51  ;;  %v1184_v29 = vld [vmem:[%s5152_s3 + $0x238] sm:$0xff]  ;;  %v1181_v22 = vld [vmem:[%s5152_s3 + $0x220] sm:$0xff]  ;;  %v1183_v51 = vld [vmem:[%s5152_s3 + $0x230] sm:$0xff] }
 0x12c   :  { %v514_v40 = vmax.f32 %v506_v32, %v510_v13  ;;  %728 = vmatprep.subr.mxu0 %v530_v10  ;;  %799 = vmatprep.subr.mxu1 %v532_v31  ;;  %v1178_v0 = vld [vmem:[%s5152_s3 + $0x208] sm:$0xff]  ;;  %v1180_v10 = vld [vmem:[%s5152_s3 + $0x218] sm:$0xff]  ;;  %v1177_v31 = vld [vmem:[%s5152_s3 + $0x200] sm:$0xff] }
 0x12d   :  { %729 = vmatpush1.msra.mxu0 %v529_v15  ;;  %800 = vmatpush1.msra.mxu1 %v531_v36  ;;  %v1179_v32 = vld [vmem:[%s5152_s3 + $0x210] sm:$0xff]  ;;  %v1356_v13 = vld [vmem:[%s5152_s3 + $0x2e8] sm:$0xff]  ;;  %v1358_v15 = vld [vmem:[%s5152_s3 + $0x2f8] sm:$0xff] }
 0x12e   :  { %519 = vst.msk [vmem:[#allocation2 + $0x18] sm:$0xff] %vm515_vm1, %v514_v40  ;;  %730 = vmatprep.subr.mxu0 %v526_v37  ;;  %801 = vmatprep.subr.mxu1 %v528_v39  ;;  %v1176_v36 = vld [vmem:[#allocation2 + $0x8] sm:$0x3]  ;;  %v1355_v37 = vld [vmem:[%s5152_s3 + $0x2e0] sm:$0xff]  ;;  %v1357_v39 = vld [vmem:[%s5152_s3 + $0x2f0] sm:$0xff] }
 0x12f   :  { %731 = vmatpush1.msra.mxu0 %v525_v41  ;;  %802 = vmatpush1.msra.mxu1 %v527_v14  ;;  %v1352_v40 = vld [vmem:[%s5152_s3 + $0x2c8] sm:$0xff]  ;;  %v1354_v41 = vld [vmem:[%s5152_s3 + $0x2d8] sm:$0xff]  ;;  %v1351_v14 = vld [vmem:[%s5152_s3 + $0x2c0] sm:$0xff] }
 0x130   :  { %732 = vmatprep.subr.mxu0 %v522_v42  ;;  %803 = vmatprep.subr.mxu1 %v524_v30  ;;  %v1353_v42 = vld [vmem:[%s5152_s3 + $0x2d0] sm:$0xff]  ;;  %v1348_v30 = vld [vmem:[%s5152_s3 + $0x2a8] sm:$0xff] }
 0x131   :  { %733 = vmatpush1.msra.mxu0 %v521_v43  ;;  %766 = vmatprep.mubr.f32.mxu0 %v3649_v3  ;;  %v1350_v43 = vld [vmem:[%s5152_s3 + $0x2b8] sm:$0xff] }
 0x132   :  { %804 = vmatpush1.msra.mxu1 %v523_v44  ;;  %837 = vmatprep.mubr.f32.mxu1 %v3649_v3  ;;  %v1347_v44 = vld [vmem:[%s5152_s3 + $0x2a0] sm:$0xff] }
 0x133   :  { %3444 = vmatmul.mubr.msk.f32.vlgmr.msra.gmra.mxu0 %vm515_vm1, %v520_v35  ;;  %3445 = vmatmul.mubr.msk.f32.vlgmr.msra.gmra.mxu1 %vm515_vm1, %v520_v35  ;;  %v1346_v35 = vld [vmem:[%s5152_s3 + $0x298] sm:$0xff] }
 0x134   :  { %888 = vmatprep.subr.mxu0 %v858_v45  ;;  %959 = vmatprep.subr.mxu1 %v860_v33  ;;  %v1349_v45 = vld [vmem:[%s5152_s3 + $0x2b0] sm:$0xff]  ;;  %v1344_v33 = vld [vmem:[%s5152_s3 + $0x288] sm:$0xff] }
 0x135   :  { %889 = vmatpush1.msra.mxu0 %v857_v47  ;;  %960 = vmatpush1.msra.mxu1 %v859_v48  ;;  %v1343_v47 = vld [vmem:[%s5152_s3 + $0x280] sm:$0xff]  ;;  %v1345_v48 = vld [vmem:[%s5152_s3 + $0x290] sm:$0xff] }
 0x136   :  { %890 = vmatprep.subr.mxu0 %v854_v49  ;;  %961 = vmatprep.subr.mxu1 %v856_v50  ;;  %v1522_v49 = vld [vmem:[%s5152_s3 + $0x368] sm:$0xff]  ;;  %v1524_v50 = vld [vmem:[%s5152_s3 + $0x378] sm:$0xff] }
 0x137   :  { %891 = vmatpush1.msra.mxu0 %v853_v17  ;;  %962 = vmatpush1.msra.mxu1 %v855_v19  ;;  %v1342_v17 = vld [vmem:[#allocation2 + $0xa] sm:$0x3]  ;;  %v1521_v19 = vld [vmem:[%s5152_s3 + $0x360] sm:$0xff] }
 0x138   :  { %892 = vmatprep.subr.mxu0 %v850_v46  ;;  %963 = vmatprep.subr.mxu1 %v852_v53  ;;  %v1523_v46 = vld [vmem:[%s5152_s3 + $0x370] sm:$0xff]  ;;  %v1518_v53 = vld [vmem:[%s5152_s3 + $0x348] sm:$0xff] }
 0x139   :  { %893 = vmatpush1.msra.mxu0 %v849_v52  ;;  %964 = vmatpush1.msra.mxu1 %v851_v55  ;;  %v1520_v52 = vld [vmem:[%s5152_s3 + $0x358] sm:$0xff]  ;;  %v1517_v55 = vld [vmem:[%s5152_s3 + $0x340] sm:$0xff] }
 0x13a   :  { %894 = vmatprep.subr.mxu0 %v846_v56  ;;  %965 = vmatprep.subr.mxu1 %v848_v57  ;;  %v1519_v56 = vld [vmem:[%s5152_s3 + $0x350] sm:$0xff]  ;;  %v1514_v57 = vld [vmem:[%s5152_s3 + $0x328] sm:$0xff] }
 0x13b   :  { %895 = vmatpush1.msra.mxu0 %v845_v58  ;;  %928 = vmatprep.mubr.f32.mxu0 %v3649_v3  ;;  %v1516_v58 = vld [vmem:[%s5152_s3 + $0x338] sm:$0xff] }
 0x13c   :  { %966 = vmatpush1.msra.mxu1 %v847_v59  ;;  %999 = vmatprep.mubr.f32.mxu1 %v3649_v3  ;;  %v1513_v59 = vld [vmem:[%s5152_s3 + $0x320] sm:$0xff] }
 0x13d   :  { %3446 = vmatmul.mubr.msk.f32.vlgmr.msra.gmra.mxu0 %vm515_vm1, %v844_v61  ;;  %3447 = vmatmul.mubr.msk.f32.vlgmr.msra.gmra.mxu1 %vm515_vm1, %v844_v61  ;;  %v1512_v61 = vld [vmem:[%s5152_s3 + $0x318] sm:$0xff] }
 0x13e   :  { %1054 = vmatprep.subr.mxu0 %v1024_v60  ;;  %1125 = vmatprep.subr.mxu1 %v1026_v34  ;;  %v1515_v60 = vld [vmem:[%s5152_s3 + $0x330] sm:$0xff]  ;;  %v1510_v34 = vld [vmem:[%s5152_s3 + $0x308] sm:$0xff] }
 0x13f   :  { %1055 = vmatpush1.msra.mxu0 %v1023_v62  ;;  %1126 = vmatpush1.msra.mxu1 %v1025_v63  ;;  %v1509_v62 = vld [vmem:[%s5152_s3 + $0x300] sm:$0xff]  ;;  %v1511_v63 = vld [vmem:[%s5152_s3 + $0x310] sm:$0xff] }
 0x140   :  { %1056 = vmatprep.subr.mxu0 %v1020_v1  ;;  %1127 = vmatprep.subr.mxu1 %v1022_v2  ;;  %v1688_v1 = vld [vmem:[%s5152_s3 + $0x3e8] sm:$0xff]  ;;  %v1690_v2 = vld [vmem:[%s5152_s3 + $0x3f8] sm:$0xff] }
 0x141   :  { %1057 = vmatpush1.msra.mxu0 %v1019_v18  ;;  %1128 = vmatpush1.msra.mxu1 %v1021_v4  ;;  %v1508_v18 = vld [vmem:[#allocation2 + $0xc] sm:$0x3]  ;;  %v1687_v4 = vld [vmem:[%s5152_s3 + $0x3e0] sm:$0xff] }
 0x142   :  { %1058 = vmatprep.subr.mxu0 %v1016_v5  ;;  %1129 = vmatprep.subr.mxu1 %v1018_v6  ;;  %v1689_v5 = vld [vmem:[%s5152_s3 + $0x3f0] sm:$0xff]  ;;  %v1684_v6 = vld [vmem:[%s5152_s3 + $0x3c8] sm:$0xff] }
 0x143   :  { %1059 = vmatpush1.msra.mxu0 %v1015_v54  ;;  %1130 = vmatpush1.msra.mxu1 %v1017_v7  ;;  %v1686_v54 = vld [vmem:[%s5152_s3 + $0x3d8] sm:$0xff]  ;;  %v1683_v7 = vld [vmem:[%s5152_s3 + $0x3c0] sm:$0xff] }
 0x144   :  { %1060 = vmatprep.subr.mxu0 %v1012_v8  ;;  %1131 = vmatprep.subr.mxu1 %v1014_v9  ;;  %v1685_v8 = vld [vmem:[%s5152_s3 + $0x3d0] sm:$0xff]  ;;  %v1680_v9 = vld [vmem:[%s5152_s3 + $0x3a8] sm:$0xff] }
 0x145   :  { %1061 = vmatpush1.msra.mxu0 %v1011_v11  ;;  %1094 = vmatprep.mubr.f32.mxu0 %v3649_v3  ;;  %v1682_v11 = vld [vmem:[%s5152_s3 + $0x3b8] sm:$0xff] }
 0x146   :  { %1132 = vmatpush1.msra.mxu1 %v1013_v12  ;;  %1165 = vmatprep.mubr.f32.mxu1 %v3649_v3  ;;  %v1679_v12 = vld [vmem:[%s5152_s3 + $0x3a0] sm:$0xff] }
 0x147   :  { %3448 = vmatmul.mubr.msk.f32.vlgmr.msra.gmra.mxu0 %vm515_vm1, %v1010_v21  ;;  %3449 = vmatmul.mubr.msk.f32.vlgmr.msra.gmra.mxu1 %vm515_vm1, %v1010_v21  ;;  %v1678_v21 = vld [vmem:[%s5152_s3 + $0x398] sm:$0xff] }
 0x148   :  { %1220 = vmatprep.subr.mxu0 %v1190_v16  ;;  %1291 = vmatprep.subr.mxu1 %v1192_v20  ;;  %v1681_v16 = vld [vmem:[%s5152_s3 + $0x3b0] sm:$0xff]  ;;  %v1676_v20 = vld [vmem:[%s5152_s3 + $0x388] sm:$0xff] }
 0x149   :  { %1221 = vmatpush1.msra.mxu0 %v1189_v23  ;;  %1292 = vmatpush1.msra.mxu1 %v1191_v38  ;;  %v1675_v23 = vld [vmem:[%s5152_s3 + $0x380] sm:$0xff]  ;;  %v1677_v38 = vld [vmem:[%s5152_s3 + $0x390] sm:$0xff] }
 0x14a   :  { %1222 = vmatprep.subr.mxu0 %v1186_v24  ;;  %1293 = vmatprep.subr.mxu1 %v1188_v25  ;;  %v1854_v24 = vld [vmem:[%s5152_s3 + $0x468] sm:$0xff]  ;;  %v1856_v25 = vld [vmem:[%s5152_s3 + $0x478] sm:$0xff] }
 0x14b   :  { %1223 = vmatpush1.msra.mxu0 %v1185_v26  ;;  %1294 = vmatpush1.msra.mxu1 %v1187_v27  ;;  %v1674_v26 = vld [vmem:[#allocation2 + $0xe] sm:$0x3]  ;;  %v1853_v27 = vld [vmem:[%s5152_s3 + $0x460] sm:$0xff] }
 0x14c   :  { %1224 = vmatprep.subr.mxu0 %v1182_v28  ;;  %1295 = vmatprep.subr.mxu1 %v1184_v29  ;;  %v1855_v28 = vld [vmem:[%s5152_s3 + $0x470] sm:$0xff]  ;;  %v1850_v29 = vld [vmem:[%s5152_s3 + $0x448] sm:$0xff] }
 0x14d   :  { %1225 = vmatpush1.msra.mxu0 %v1181_v22  ;;  %1296 = vmatpush1.msra.mxu1 %v1183_v51  ;;  %v1852_v22 = vld [vmem:[%s5152_s3 + $0x458] sm:$0xff]  ;;  %v1849_v51 = vld [vmem:[%s5152_s3 + $0x440] sm:$0xff] }
 0x14e   :  { %1226 = vmatprep.subr.mxu0 %v1178_v0  ;;  %1297 = vmatprep.subr.mxu1 %v1180_v10  ;;  %v1851_v0 = vld [vmem:[%s5152_s3 + $0x450] sm:$0xff]  ;;  %v1846_v10 = vld [vmem:[%s5152_s3 + $0x428] sm:$0xff] }
 0x14f   :  { %1227 = vmatpush1.msra.mxu0 %v1177_v31  ;;  %1260 = vmatprep.mubr.f32.mxu0 %v3649_v3  ;;  %v1848_v31 = vld [vmem:[%s5152_s3 + $0x438] sm:$0xff] }
 0x150   :  { %1298 = vmatpush1.msra.mxu1 %v1179_v32  ;;  %1331 = vmatprep.mubr.f32.mxu1 %v3649_v3  ;;  %v1845_v32 = vld [vmem:[%s5152_s3 + $0x420] sm:$0xff] }
 0x151   :  { %3450 = vmatmul.mubr.msk.f32.vlgmr.msra.gmra.mxu0 %vm515_vm1, %v1176_v36  ;;  %3451 = vmatmul.mubr.msk.f32.vlgmr.msra.gmra.mxu1 %vm515_vm1, %v1176_v36  ;;  %v1844_v36 = vld [vmem:[%s5152_s3 + $0x418] sm:$0xff] }
 0x152   :  { %1386 = vmatprep.subr.mxu0 %v1356_v13  ;;  %1457 = vmatprep.subr.mxu1 %v1358_v15  ;;  %v1847_v13 = vld [vmem:[%s5152_s3 + $0x430] sm:$0xff]  ;;  %v1842_v15 = vld [vmem:[%s5152_s3 + $0x408] sm:$0xff] }
 0x153   :  { %1387 = vmatpush1.msra.mxu0 %v1355_v37  ;;  %1458 = vmatpush1.msra.mxu1 %v1357_v39  ;;  %v1841_v37 = vld [vmem:[%s5152_s3 + $0x400] sm:$0xff]  ;;  %v1843_v39 = vld [vmem:[%s5152_s3 + $0x410] sm:$0xff] }
 0x154   :  { %1388 = vmatprep.subr.mxu0 %v1352_v40  ;;  %1459 = vmatprep.subr.mxu1 %v1354_v41  ;;  %v2020_v40 = vld [vmem:[%s5152_s3 + $0x4e8] sm:$0xff]  ;;  %v2022_v41 = vld [vmem:[%s5152_s3 + $0x4f8] sm:$0xff] }
 0x155   :  { %1389 = vmatpush1.msra.mxu0 %v1351_v14  ;;  %1460 = vmatpush1.msra.mxu1 %v1353_v42  ;;  %v1840_v14 = vld [vmem:[#allocation2 + $0x10] sm:$0x3]  ;;  %v2019_v42 = vld [vmem:[%s5152_s3 + $0x4e0] sm:$0xff] }
 0x156   :  { %1390 = vmatprep.subr.mxu0 %v1348_v30  ;;  %1461 = vmatprep.subr.mxu1 %v1350_v43  ;;  %v2021_v30 = vld [vmem:[%s5152_s3 + $0x4f0] sm:$0xff]  ;;  %v2016_v43 = vld [vmem:[%s5152_s3 + $0x4c8] sm:$0xff] }
 0x157   :  { %1391 = vmatpush1.msra.mxu0 %v1347_v44  ;;  %1462 = vmatpush1.msra.mxu1 %v1349_v45  ;;  %v2018_v44 = vld [vmem:[%s5152_s3 + $0x4d8] sm:$0xff]  ;;  %v2015_v45 = vld [vmem:[%s5152_s3 + $0x4c0] sm:$0xff] }
 0x158   :  { %1392 = vmatprep.subr.mxu0 %v1344_v33  ;;  %1463 = vmatprep.subr.mxu1 %v1346_v35  ;;  %v2017_v33 = vld [vmem:[%s5152_s3 + $0x4d0] sm:$0xff]  ;;  %v2012_v35 = vld [vmem:[%s5152_s3 + $0x4a8] sm:$0xff] }
 0x159   :  { %1393 = vmatpush1.msra.mxu0 %v1343_v47  ;;  %1426 = vmatprep.mubr.f32.mxu0 %v3649_v3  ;;  %v2014_v47 = vld [vmem:[%s5152_s3 + $0x4b8] sm:$0xff] }
 0x15a   :  { %1464 = vmatpush1.msra.mxu1 %v1345_v48  ;;  %1497 = vmatprep.mubr.f32.mxu1 %v3649_v3  ;;  %v2011_v48 = vld [vmem:[%s5152_s3 + $0x4a0] sm:$0xff] }
 0x15b   :  { %3452 = vmatmul.mubr.msk.f32.vlgmr.msra.gmra.mxu0 %vm515_vm1, %v1342_v17  ;;  %3453 = vmatmul.mubr.msk.f32.vlgmr.msra.gmra.mxu1 %vm515_vm1, %v1342_v17  ;;  %v2010_v17 = vld [vmem:[%s5152_s3 + $0x498] sm:$0xff] }
 0x15c   :  { %1552 = vmatprep.subr.mxu0 %v1522_v49  ;;  %1623 = vmatprep.subr.mxu1 %v1524_v50  ;;  %v2013_v49 = vld [vmem:[%s5152_s3 + $0x4b0] sm:$0xff]  ;;  %v2008_v50 = vld [vmem:[%s5152_s3 + $0x488] sm:$0xff] }
 0x15d   :  { %1553 = vmatpush1.msra.mxu0 %v1521_v19  ;;  %1624 = vmatpush1.msra.mxu1 %v1523_v46  ;;  %v2007_v19 = vld [vmem:[%s5152_s3 + $0x480] sm:$0xff]  ;;  %v2009_v46 = vld [vmem:[%s5152_s3 + $0x490] sm:$0xff] }
 0x15e   :  { %1554 = vmatprep.subr.mxu0 %v1518_v53  ;;  %1625 = vmatprep.subr.mxu1 %v1520_v52  ;;  %v2186_v53 = vld [vmem:[%s5152_s3 + $0x568] sm:$0xff]  ;;  %v2188_v52 = vld [vmem:[%s5152_s3 + $0x578] sm:$0xff] }
 0x15f   :  { %1555 = vmatpush1.msra.mxu0 %v1517_v55  ;;  %1626 = vmatpush1.msra.mxu1 %v1519_v56  ;;  %v2006_v55 = vld [vmem:[#allocation2 + $0x12] sm:$0x3]  ;;  %v2185_v56 = vld [vmem:[%s5152_s3 + $0x560] sm:$0xff] }
 0x160   :  { %1556 = vmatprep.subr.mxu0 %v1514_v57  ;;  %1627 = vmatprep.subr.mxu1 %v1516_v58  ;;  %v2187_v57 = vld [vmem:[%s5152_s3 + $0x570] sm:$0xff]  ;;  %v2182_v58 = vld [vmem:[%s5152_s3 + $0x548] sm:$0xff] }
 0x161   :  { %1557 = vmatpush1.msra.mxu0 %v1513_v59  ;;  %1628 = vmatpush1.msra.mxu1 %v1515_v60  ;;  %v2184_v59 = vld [vmem:[%s5152_s3 + $0x558] sm:$0xff]  ;;  %v2181_v60 = vld [vmem:[%s5152_s3 + $0x540] sm:$0xff] }
 0x162   :  { %1558 = vmatprep.subr.mxu0 %v1510_v34  ;;  %1629 = vmatprep.subr.mxu1 %v1512_v61  ;;  %v2183_v34 = vld [vmem:[%s5152_s3 + $0x550] sm:$0xff]  ;;  %v2178_v61 = vld [vmem:[%s5152_s3 + $0x528] sm:$0xff] }
 0x163   :  { %1559 = vmatpush1.msra.mxu0 %v1509_v62  ;;  %1592 = vmatprep.mubr.f32.mxu0 %v3649_v3  ;;  %v2180_v62 = vld [vmem:[%s5152_s3 + $0x538] sm:$0xff] }
 0x164   :  { %1630 = vmatpush1.msra.mxu1 %v1511_v63  ;;  %1663 = vmatprep.mubr.f32.mxu1 %v3649_v3  ;;  %v2177_v63 = vld [vmem:[%s5152_s3 + $0x520] sm:$0xff] }
 0x165   :  { %3454 = vmatmul.mubr.msk.f32.vlgmr.msra.gmra.mxu0 %vm515_vm1, %v1508_v18  ;;  %3455 = vmatmul.mubr.msk.f32.vlgmr.msra.gmra.mxu1 %vm515_vm1, %v1508_v18  ;;  %v2176_v18 = vld [vmem:[%s5152_s3 + $0x518] sm:$0xff] }
 0x166   :  { %1718 = vmatprep.subr.mxu0 %v1688_v1  ;;  %1789 = vmatprep.subr.mxu1 %v1690_v2  ;;  %v2179_v1 = vld [vmem:[%s5152_s3 + $0x530] sm:$0xff]  ;;  %v2174_v2 = vld [vmem:[%s5152_s3 + $0x508] sm:$0xff] }
 0x167   :  { %1719 = vmatpush1.msra.mxu0 %v1687_v4  ;;  %1790 = vmatpush1.msra.mxu1 %v1689_v5  ;;  %v2173_v4 = vld [vmem:[%s5152_s3 + $0x500] sm:$0xff]  ;;  %v2175_v5 = vld [vmem:[%s5152_s3 + $0x510] sm:$0xff] }
 0x168   :  { %1720 = vmatprep.subr.mxu0 %v1684_v6  ;;  %1791 = vmatprep.subr.mxu1 %v1686_v54  ;;  %v2352_v6 = vld [vmem:[%s5152_s3 + $0x5e8] sm:$0xff]  ;;  %v2354_v54 = vld [vmem:[%s5152_s3 + $0x5f8] sm:$0xff] }
 0x169   :  { %1721 = vmatpush1.msra.mxu0 %v1683_v7  ;;  %1792 = vmatpush1.msra.mxu1 %v1685_v8  ;;  %v2172_v7 = vld [vmem:[#allocation2 + $0x14] sm:$0x3]  ;;  %v2351_v8 = vld [vmem:[%s5152_s3 + $0x5e0] sm:$0xff] }
 0x16a   :  { %1722 = vmatprep.subr.mxu0 %v1680_v9  ;;  %1793 = vmatprep.subr.mxu1 %v1682_v11  ;;  %v2353_v9 = vld [vmem:[%s5152_s3 + $0x5f0] sm:$0xff]  ;;  %v2348_v11 = vld [vmem:[%s5152_s3 + $0x5c8] sm:$0xff] }
 0x16b   :  { %1723 = vmatpush1.msra.mxu0 %v1679_v12  ;;  %1794 = vmatpush1.msra.mxu1 %v1681_v16  ;;  %v2350_v12 = vld [vmem:[%s5152_s3 + $0x5d8] sm:$0xff]  ;;  %v2347_v16 = vld [vmem:[%s5152_s3 + $0x5c0] sm:$0xff] }
 0x16c   :  { %1724 = vmatprep.subr.mxu0 %v1676_v20  ;;  %1795 = vmatprep.subr.mxu1 %v1678_v21  ;;  %v2349_v20 = vld [vmem:[%s5152_s3 + $0x5d0] sm:$0xff]  ;;  %v2344_v21 = vld [vmem:[%s5152_s3 + $0x5a8] sm:$0xff] }
 0x16d   :  { %1725 = vmatpush1.msra.mxu0 %v1675_v23  ;;  %1758 = vmatprep.mubr.f32.mxu0 %v3649_v3  ;;  %v2346_v23 = vld [vmem:[%s5152_s3 + $0x5b8] sm:$0xff] }
 0x16e   :  { %1796 = vmatpush1.msra.mxu1 %v1677_v38  ;;  %1829 = vmatprep.mubr.f32.mxu1 %v3649_v3  ;;  %v2343_v38 = vld [vmem:[%s5152_s3 + $0x5a0] sm:$0xff] }
 0x16f   :  { %3456 = vmatmul.mubr.msk.f32.vlgmr.msra.gmra.mxu0 %vm515_vm1, %v1674_v26  ;;  %3457 = vmatmul.mubr.msk.f32.vlgmr.msra.gmra.mxu1 %vm515_vm1, %v1674_v26  ;;  %v2342_v26 = vld [vmem:[%s5152_s3 + $0x598] sm:$0xff] }
 0x170   :  { %1884 = vmatprep.subr.mxu0 %v1854_v24  ;;  %1955 = vmatprep.subr.mxu1 %v1856_v25  ;;  %v2345_v24 = vld [vmem:[%s5152_s3 + $0x5b0] sm:$0xff]  ;;  %v2340_v25 = vld [vmem:[%s5152_s3 + $0x588] sm:$0xff] }
 0x171   :  { %1885 = vmatpush1.msra.mxu0 %v1853_v27  ;;  %1956 = vmatpush1.msra.mxu1 %v1855_v28  ;;  %v2339_v27 = vld [vmem:[%s5152_s3 + $0x580] sm:$0xff]  ;;  %v2341_v28 = vld [vmem:[%s5152_s3 + $0x590] sm:$0xff] }
 0x172   :  { %1886 = vmatprep.subr.mxu0 %v1850_v29  ;;  %1957 = vmatprep.subr.mxu1 %v1852_v22  ;;  %v2518_v29 = vld [vmem:[%s5152_s3 + $0x668] sm:$0xff]  ;;  %v2520_v22 = vld [vmem:[%s5152_s3 + $0x678] sm:$0xff] }
 0x173   :  { %1887 = vmatpush1.msra.mxu0 %v1849_v51  ;;  %1958 = vmatpush1.msra.mxu1 %v1851_v0  ;;  %v2338_v51 = vld [vmem:[#allocation2 + $0x16] sm:$0x3]  ;;  %v2517_v0 = vld [vmem:[%s5152_s3 + $0x660] sm:$0xff] }
 0x174   :  { %1888 = vmatprep.subr.mxu0 %v1846_v10  ;;  %1959 = vmatprep.subr.mxu1 %v1848_v31  ;;  %v2519_v10 = vld [vmem:[%s5152_s3 + $0x670] sm:$0xff]  ;;  %v2514_v31 = vld [vmem:[%s5152_s3 + $0x648] sm:$0xff] }
 0x175   :  { %1889 = vmatpush1.msra.mxu0 %v1845_v32  ;;  %1960 = vmatpush1.msra.mxu1 %v1847_v13  ;;  %v2516_v32 = vld [vmem:[%s5152_s3 + $0x658] sm:$0xff]  ;;  %v2513_v13 = vld [vmem:[%s5152_s3 + $0x640] sm:$0xff] }
 0x176   :  { %1890 = vmatprep.subr.mxu0 %v1842_v15  ;;  %1961 = vmatprep.subr.mxu1 %v1844_v36  ;;  %v2515_v15 = vld [vmem:[%s5152_s3 + $0x650] sm:$0xff]  ;;  %v2510_v36 = vld [vmem:[%s5152_s3 + $0x628] sm:$0xff] }
 0x177   :  { %1891 = vmatpush1.msra.mxu0 %v1841_v37  ;;  %1924 = vmatprep.mubr.f32.mxu0 %v3649_v3  ;;  %v2512_v37 = vld [vmem:[%s5152_s3 + $0x638] sm:$0xff] }
 0x178   :  { %1962 = vmatpush1.msra.mxu1 %v1843_v39  ;;  %1995 = vmatprep.mubr.f32.mxu1 %v3649_v3  ;;  %v2509_v39 = vld [vmem:[%s5152_s3 + $0x620] sm:$0xff] }
 0x179   :  { %3458 = vmatmul.mubr.msk.f32.vlgmr.msra.gmra.mxu0 %vm515_vm1, %v1840_v14  ;;  %3459 = vmatmul.mubr.msk.f32.vlgmr.msra.gmra.mxu1 %vm515_vm1, %v1840_v14  ;;  %v2508_v14 = vld [vmem:[%s5152_s3 + $0x618] sm:$0xff] }
 0x17a   :  { %2050 = vmatprep.subr.mxu0 %v2020_v40  ;;  %2121 = vmatprep.subr.mxu1 %v2022_v41  ;;  %v2511_v40 = vld [vmem:[%s5152_s3 + $0x630] sm:$0xff]  ;;  %v2506_v41 = vld [vmem:[%s5152_s3 + $0x608] sm:$0xff] }
 0x17b   :  { %2051 = vmatpush1.msra.mxu0 %v2019_v42  ;;  %2122 = vmatpush1.msra.mxu1 %v2021_v30  ;;  %v2505_v42 = vld [vmem:[%s5152_s3 + $0x600] sm:$0xff]  ;;  %v2507_v30 = vld [vmem:[%s5152_s3 + $0x610] sm:$0xff] }
 0x17c   :  { %2052 = vmatprep.subr.mxu0 %v2016_v43  ;;  %2123 = vmatprep.subr.mxu1 %v2018_v44  ;;  %v2684_v43 = vld [vmem:[%s5152_s3 + $0x6e8] sm:$0xff]  ;;  %v2686_v44 = vld [vmem:[%s5152_s3 + $0x6f8] sm:$0xff] }
 0x17d   :  { %2053 = vmatpush1.msra.mxu0 %v2015_v45  ;;  %2124 = vmatpush1.msra.mxu1 %v2017_v33  ;;  %v2504_v45 = vld [vmem:[#allocation2 + $0x18] sm:$0x3]  ;;  %v2683_v33 = vld [vmem:[%s5152_s3 + $0x6e0] sm:$0xff] }
 0x17e   :  { %2054 = vmatprep.subr.mxu0 %v2012_v35  ;;  %2125 = vmatprep.subr.mxu1 %v2014_v47  ;;  %v2685_v35 = vld [vmem:[%s5152_s3 + $0x6f0] sm:$0xff]  ;;  %v2680_v47 = vld [vmem:[%s5152_s3 + $0x6c8] sm:$0xff] }
 0x17f   :  { %2055 = vmatpush1.msra.mxu0 %v2011_v48  ;;  %2126 = vmatpush1.msra.mxu1 %v2013_v49  ;;  %v2682_v48 = vld [vmem:[%s5152_s3 + $0x6d8] sm:$0xff]  ;;  %v2679_v49 = vld [vmem:[%s5152_s3 + $0x6c0] sm:$0xff] }
 0x180   :  { %2056 = vmatprep.subr.mxu0 %v2008_v50  ;;  %2127 = vmatprep.subr.mxu1 %v2010_v17  ;;  %v2681_v50 = vld [vmem:[%s5152_s3 + $0x6d0] sm:$0xff]  ;;  %v2676_v17 = vld [vmem:[%s5152_s3 + $0x6a8] sm:$0xff] }
 0x181   :  { %2057 = vmatpush1.msra.mxu0 %v2007_v19  ;;  %2090 = vmatprep.mubr.f32.mxu0 %v3649_v3  ;;  %v2678_v19 = vld [vmem:[%s5152_s3 + $0x6b8] sm:$0xff] }
 0x182   :  { %2128 = vmatpush1.msra.mxu1 %v2009_v46  ;;  %2161 = vmatprep.mubr.f32.mxu1 %v3649_v3  ;;  %v2675_v46 = vld [vmem:[%s5152_s3 + $0x6a0] sm:$0xff] }
 0x183   :  { %3460 = vmatmul.mubr.msk.f32.vlgmr.msra.gmra.mxu0 %vm515_vm1, %v2006_v55  ;;  %3461 = vmatmul.mubr.msk.f32.vlgmr.msra.gmra.mxu1 %vm515_vm1, %v2006_v55  ;;  %v2674_v55 = vld [vmem:[%s5152_s3 + $0x698] sm:$0xff] }
 0x184   :  { %2216 = vmatprep.subr.mxu0 %v2186_v53  ;;  %2287 = vmatprep.subr.mxu1 %v2188_v52  ;;  %v2677_v53 = vld [vmem:[%s5152_s3 + $0x6b0] sm:$0xff]  ;;  %v2672_v52 = vld [vmem:[%s5152_s3 + $0x688] sm:$0xff] }
 0x185   :  { %2217 = vmatpush1.msra.mxu0 %v2185_v56  ;;  %2288 = vmatpush1.msra.mxu1 %v2187_v57  ;;  %v2671_v56 = vld [vmem:[%s5152_s3 + $0x680] sm:$0xff]  ;;  %v2673_v57 = vld [vmem:[%s5152_s3 + $0x690] sm:$0xff] }
 0x186   :  { %2218 = vmatprep.subr.mxu0 %v2182_v58  ;;  %2289 = vmatprep.subr.mxu1 %v2184_v59  ;;  %v2850_v58 = vld [vmem:[%s5152_s3 + $0x768] sm:$0xff]  ;;  %v2852_v59 = vld [vmem:[%s5152_s3 + $0x778] sm:$0xff] }
 0x187   :  { %2219 = vmatpush1.msra.mxu0 %v2181_v60  ;;  %2290 = vmatpush1.msra.mxu1 %v2183_v34  ;;  %v2670_v60 = vld [vmem:[#allocation2 + $0x1a] sm:$0x3]  ;;  %v2849_v34 = vld [vmem:[%s5152_s3 + $0x760] sm:$0xff] }
 0x188   :  { %2220 = vmatprep.subr.mxu0 %v2178_v61  ;;  %2291 = vmatprep.subr.mxu1 %v2180_v62  ;;  %v2851_v61 = vld [vmem:[%s5152_s3 + $0x770] sm:$0xff]  ;;  %v2846_v62 = vld [vmem:[%s5152_s3 + $0x748] sm:$0xff] }
 0x189   :  { %2221 = vmatpush1.msra.mxu0 %v2177_v63  ;;  %2292 = vmatpush1.msra.mxu1 %v2179_v1  ;;  %v2848_v63 = vld [vmem:[%s5152_s3 + $0x758] sm:$0xff]  ;;  %v2845_v1 = vld [vmem:[%s5152_s3 + $0x740] sm:$0xff] }
 0x18a   :  { %2222 = vmatprep.subr.mxu0 %v2174_v2  ;;  %2293 = vmatprep.subr.mxu1 %v2176_v18  ;;  %v2847_v2 = vld [vmem:[%s5152_s3 + $0x750] sm:$0xff]  ;;  %v2842_v18 = vld [vmem:[%s5152_s3 + $0x728] sm:$0xff] }
 0x18b   :  { %2223 = vmatpush1.msra.mxu0 %v2173_v4  ;;  %2256 = vmatprep.mubr.f32.mxu0 %v3649_v3  ;;  %v2844_v4 = vld [vmem:[%s5152_s3 + $0x738] sm:$0xff] }
 0x18c   :  { %2294 = vmatpush1.msra.mxu1 %v2175_v5  ;;  %2327 = vmatprep.mubr.f32.mxu1 %v3649_v3  ;;  %v2841_v5 = vld [vmem:[%s5152_s3 + $0x720] sm:$0xff] }
 0x18d   :  { %3462 = vmatmul.mubr.msk.f32.vlgmr.msra.gmra.mxu0 %vm515_vm1, %v2172_v7  ;;  %3463 = vmatmul.mubr.msk.f32.vlgmr.msra.gmra.mxu1 %vm515_vm1, %v2172_v7  ;;  %v2840_v7 = vld [vmem:[%s5152_s3 + $0x718] sm:$0xff] }
 0x18e   :  { %2382 = vmatprep.subr.mxu0 %v2352_v6  ;;  %2453 = vmatprep.subr.mxu1 %v2354_v54  ;;  %v2843_v6 = vld [vmem:[%s5152_s3 + $0x730] sm:$0xff]  ;;  %v2838_v54 = vld [vmem:[%s5152_s3 + $0x708] sm:$0xff] }
 0x18f   :  { %2383 = vmatpush1.msra.mxu0 %v2351_v8  ;;  %2454 = vmatpush1.msra.mxu1 %v2353_v9  ;;  %v2837_v8 = vld [vmem:[%s5152_s3 + $0x700] sm:$0xff]  ;;  %v2839_v9 = vld [vmem:[%s5152_s3 + $0x710] sm:$0xff] }
 0x190   :  { %2384 = vmatprep.subr.mxu0 %v2348_v11  ;;  %2455 = vmatprep.subr.mxu1 %v2350_v12  ;;  %v3016_v11 = vld [vmem:[%s5152_s3 + $0x7e8] sm:$0xff]  ;;  %v3018_v12 = vld [vmem:[%s5152_s3 + $0x7f8] sm:$0xff] }
 0x191   :  { %2385 = vmatpush1.msra.mxu0 %v2347_v16  ;;  %2456 = vmatpush1.msra.mxu1 %v2349_v20  ;;  %v2836_v16 = vld [vmem:[#allocation2 + $0x1c] sm:$0x3]  ;;  %v3015_v20 = vld [vmem:[%s5152_s3 + $0x7e0] sm:$0xff] }
 0x192   :  { %2386 = vmatprep.subr.mxu0 %v2344_v21  ;;  %2457 = vmatprep.subr.mxu1 %v2346_v23  ;;  %v3017_v21 = vld [vmem:[%s5152_s3 + $0x7f0] sm:$0xff]  ;;  %v3012_v23 = vld [vmem:[%s5152_s3 + $0x7c8] sm:$0xff] }
 0x193   :  { %2387 = vmatpush1.msra.mxu0 %v2343_v38  ;;  %2458 = vmatpush1.msra.mxu1 %v2345_v24  ;;  %v3014_v38 = vld [vmem:[%s5152_s3 + $0x7d8] sm:$0xff]  ;;  %v3011_v24 = vld [vmem:[%s5152_s3 + $0x7c0] sm:$0xff] }
 0x194   :  { %2388 = vmatprep.subr.mxu0 %v2340_v25  ;;  %2459 = vmatprep.subr.mxu1 %v2342_v26  ;;  %v3013_v25 = vld [vmem:[%s5152_s3 + $0x7d0] sm:$0xff]  ;;  %v3008_v26 = vld [vmem:[%s5152_s3 + $0x7a8] sm:$0xff] }
 0x195   :  { %2389 = vmatpush1.msra.mxu0 %v2339_v27  ;;  %2422 = vmatprep.mubr.f32.mxu0 %v3649_v3  ;;  %v3010_v27 = vld [vmem:[%s5152_s3 + $0x7b8] sm:$0xff] }
 0x196   :  { %2460 = vmatpush1.msra.mxu1 %v2341_v28  ;;  %2493 = vmatprep.mubr.f32.mxu1 %v3649_v3  ;;  %v3007_v28 = vld [vmem:[%s5152_s3 + $0x7a0] sm:$0xff] }
 0x197   :  { %3464 = vmatmul.mubr.msk.f32.vlgmr.msra.gmra.mxu0 %vm515_vm1, %v2338_v51  ;;  %3465 = vmatmul.mubr.msk.f32.vlgmr.msra.gmra.mxu1 %vm515_vm1, %v2338_v51  ;;  %v3006_v51 = vld [vmem:[%s5152_s3 + $0x798] sm:$0xff] }
 0x198   :  { %2548 = vmatprep.subr.mxu0 %v2518_v29  ;;  %2619 = vmatprep.subr.mxu1 %v2520_v22  ;;  %v3009_v29 = vld [vmem:[%s5152_s3 + $0x7b0] sm:$0xff]  ;;  %v3004_v22 = vld [vmem:[%s5152_s3 + $0x788] sm:$0xff] }
 0x199   :  { %2549 = vmatpush1.msra.mxu0 %v2517_v0  ;;  %2620 = vmatpush1.msra.mxu1 %v2519_v10  ;;  %v3003_v0 = vld [vmem:[%s5152_s3 + $0x780] sm:$0xff]  ;;  %v3005_v10 = vld [vmem:[%s5152_s3 + $0x790] sm:$0xff] }
 0x19a   :  { %2550 = vmatprep.subr.mxu0 %v2514_v31  ;;  %2621 = vmatprep.subr.mxu1 %v2516_v32  ;;  %v3002_v31 = vld [vmem:[#allocation2 + $0x1e] sm:$0x3] }
 0x19b   :  { %2551 = vmatpush1.msra.mxu0 %v2513_v13  ;;  %2622 = vmatpush1.msra.mxu1 %v2515_v15  ;;  %v3229_v32 = vld [vmem:[%s5154_s5 + $0xf8] sm:$0xff] }
 0x19c   :  { %2552 = vmatprep.subr.mxu0 %v2510_v36  ;;  %2623 = vmatprep.subr.mxu1 %v2512_v37  ;;  %v3261_v13 = vld [vmem:[%s5154_s5 + $0x1f8] sm:$0xff]  ;;  %v3228_v36 = vld [vmem:[%s5154_s5 + $0xf0] sm:$0xff] }
 0x19d   :  { %2553 = vmatpush1.msra.mxu0 %v2509_v39  ;;  %2624 = vmatpush1.msra.mxu1 %v2511_v40  ;;  %v3213_v15 = vld [vmem:[%s5154_s5 + $0x78] sm:$0xff]  ;;  %v3260_v37 = vld [vmem:[%s5154_s5 + $0x1f0] sm:$0xff] }
 0x19e   :  { %2554 = vmatprep.subr.mxu0 %v2506_v41  ;;  %2625 = vmatprep.subr.mxu1 %v2508_v14  ;;  %v3212_v39 = vld [vmem:[%s5154_s5 + $0x70] sm:$0xff]  ;;  %v3227_v41 = vld [vmem:[%s5154_s5 + $0xe8] sm:$0xff] }
 0x19f   :  { %2555 = vmatpush1.msra.mxu0 %v2505_v42  ;;  %2588 = vmatprep.mubr.f32.mxu0 %v3649_v3  ;;  %v3244_v40 = vld [vmem:[%s5154_s5 + $0x170] sm:$0xff]  ;;  %v3259_v14 = vld [vmem:[%s5154_s5 + $0x1e8] sm:$0xff] }
 0x1a0   :  { %2626 = vmatpush1.msra.mxu1 %v2507_v30  ;;  %2659 = vmatprep.mubr.f32.mxu1 %v3649_v3  ;;  %v3211_v42 = vld [vmem:[%s5154_s5 + $0x68] sm:$0xff] }
 0x1a1   :  { %3466 = vmatmul.mubr.msk.f32.vlgmr.msra.gmra.mxu0 %vm515_vm1, %v2504_v45  ;;  %3467 = vmatmul.mubr.msk.f32.vlgmr.msra.gmra.mxu1 %vm515_vm1, %v2504_v45  ;;  %v3243_v30 = vld [vmem:[%s5154_s5 + $0x168] sm:$0xff]  ;;  %v3210_v45 = vld [vmem:[%s5154_s5 + $0x60] sm:$0xff] }
 0x1a2   :  { %2714 = vmatprep.subr.mxu0 %v2684_v43  ;;  %2785 = vmatprep.subr.mxu1 %v2686_v44  ;;  %v3226_v43 = vld [vmem:[%s5154_s5 + $0xe0] sm:$0xff] }
 0x1a3   :  { %2715 = vmatpush1.msra.mxu0 %v2683_v33  ;;  %2786 = vmatpush1.msra.mxu1 %v2685_v35  ;;  %v3258_v44 = vld [vmem:[%s5154_s5 + $0x1e0] sm:$0xff]  ;;  %v3225_v35 = vld [vmem:[%s5154_s5 + $0xd8] sm:$0xff] }
 0x1a4   :  { %2716 = vmatprep.subr.mxu0 %v2680_v47  ;;  %2787 = vmatprep.subr.mxu1 %v2682_v48  ;;  %v3242_v33 = vld [vmem:[%s5154_s5 + $0x160] sm:$0xff]  ;;  %v3257_v47 = vld [vmem:[%s5154_s5 + $0x1d8] sm:$0xff] }
 0x1a5   :  { %2717 = vmatpush1.msra.mxu0 %v2679_v49  ;;  %2788 = vmatpush1.msra.mxu1 %v2681_v50  ;;  %v3209_v48 = vld [vmem:[%s5154_s5 + $0x58] sm:$0xff]  ;;  %v3224_v50 = vld [vmem:[%s5154_s5 + $0xd0] sm:$0xff] }
 0x1a6   :  { %2718 = vmatprep.subr.mxu0 %v2676_v17  ;;  %2789 = vmatprep.subr.mxu1 %v2678_v19  ;;  %v3241_v49 = vld [vmem:[%s5154_s5 + $0x158] sm:$0xff]  ;;  %v3256_v17 = vld [vmem:[%s5154_s5 + $0x1d0] sm:$0xff] }
 0x1a7   :  { %2719 = vmatpush1.msra.mxu0 %v2675_v46  ;;  %2790 = vmatpush1.msra.mxu1 %v2677_v53  ;;  %v3208_v19 = vld [vmem:[%s5154_s5 + $0x50] sm:$0xff]  ;;  %v3223_v53 = vld [vmem:[%s5154_s5 + $0xc8] sm:$0xff] }
 0x1a8   :  { %2720 = vmatprep.subr.mxu0 %v2672_v52  ;;  %2791 = vmatprep.subr.mxu1 %v2674_v55  ;;  %v3240_v46 = vld [vmem:[%s5154_s5 + $0x150] sm:$0xff]  ;;  %v3255_v52 = vld [vmem:[%s5154_s5 + $0x1c8] sm:$0xff] }
 0x1a9   :  { %2721 = vmatpush1.msra.mxu0 %v2671_v56  ;;  %2754 = vmatprep.mubr.f32.mxu0 %v3649_v3  ;;  %v3207_v55 = vld [vmem:[%s5154_s5 + $0x48] sm:$0xff] }
 0x1aa   :  { %2792 = vmatpush1.msra.mxu1 %v2673_v57  ;;  %2825 = vmatprep.mubr.f32.mxu1 %v3649_v3  ;;  %v3239_v56 = vld [vmem:[%s5154_s5 + $0x148] sm:$0xff]  ;;  %v3222_v57 = vld [vmem:[%s5154_s5 + $0xc0] sm:$0xff] }
 0x1ab   :  { %3468 = vmatmul.mubr.msk.f32.vlgmr.msra.gmra.mxu0 %vm515_vm1, %v2670_v60  ;;  %3469 = vmatmul.mubr.msk.f32.vlgmr.msra.gmra.mxu1 %vm515_vm1, %v2670_v60  ;;  %v3238_v60 = vld [vmem:[%s5154_s5 + $0x140] sm:$0xff] }
 0x1ac   :  { %2880 = vmatprep.subr.mxu0 %v2850_v58  ;;  %2951 = vmatprep.subr.mxu1 %v2852_v59  ;;  %v3254_v58 = vld [vmem:[%s5154_s5 + $0x1c0] sm:$0xff] }
 0x1ad   :  { %2881 = vmatpush1.msra.mxu0 %v2849_v34  ;;  %2952 = vmatpush1.msra.mxu1 %v2851_v61  ;;  %v3206_v59 = vld [vmem:[%s5154_s5 + $0x40] sm:$0xff]  ;;  %v3221_v34 = vld [vmem:[%s5154_s5 + $0xb8] sm:$0xff] }
 0x1ae   :  { %2882 = vmatprep.subr.mxu0 %v2846_v62  ;;  %2953 = vmatprep.subr.mxu1 %v2848_v63  ;;  %v3253_v61 = vld [vmem:[%s5154_s5 + $0x1b8] sm:$0xff] }
 0x1af   :  { %2883 = vmatpush1.msra.mxu0 %v2845_v1  ;;  %2954 = vmatpush1.msra.mxu1 %v2847_v2  ;;  %v3205_v62 = vld [vmem:[%s5154_s5 + $0x38] sm:$0xff]  ;;  %v3220_v1 = vld [vmem:[%s5154_s5 + $0xb0] sm:$0xff] }
 0x1b0   :  { %2884 = vmatprep.subr.mxu0 %v2842_v18  ;;  %2955 = vmatprep.subr.mxu1 %v2844_v4  ;;  %v3237_v63 = vld [vmem:[%s5154_s5 + $0x138] sm:$0xff]  ;;  %v3252_v2 = vld [vmem:[%s5154_s5 + $0x1b0] sm:$0xff] }
 0x1b1   :  { %2885 = vmatpush1.msra.mxu0 %v2841_v5  ;;  %2956 = vmatpush1.msra.mxu1 %v2843_v6  ;;  %v3204_v18 = vld [vmem:[%s5154_s5 + $0x30] sm:$0xff]  ;;  %v3219_v5 = vld [vmem:[%s5154_s5 + $0xa8] sm:$0xff] }
 0x1b2   :  { %2886 = vmatprep.subr.mxu0 %v2838_v54  ;;  %2957 = vmatprep.subr.mxu1 %v2840_v7  ;;  %v3236_v4 = vld [vmem:[%s5154_s5 + $0x130] sm:$0xff]  ;;  %v3251_v6 = vld [vmem:[%s5154_s5 + $0x1a8] sm:$0xff] }
 0x1b3   :  { %2887 = vmatpush1.msra.mxu0 %v2837_v8  ;;  %2920 = vmatprep.mubr.f32.mxu0 %v3649_v3  ;;  %v3203_v54 = vld [vmem:[%s5154_s5 + $0x28] sm:$0xff]  ;;  %v3218_v8 = vld [vmem:[%s5154_s5 + $0xa0] sm:$0xff] }
 0x1b4   :  { %2958 = vmatpush1.msra.mxu1 %v2839_v9  ;;  %2991 = vmatprep.mubr.f32.mxu1 %v3649_v3  ;;  %v3235_v7 = vld [vmem:[%s5154_s5 + $0x128] sm:$0xff]  ;;  %v3250_v9 = vld [vmem:[%s5154_s5 + $0x1a0] sm:$0xff] }
 0x1b5   :  { %3470 = vmatmul.mubr.msk.f32.vlgmr.msra.gmra.mxu0 %vm515_vm1, %v2836_v16  ;;  %3471 = vmatmul.mubr.msk.f32.vlgmr.msra.gmra.mxu1 %vm515_vm1, %v2836_v16  ;;  %v3217_v16 = vld [vmem:[%s5154_s5 + $0x98] sm:$0xff] }
 0x1b6   :  { %3046 = vmatprep.subr.mxu0 %v3016_v11  ;;  %3117 = vmatprep.subr.mxu1 %v3018_v12  ;;  %v3202_v11 = vld [vmem:[%s5154_s5 + $0x20] sm:$0xff] }
 0x1b7   :  { %3047 = vmatpush1.msra.mxu0 %v3015_v20  ;;  %3118 = vmatpush1.msra.mxu1 %v3017_v21  ;;  %v3234_v12 = vld [vmem:[%s5154_s5 + $0x120] sm:$0xff]  ;;  %v3249_v20 = vld [vmem:[%s5154_s5 + $0x198] sm:$0xff] }
 0x1b8   :  { %3048 = vmatprep.subr.mxu0 %v3012_v23  ;;  %3119 = vmatprep.subr.mxu1 %v3014_v38  ;;  %v3201_v21 = vld [vmem:[%s5154_s5 + $0x18] sm:$0xff]  ;;  %v3216_v38 = vld [vmem:[%s5154_s5 + $0x90] sm:$0xff] }
 0x1b9   :  { %3049 = vmatpush1.msra.mxu0 %v3011_v24  ;;  %3120 = vmatpush1.msra.mxu1 %v3013_v25  ;;  %v3233_v23 = vld [vmem:[%s5154_s5 + $0x118] sm:$0xff]  ;;  %v3248_v24 = vld [vmem:[%s5154_s5 + $0x190] sm:$0xff] }
 0x1ba   :  { %3050 = vmatprep.subr.mxu0 %v3008_v26  ;;  %3121 = vmatprep.subr.mxu1 %v3010_v27  ;;  %v3200_v25 = vld [vmem:[%s5154_s5 + $0x10] sm:$0xff]  ;;  %v3215_v27 = vld [vmem:[%s5154_s5 + $0x88] sm:$0xff] }
 0x1bb   :  { %3051 = vmatpush1.msra.mxu0 %v3007_v28  ;;  %3122 = vmatpush1.msra.mxu1 %v3009_v29  ;;  %v3232_v26 = vld [vmem:[%s5154_s5 + $0x110] sm:$0xff]  ;;  %v3247_v28 = vld [vmem:[%s5154_s5 + $0x188] sm:$0xff] }
 0x1bc   :  { %3052 = vmatprep.subr.mxu0 %v3004_v22  ;;  %3123 = vmatprep.subr.mxu1 %v3006_v51  ;;  %v3199_v29 = vld [vmem:[%s5154_s5 + $0x8] sm:$0xff]  ;;  %v3214_v51 = vld [vmem:[%s5154_s5 + $0x80] sm:$0xff] }
 0x1bd   :  { %3053 = vmatpush1.msra.mxu0 %v3003_v0  ;;  %3086 = vmatprep.mubr.f32.mxu0 %v3649_v3  ;;  %v3231_v22 = vld [vmem:[%s5154_s5 + $0x108] sm:$0xff]  ;;  %v3246_v0 = vld [vmem:[%s5154_s5 + $0x180] sm:$0xff] }
 0x1be   :  { %3124 = vmatpush1.msra.mxu1 %v3005_v10  ;;  %3157 = vmatprep.mubr.f32.mxu1 %v3649_v3  ;;  %v3245_v3 = vld [vmem:[%s5154_s5 + $0x178] sm:$0xff]  ;;  %v3198_v10 = vld [vmem:[%s5154_s5] sm:$0xff] }
 0x1bf   :  { %3472 = vmatmul.mubr.msk.f32.vlgmr.msra.gmra.mxu0 %vm515_vm1, %v3002_v31  ;;  %3473 = vmatmul.mubr.msk.f32.vlgmr.msra.gmra.mxu1 %vm515_vm1, %v3002_v31  ;;  %v3230_v31 = vld [vmem:[%s5154_s5 + $0x100] sm:$0xff] }
 0x1c0   :  { %3555 = vmatprep.subr.mxu0 %v3229_v32  ;;  %3590 = vmatprep.subr.mxu1 %v3261_v13 }
 0x1c1   :  { %3556 = vmatpush3.msra.mxu0 %v3213_v15  ;;  %3591 = vmatpush3.msra.mxu1 %v3245_v3 }
 0x1c2   :  { %3557 = vmatprep.subr.mxu0 %v3228_v36  ;;  %3592 = vmatprep.subr.mxu1 %v3260_v37 }
 0x1c3   :  { %3558 = vmatpush3.msra.mxu0 %v3212_v39  ;;  %3593 = vmatpush3.msra.mxu1 %v3244_v40 }
 0x1c4   :  { %3559 = vmatprep.subr.mxu0 %v3227_v41  ;;  %3594 = vmatprep.subr.mxu1 %v3259_v14 }
 0x1c5   :  { %3560 = vmatpush3.msra.mxu0 %v3211_v42  ;;  %3595 = vmatpush3.msra.mxu1 %v3243_v30 }
 0x1c6   :  { %3561 = vmatprep.subr.mxu0 %v3226_v43  ;;  %3596 = vmatprep.subr.mxu1 %v3258_v44 }
 0x1c7   :  { %3562 = vmatpush3.msra.mxu0 %v3210_v45  ;;  %3597 = vmatpush3.msra.mxu1 %v3242_v33 }
 0x1c8   :  { %3563 = vmatprep.subr.mxu0 %v3225_v35  ;;  %3598 = vmatprep.subr.mxu1 %v3257_v47 }
 0x1c9   :  { %3564 = vmatpush3.msra.mxu0 %v3209_v48  ;;  %3599 = vmatpush3.msra.mxu1 %v3241_v49 }
 0x1ca   :  { %3565 = vmatprep.subr.mxu0 %v3224_v50  ;;  %3600 = vmatprep.subr.mxu1 %v3256_v17 }
 0x1cb   :  { %3566 = vmatpush3.msra.mxu0 %v3208_v19  ;;  %3601 = vmatpush3.msra.mxu1 %v3240_v46 }
 0x1cc   :  { %3567 = vmatprep.subr.mxu0 %v3223_v53  ;;  %3602 = vmatprep.subr.mxu1 %v3255_v52 }
 0x1cd   :  { %3568 = vmatpush3.msra.mxu0 %v3207_v55  ;;  %3603 = vmatpush3.msra.mxu1 %v3239_v56 }
 0x1ce   :  { %3569 = vmatprep.subr.mxu0 %v3222_v57  ;;  %3604 = vmatprep.subr.mxu1 %v3254_v58 }
 0x1cf   :  { %3570 = vmatpush3.msra.mxu0 %v3206_v59  ;;  %3605 = vmatpush3.msra.mxu1 %v3238_v60 }
 0x1d0   :  { %3571 = vmatprep.subr.mxu0 %v3221_v34  ;;  %3606 = vmatprep.subr.mxu1 %v3253_v61 }
 0x1d1   :  { %3572 = vmatpush3.msra.mxu0 %v3205_v62  ;;  %3607 = vmatpush3.msra.mxu1 %v3237_v63 }
 0x1d2   :  { %3573 = vmatprep.subr.mxu0 %v3220_v1  ;;  %3608 = vmatprep.subr.mxu1 %v3252_v2 }
 0x1d3   :  { %3574 = vmatpush3.msra.mxu0 %v3204_v18  ;;  %3609 = vmatpush3.msra.mxu1 %v3236_v4 }
 0x1d4   :  { %3575 = vmatprep.subr.mxu0 %v3219_v5  ;;  %3610 = vmatprep.subr.mxu1 %v3251_v6 }
 0x1d5   :  { %3576 = vmatpush3.msra.mxu0 %v3203_v54  ;;  %3611 = vmatpush3.msra.mxu1 %v3235_v7 }
 0x1d6   :  { %3577 = vmatprep.subr.mxu0 %v3218_v8  ;;  %3612 = vmatprep.subr.mxu1 %v3250_v9 }
 0x1d7   :  { %3578 = vmatpush3.msra.mxu0 %v3202_v11  ;;  %3613 = vmatpush3.msra.mxu1 %v3234_v12 }
 0x1d8   :  { %3579 = vmatprep.subr.mxu0 %v3217_v16  ;;  %3614 = vmatprep.subr.mxu1 %v3249_v20 }
 0x1d9   :  { %3580 = vmatpush3.msra.mxu0 %v3201_v21  ;;  %3615 = vmatpush3.msra.mxu1 %v3233_v23 }
 0x1da   :  { %3581 = vmatprep.subr.mxu0 %v3216_v38  ;;  %3616 = vmatprep.subr.mxu1 %v3248_v24 }
 0x1db   :  { %3582 = vmatpush3.msra.mxu0 %v3200_v25  ;;  %3617 = vmatpush3.msra.mxu1 %v3232_v26 }
 0x1dc   :  { %3583 = vmatprep.subr.mxu0 %v3215_v27  ;;  %3618 = vmatprep.subr.mxu1 %v3247_v28 }
 0x1dd   :  { %3584 = vmatpush3.msra.mxu0 %v3199_v29  ;;  %3619 = vmatpush3.msra.mxu1 %v3231_v22 }
 0x1de   :  { %3585 = vmatprep.subr.mxu0 %v3214_v51  ;;  %3620 = vmatprep.subr.mxu1 %v3246_v0 }
 0x1df   :  { %3586 = vmatpush3.msra.mxu0 %v3198_v10  ;;  %3621 = vmatpush3.msra.mxu1 %v3230_v31 }
 0x1ea   :  { %v623_v32 = vpop.f32.mrf.mxu0  ;;  %v694_v13 = vpop.f32.mrf.mxu1 }
 0x1ec   :  { %v625_v15 = vpop.f32.mrf.mxu0  ;;  %v696_v3 = vpop.f32.mrf.mxu1 }
 0x1f3   :  { %v768_v36 = vpop.f32.mrf.mxu0  ;;  %v839_v37 = vpop.f32.mrf.mxu1 }
 0x1f4   :  { %v769_v54 = vadd.f32 %v768_v36, %v623_v32  ;;  %v840_v7 = vadd.f32 %v839_v37, %v694_v13 }
 0x1f5   :  { %v770_v39 = vpop.f32.mrf.mxu0  ;;  %v841_v40 = vpop.f32.mrf.mxu1 }
 0x1f6   :  { %v771_v11 = vadd.f32 %v770_v39, %v625_v15  ;;  %v842_v12 = vadd.f32 %v841_v40, %v696_v3 }
 0x1fd   :  { %v930_v41 = vpop.f32.mrf.mxu0  ;;  %v1001_v14 = vpop.f32.mrf.mxu1 }
 0x1fe   :  { %v1006_v16 = vadd.f32 %v930_v41, %v769_v54  ;;  %v1008_v20 = vadd.f32 %v1001_v14, %v840_v7 }
 0x1ff   :  { %v932_v42 = vpop.f32.mrf.mxu0  ;;  %v1003_v30 = vpop.f32.mrf.mxu1 }
 0x200   :  { %v1007_v38 = vadd.f32 %v932_v42, %v771_v11  ;;  %v1009_v24 = vadd.f32 %v1003_v30, %v842_v12 }
 0x207   :  { %v1096_v43 = vpop.f32.mrf.mxu0  ;;  %v1167_v44 = vpop.f32.mrf.mxu1 }
 0x208   :  { %v1172_v25 = vadd.f32 %v1096_v43, %v1006_v16  ;;  %v1174_v26 = vadd.f32 %v1167_v44, %v1008_v20 }
 0x209   :  { %v1098_v45 = vpop.f32.mrf.mxu0  ;;  %v1169_v33 = vpop.f32.mrf.mxu1 }
 0x20a   :  { %v1173_v27 = vadd.f32 %v1098_v45, %v1007_v38  ;;  %v1175_v28 = vadd.f32 %v1169_v33, %v1009_v24 }
 0x211   :  { %v1262_v35 = vpop.f32.mrf.mxu0  ;;  %v1333_v47 = vpop.f32.mrf.mxu1 }
 0x212   :  { %v1338_v29 = vadd.f32 %v1262_v35, %v1172_v25  ;;  %v1340_v22 = vadd.f32 %v1333_v47, %v1174_v26 }
 0x213   :  { %v1264_v48 = vpop.f32.mrf.mxu0  ;;  %v1335_v49 = vpop.f32.mrf.mxu1 }
 0x214   :  { %v1339_v10 = vadd.f32 %v1264_v48, %v1173_v27  ;;  %v1341_v31 = vadd.f32 %v1335_v49, %v1175_v28 }
 0x21b   :  { %v1428_v50 = vpop.f32.mrf.mxu0  ;;  %v1499_v17 = vpop.f32.mrf.mxu1 }
 0x21c   :  { %v1504_v32 = vadd.f32 %v1428_v50, %v1338_v29  ;;  %v1506_v13 = vadd.f32 %v1499_v17, %v1340_v22  ;;  %v3170_v50 = vlaneseq }
 0x21d   :  { %v1430_v19 = vpop.f32.mrf.mxu0  ;;  %v1501_v46 = vpop.f32.mrf.mxu1 }
 0x21e   :  { %v1505_v36 = vadd.f32 %v1430_v19, %v1339_v10  ;;  %v1507_v37 = vadd.f32 %v1501_v46, %v1341_v31 }
 0x225   :  { %v1594_v53 = vpop.f32.mrf.mxu0  ;;  %v1665_v52 = vpop.f32.mrf.mxu1 }
 0x226   :  { %v1670_v39 = vadd.f32 %v1594_v53, %v1504_v32  ;;  %v1672_v40 = vadd.f32 %v1665_v52, %v1506_v13 }
 0x227   :  { %v1596_v55 = vpop.f32.mrf.mxu0  ;;  %v1667_v56 = vpop.f32.mrf.mxu1 }
 0x228   :  { %v1671_v41 = vadd.f32 %v1596_v55, %v1505_v36  ;;  %v1673_v14 = vadd.f32 %v1667_v56, %v1507_v37 }
 0x22f   :  { %v1760_v57 = vpop.f32.mrf.mxu0  ;;  %v1831_v58 = vpop.f32.mrf.mxu1 }
 0x230   :  { %v1836_v42 = vadd.f32 %v1760_v57, %v1670_v39  ;;  %v1838_v30 = vadd.f32 %v1831_v58, %v1672_v40  ;;  %v3171_v58 = vshrl.u32 %v3170_v50, 7 }
 0x231   :  { %v1762_v59 = vpop.f32.mrf.mxu0  ;;  %v1833_v60 = vpop.f32.mrf.mxu1 }
 0x232   :  { %v1837_v45 = vadd.f32 %v1762_v59, %v1671_v41  ;;  %v1839_v33 = vadd.f32 %v1833_v60, %v1673_v14 }
 0x239   :  { %v1926_v34 = vpop.f32.mrf.mxu0  ;;  %v1997_v61 = vpop.f32.mrf.mxu1 }
 0x23a   :  { %v2002_v35 = vadd.f32 %v1926_v34, %v1836_v42  ;;  %v2004_v47 = vadd.f32 %v1997_v61, %v1838_v30 }
 0x23b   :  { %v1928_v62 = vpop.f32.mrf.mxu0  ;;  %v1999_v63 = vpop.f32.mrf.mxu1 }
 0x23c   :  { %v2003_v17 = vadd.f32 %v1928_v62, %v1837_v45  ;;  %v2005_v54 = vadd.f32 %v1999_v63, %v1839_v33  ;;  %v3172_v63 = vsub.s32 0, %v3171_v58 }
 0x243   :  { %v2092_v1 = vpop.f32.mrf.mxu0  ;;  %v2163_v2 = vpop.f32.mrf.mxu1 }
 0x244   :  { %v2168_v7 = vadd.f32 %v2092_v1, %v2002_v35  ;;  %v2170_v19 = vadd.f32 %v2163_v2, %v2004_v47  ;;  %v3180_v1 = vsub.s32 2, %v3171_v58  ;;  %v3176_v2 = vsub.s32 1, %v3171_v58  ;;  %v3474_v47 = vld [vmem:[%s5155_s6] ss:$0 sm:$0xff] }
 0x245   :  { %v2094_v18 = vpop.f32.mrf.mxu0  ;;  %v2165_v4 = vpop.f32.mrf.mxu1 }
 0x246   :  { %v2169_v46 = vadd.f32 %v2094_v18, %v2003_v17  ;;  %v2171_v53 = vadd.f32 %v2165_v4, %v2005_v54  ;;  %v3184_v18 = vsub.s32 3, %v3171_v58 }
 0x24d   :  { %v2258_v5 = vpop.f32.mrf.mxu0  ;;  %v2329_v6 = vpop.f32.mrf.mxu1 }
 0x24e   :  { %v2334_v52 = vadd.f32 %v2258_v5, %v2168_v7  ;;  %v2336_v55 = vadd.f32 %v2329_v6, %v2170_v19 }
 0x24f   :  { %v2260_v8 = vpop.f32.mrf.mxu0  ;;  %v2331_v9 = vpop.f32.mrf.mxu1 }
 0x250   :  { %v2335_v11 = vadd.f32 %v2260_v8, %v2169_v46  ;;  %v2337_v12 = vadd.f32 %v2331_v9, %v2171_v53  ;;  %v3168_v8 = vld [vmem:[%s5153_s4] sm:$0xf] }
 0x251   :  { %v3173_v29 = vrot.slane %v3168_v8, %v3172_v63  ;;  %v3185_v10 = vrot.slane %v3168_v8, %v3184_v18 }
 0x257   :  { %v2424_v21 = vpop.f32.mrf.mxu0  ;;  %v2495_v23 = vpop.f32.mrf.mxu1 }
 0x258   :  { %v2500_v59 = vadd.f32 %v2424_v21, %v2334_v52  ;;  %v2502_v60 = vadd.f32 %v2495_v23, %v2336_v55 }
 0x259   :  { %v2426_v51 = vpop.f32.mrf.mxu0  ;;  %v2497_v0 = vpop.f32.mrf.mxu1 }
 0x25a   :  { %v2501_v16 = vadd.f32 %v2426_v51, %v2335_v11  ;;  %v2503_v20 = vadd.f32 %v2497_v0, %v2337_v12  ;;  %v3181_v51 = vrot.slane %v3168_v8, %v3180_v1  ;;  %v3177_v0 = vrot.slane %v3168_v8, %v3176_v2 }
 0x261   :  { %v2590_v15 = vpop.f32.mrf.mxu0  ;;  %v2661_v3 = vpop.f32.mrf.mxu1 }
 0x262   :  { %v2666_v38 = vadd.f32 %v2590_v15, %v2500_v59  ;;  %v2668_v62 = vadd.f32 %v2661_v3, %v2502_v60 }
 0x263   :  { %v2592_v43 = vpop.f32.mrf.mxu0  ;;  %v2663_v44 = vpop.f32.mrf.mxu1 }
 0x264   :  { %v2667_v4 = vadd.f32 %v2592_v43, %v2501_v16  ;;  %v2669_v5 = vadd.f32 %v2663_v44, %v2503_v20 }
 0x26b   :  { %v2756_v48 = vpop.f32.mrf.mxu0  ;;  %v2827_v49 = vpop.f32.mrf.mxu1 }
 0x26c   :  { %v2832_v6 = vadd.f32 %v2756_v48, %v2666_v38  ;;  %v2834_v24 = vadd.f32 %v2827_v49, %v2668_v62 }
 0x26d   :  { %v2758_v56 = vpop.f32.mrf.mxu0  ;;  %v2829_v57 = vpop.f32.mrf.mxu1 }
 0x26e   :  { %v2833_v23 = vadd.f32 %v2758_v56, %v2667_v4  ;;  %v2835_v25 = vadd.f32 %v2829_v57, %v2669_v5 }
 0x275   :  { %v2922_v34 = vpop.f32.mrf.mxu0  ;;  %v2993_v61 = vpop.f32.mrf.mxu1 }
 0x276   :  { %v2998_v26 = vadd.f32 %v2922_v34, %v2832_v6  ;;  %v3000_v27 = vadd.f32 %v2993_v61, %v2834_v24 }
 0x277   :  { %v2924_v9 = vpop.f32.mrf.mxu0  ;;  %v2995_v21 = vpop.f32.mrf.mxu1 }
 0x278   :  { %v2999_v31 = vadd.f32 %v2924_v9, %v2833_v23  ;;  %v3001_v32 = vadd.f32 %v2995_v21, %v2835_v25 }
 0x27f   :  { %v3088_v28 = vpop.f32.mrf.mxu0  ;;  %v3159_v22 = vpop.f32.mrf.mxu1 }
 0x280   :  { %v3164_v13 = vadd.f32 %v3088_v28, %v2998_v26  ;;  %v3166_v15 = vadd.f32 %v3159_v22, %v3000_v27 }
 0x281   :  { %v3090_v3 = vpop.f32.mrf.mxu0  ;;  %v3161_v36 = vpop.f32.mrf.mxu1 }
 0x282   :  { %v3165_v37 = vadd.f32 %v3090_v3, %v2999_v31  ;;  %v3167_v39 = vadd.f32 %v3161_v36, %v3001_v32  ;;  %v3190_v40 = vadd.f32 %v3173_v29, %v3164_v13  ;;  %v3192_v41 = vadd.f32 %v3181_v51, %v3166_v15 }
 0x284   :  { %v3191_v14 = vadd.f32 %v3177_v0, %v3165_v37  ;;  %v3193_v42 = vadd.f32 %v3185_v10, %v3167_v39  ;;  %v3194_v44 = vmax.f32 %v3190_v40, 0.0  ;;  %v3196_v45 = vmax.f32 %v3192_v41, 0.0 }
 0x286   :  { %v3195_v30 = vmax.f32 %v3191_v14, 0.0  ;;  %v3197_v43 = vmax.f32 %v3193_v42, 0.0 }
 0x288   :  { %3333 = vmatprep.mubr.f32.mxu0 %v3195_v30  ;;  %3403 = vmatprep.mubr.f32.mxu1 %v3197_v43 }
 0x289   :  { %3334 = vmatmul.mubr.f32.vlgmr.msra.gmra.mxu0 %v3194_v44  ;;  %3404 = vmatmul.mubr.f32.vlgmr.msra.gmra.mxu1 %v3196_v45 }
 0x349   :  { %v3587_v33 = vpop.f32.mrf.mxu0  ;;  %v3622_v35 = vpop.f32.mrf.mxu1 }
 0x34b   :  { %v3588_v48 = vpop.f32.mrf.mxu0  ;;  %v3623_v49 = vpop.f32.mrf.mxu1 }
 0x34c   :  { %v3589_v50 = vadd.f32 %v3588_v48, %v3587_v33  ;;  %v3624_v54 = vadd.f32 %v3623_v49, %v3622_v35 }
 0x34e   :  { %v3336_v17 = vadd.f32 %v3589_v50, %v3474_v47 }
 0x350   :  { %v3406_v7 = vadd.f32 %v3624_v54, %v3336_v17 }
 0x352   :  { %3410 = vst.msk [vmem:[#allocation3] sm:$0x3] %vm3409_vm2, %v3406_v7 }
 0x353   :  { %3638 = shalt.err (!%p3635_p4)
}
 0x354   :  { %3420 = dma.vmem_to_hbm [thread:$0]  %s3418_s8, 32, %s5156_s7, [#allocation4]  }
 0x355   :  { %3647 = dma.done.wait [#allocation4], 32  }
 0x356   :  { %3648 = vsyncadd [#allocation4], 4294967264 }
 0x357   :  { %3424 = vsyncpa [#allocation4], 1 }

</bundles_post_ra>
